<compile_context>
chip_gen: v7x
topology: tpu7x:2x2x1
jax: 0.10.0
libtpu: 0.0.40
codegen_flags: <defaults>
</compile_context>

<pallas_src>
import math
from functools import partial

import jax
import jax.numpy as jnp
from jax import lax
from jax.experimental import pallas as pl
from jax.experimental.pallas import tpu as pltpu


def _gru_block_kernel(x_ref, h0_ref, wi_ref, wic_ref, wh_ref, bi_ref, bhn_ref,
                      wo_ref, bo_ref, out_ref, gi_scr):
    """Full GRU recurrence + readout for one block of BF = B*T rows.

    x_ref  : (bf_blk, S, D)   item embeddings for the whole slate (matmul dtype)
    h0_ref : (bf_blk, D)      initial hidden state (user embeddings), f32
    wi_ref : (D, 3D)          fused input->hidden weights (item half), [r|z|n]
    wic_ref: (D, 3D)          fused input->hidden weights (clicked half)
    wh_ref : (D, 3D)          fused hidden->hidden weights
    bi_ref : (1, 3D)          b_ih + [b_hh_r, b_hh_z, 0]            (f32)
    bhn_ref: (1, D)           b_hh_n (stays inside the r * (...) term)
    wo_ref : (1, D)           output projection row                 (f32)
    bo_ref : (1, 1) SMEM      output bias scalar
    out_ref: (bf_blk, S)      logits block (one HBM writeback per block)
    gi_scr : (bf_blk, S, 3D)  f32 scratch holding the hoisted input projection
    """
    bf_blk, S, D = x_ref.shape

    # ---- hoisted input projection: one big matmul over all slate positions ---
    x = x_ref[...]                                            # (bf, S, D)
    gi_flat = jnp.dot(x.reshape(bf_blk * S, D), wi_ref[...],
                      preferred_element_type=jnp.float32) + bi_ref[...]
    gi_scr[...] = gi_flat.reshape(bf_blk, S, 3 * D)

    # t == 0 feeds [x0, x0] to the GRU (no previous click); later steps feed
    # [x_t, 0] -> single extra matmul for the clicked half at position 0 only.
    x0 = x_ref[:, 0, :]                                       # (bf, D) strided vld
    gi0 = gi_scr[:, 0, :] + jnp.dot(x0, wic_ref[...],
                                    preferred_element_type=jnp.float32)

    wh = wh_ref[...]
    bhn = bhn_ref[...]
    wo = wo_ref[...]
    bo = bo_ref[0, 0]

    h = h0_ref[...].astype(jnp.float32)                       # (bf, D) f32

    # ---- sequential slate recurrence, statically unrolled (S is small) -------
    for t in range(S):
        gi_t = gi0 if t == 0 else gi_scr[:, t, :]             # (bf, 3D) f32
        gh = jnp.dot(h.astype(wh.dtype), wh,
                     preferred_element_type=jnp.float32)      # (bf, 3D)
        r = jax.nn.sigmoid(gi_t[:, 0 * D:1 * D] + gh[:, 0 * D:1 * D])
        z = jax.nn.sigmoid(gi_t[:, 1 * D:2 * D] + gh[:, 1 * D:2 * D])
        n = jnp.tanh(gi_t[:, 2 * D:3 * D] + r * (gh[:, 2 * D:3 * D] + bhn))
        h = (1.0 - z) * n + z * h

        # Linear(D, 1) readout as VPU multiply + lane reduction (no N=1 MXU
        # matmul); write the column straight into the resident output tile.
        y = jnp.sum(h * wo, axis=1, keepdims=True) + bo       # (bf, 1)
        out_ref[:, t:t + 1] = y


def _ceil_to(n, m):
    return -(-n // m) * m


def _padded_bytes(shape, dtype):
    """VMEM bytes for `shape` with lane (128) / sublane padding applied."""
    itemsize = jnp.dtype(dtype).itemsize
    sub = {4: 8, 2: 16, 1: 32}.get(itemsize, 8)
    dims = list(shape)
    dims[-1] = _ceil_to(dims[-1], 128)
    if len(dims) >= 2:
        dims[-2] = _ceil_to(dims[-2], sub)
    total = 1
    for d in dims:
        total *= d
    return total * itemsize


def _pick_bf_block(bf, max_block, min_blocks=2):
    """Largest multiple of 8 dividing BF, <= max_block, and (when BF allows)
    giving at least `min_blocks` blocks so both v7x TensorCores get work."""
    cap = min(max_block, bf)
    if bf >= min_blocks * 8:
        cap = min(cap, bf // min_blocks)
    cand = (cap // 8) * 8
    while cand >= 8:
        if bf % cand == 0:
            return cand
        cand -= 8
    return bf  # block equal to the full dim is always legal


@partial(jax.jit, static_argnames=("matmul_dtype", "max_bf_block", "bf_block"))
def neural_click_forward(item_embs, user_embs, params, *,
                         matmul_dtype=jnp.float32, max_bf_block=1024,
                         bf_block=None):
    """Pallas implementation of NeuralClickModel.forward (readout=None)."""
    B, T, S, D = item_embs.shape
    BF = B * T

    # Free reshapes only; single wrapper-side cast of the dominant input.
    x3 = item_embs.reshape(BF, S, D).astype(matmul_dtype)
    h0 = user_embs.reshape(BF, D).astype(jnp.float32)

    w_ih, w_hh = params["w_ih"], params["w_hh"]            # (3D, 2D), (3D, D)
    b_ih, b_hh = params["b_ih"], params["b_hh"]            # (3D,), (3D,)
    w_out, b_out = params["w_out"], params["b_out"]        # (1, D), (1,)

    wi = w_ih[:, :D].T.astype(matmul_dtype)                # (D, 3D) item half
    wic = w_ih[:, D:].T.astype(matmul_dtype)               # (D, 3D) clicked half
    wh = w_hh.T.astype(matmul_dtype)                       # (D, 3D)
    bi = (b_ih + jnp.concatenate([b_hh[:2 * D],
                                  jnp.zeros((D,), b_hh.dtype)])
          ).astype(jnp.float32).reshape(1, 3 * D)
    bhn = b_hh[2 * D:].astype(jnp.float32).reshape(1, D)
    wo = w_out.astype(jnp.float32).reshape(1, D)
    bo = b_out.astype(jnp.float32).reshape(1, 1)

    bf_blk = bf_block if bf_block is not None else _pick_bf_block(BF, max_bf_block)
    assert BF % bf_blk == 0, (BF, bf_blk)
    grid = (BF // bf_blk,)

    def const_map(i):
        return (0, 0)

    in_specs = [
        pl.BlockSpec((bf_blk, S, D), lambda i: (i, 0, 0)),          # x slab
        pl.BlockSpec((bf_blk, D), lambda i: (i, 0)),                # h0
        pl.BlockSpec((D, 3 * D), const_map),                        # wi
        pl.BlockSpec((D, 3 * D), const_map),                        # wic
        pl.BlockSpec((D, 3 * D), const_map),                        # wh
        pl.BlockSpec((1, 3 * D), const_map),                        # bi
        pl.BlockSpec((1, D), const_map),                            # bhn
        pl.BlockSpec((1, D), const_map),                            # wo
        pl.BlockSpec(memory_space=pltpu.MemorySpace.SMEM),          # bo scalar
    ]
    out_spec = pl.BlockSpec((bf_blk, S), lambda i: (i, 0))

    # VMEM budget with lane/sublane padding, double-buffered inputs/outputs,
    # the gi scratch, and headroom for live f32 gate temps.  Capped at 40 MiB
    # so it stays inside v7x's 64 MiB per-core VMEM.
    est = (2 * _padded_bytes((bf_blk, S, D), matmul_dtype)
           + 2 * _padded_bytes((bf_blk, D), jnp.float32)
           + 2 * _padded_bytes((bf_blk, S), jnp.float32)
           + 2 * (3 * _padded_bytes((D, 3 * D), matmul_dtype)
                  + _padded_bytes((1, 3 * D), jnp.float32)
                  + 2 * _padded_bytes((1, D), jnp.float32))
           + _padded_bytes((bf_blk, S, 3 * D), jnp.float32)
           + 6 * _padded_bytes((bf_blk, 3 * D), jnp.float32))
    vmem_limit = int(min(max(2 * est, 8 << 20), 40 << 20))

    y = pl.pallas_call(
        _gru_block_kernel,
        out_shape=jax.ShapeDtypeStruct((BF, S), jnp.float32),
        grid=grid,
        in_specs=in_specs,
        out_specs=out_spec,
        scratch_shapes=[pltpu.VMEM((bf_blk, S, 3 * D), jnp.float32)],
        compiler_params=pltpu.CompilerParams(
            dimension_semantics=("parallel",),
            vmem_limit_bytes=vmem_limit),
    )(x3, h0, wi, wic, wh, bi, bhn, wo, bo)

    return y.reshape(B, T, S)


def reference_forward(item_embs, user_embs, params):
    """Pure-JAX reference mirroring the PyTorch code (readout=None)."""
    B, T, S, D = item_embs.shape
    BF = B * T
    x = item_embs.reshape(BF, S, D)
    items = jnp.concatenate([x, x], axis=-1)                      # (BF, S, 2D)
    clicks = jnp.zeros((BF, S), jnp.float32)
    items = items.at[:, 1:, D:].multiply(clicks[:, :-1, None])
    h = user_embs.reshape(BF, D)

    w_ih, w_hh = params["w_ih"], params["w_hh"]
    b_ih, b_hh = params["b_ih"], params["b_hh"]
    w_out, b_out = params["w_out"], params["b_out"]

    ys = []
    for t in range(S):
        xt = items[:, t, :]
        gi = xt @ w_ih.T + b_ih
        gh = h @ w_hh.T + b_hh
        r = jax.nn.sigmoid(gi[:, :D] + gh[:, :D])
        z = jax.nn.sigmoid(gi[:, D:2 * D] + gh[:, D:2 * D])
        n = jnp.tanh(gi[:, 2 * D:] + r * gh[:, 2 * D:])
        h = (1.0 - z) * n + z * h
        ys.append(h @ w_out.T + b_out)                            # (BF, 1)
    y = jnp.concatenate(ys, axis=1)                               # (BF, S)
    return y.reshape(B, T, S)


if __name__ == "__main__":
    B, T, S, D = 2, 8, 8, 32          # batch, sessions, slate_size, embedding_dim
    key = jax.random.PRNGKey(0)
    ks = jax.random.split(key, 8)

    item_embs = jax.random.normal(ks[0], (B, T, S, D), jnp.float32)
    user_embs = jax.random.normal(ks[1], (B, T, D), jnp.float32)

    # Deterministic parameter init (PyTorch GRU/Linear shapes, U(-1/sqrt(D), 1/sqrt(D))).
    bound = 1.0 / math.sqrt(D)
    params = {
        "w_ih": jax.random.uniform(ks[2], (3 * D, 2 * D), jnp.float32, -bound, bound),
        "w_hh": jax.random.uniform(ks[3], (3 * D, D), jnp.float32, -bound, bound),
        "b_ih": jax.random.uniform(ks[4], (3 * D,), jnp.float32, -bound, bound),
        "b_hh": jax.random.uniform(ks[5], (3 * D,), jnp.float32, -bound, bound),
        "w_out": jax.random.uniform(ks[6], (1, D), jnp.float32, -bound, bound),
        "b_out": jax.random.uniform(ks[7], (1,), jnp.float32, -bound, bound),
    }

    y_ref = reference_forward(item_embs, user_embs, params)

    # f32 matmuls; BF=16 -> the block picker yields bf_blk=8, i.e. two blocks
    # along the "parallel" grid axis (exercises multi-block + megacore path).
    y = jax.block_until_ready(neural_click_forward(item_embs, user_embs, params))
    assert y.shape == (B, T, S), y.shape
    assert jnp.allclose(y, y_ref, atol=1e-5, rtol=1e-5), float(jnp.abs(y - y_ref).max())

    # bf16 matmul operands (v6e/v7x MXU/DMA path), f32 activations/accumulation.
    y_bf16 = jax.block_until_ready(
        neural_click_forward(item_embs, user_embs, params,
                             matmul_dtype=jnp.bfloat16))
    assert jnp.allclose(y_bf16, y_ref, atol=5e-2, rtol=5e-2), \
        float(jnp.abs(y_bf16 - y_ref).max())

    print("KERNEL_OK")
</pallas_src>

<mosaic_0001>
module attributes {stable_mosaic.version = 11 : i64} {
  func.func @_gru_block_kernel(%arg0: i32, %arg1: memref<8x8x32xf32, #tpu.memory_space<vmem>>, %arg2: memref<8x32xf32, #tpu.memory_space<vmem>>, %arg3: memref<32x96xf32, #tpu.memory_space<vmem>>, %arg4: memref<32x96xf32, #tpu.memory_space<vmem>>, %arg5: memref<32x96xf32, #tpu.memory_space<vmem>>, %arg6: memref<1x96xf32, #tpu.memory_space<vmem>>, %arg7: memref<1x32xf32, #tpu.memory_space<vmem>>, %arg8: memref<1x32xf32, #tpu.memory_space<vmem>>, %arg9: memref<1x1xf32, #tpu.memory_space<smem>>, %arg10: memref<8x8xf32, #tpu.memory_space<vmem>>, %arg11: memref<8x8x96xf32, #tpu.memory_space<vmem>>) attributes {dimension_semantics = [#tpu.dimension_semantics<parallel>], iteration_bounds = array<i64: 2>, scalar_prefetch = 0 : i64, scratch_operands = 1 : i64, tpu.core_type = #tpu.core_type<tc>, window_params = [{transform_indices = @transform_0, window_bounds = array<i64: 8, 8, 32>}, {transform_indices = @transform_1, window_bounds = array<i64: 8, 32>}, {pipeline_mode = #tpu.pipeline_mode<synchronous>, transform_indices = @transform_2, window_bounds = array<i64: 32, 96>}, {pipeline_mode = #tpu.pipeline_mode<synchronous>, transform_indices = @transform_3, window_bounds = array<i64: 32, 96>}, {pipeline_mode = #tpu.pipeline_mode<synchronous>, transform_indices = @transform_4, window_bounds = array<i64: 32, 96>}, {pipeline_mode = #tpu.pipeline_mode<synchronous>, transform_indices = @transform_5, window_bounds = array<i64: 1, 96>}, {pipeline_mode = #tpu.pipeline_mode<synchronous>, transform_indices = @transform_6, window_bounds = array<i64: 1, 32>}, {pipeline_mode = #tpu.pipeline_mode<synchronous>, transform_indices = @transform_7, window_bounds = array<i64: 1, 32>}, {transform_indices = @transform_8, window_bounds = array<i64: 1, 1>}, {transform_indices = @transform_9, window_bounds = array<i64: 8, 8>}]} {
    %c0 = arith.constant 0 : index
    %c0_0 = arith.constant 0 : index
    %c0_1 = arith.constant 0 : index
    %0 = vector.load %arg1[%c0, %c0_0, %c0_1] : memref<8x8x32xf32, #tpu.memory_space<vmem>>, vector<8x8x32xf32>
    %1 = vector.shape_cast %0 : vector<8x8x32xf32> to vector<64x32xf32>
    %c0_2 = arith.constant 0 : index
    %c0_3 = arith.constant 0 : index
    %2 = vector.load %arg3[%c0_2, %c0_3] : memref<32x96xf32, #tpu.memory_space<vmem>>, vector<32x96xf32>
    %cst = arith.constant dense<0.000000e+00> : vector<64x96xf32>
    %3 = tpu.matmul %1, %2, %cst {dimension_numbers = #tpu.dot_dimension_numbers<[1], [0], [0], [1], [0, 0, 1, 1], [], []>} : vector<64x32xf32>, vector<32x96xf32>, vector<64x96xf32> -> vector<64x96xf32>
    %c0_4 = arith.constant 0 : index
    %c0_5 = arith.constant 0 : index
    %4 = vector.load %arg6[%c0_4, %c0_5] : memref<1x96xf32, #tpu.memory_space<vmem>>, vector<1x96xf32>
    %5 = vector.broadcast %4 : vector<1x96xf32> to vector<64x96xf32>
    %6 = arith.addf %3, %5 : vector<64x96xf32>
    %7 = vector.shape_cast %6 : vector<64x96xf32> to vector<8x8x96xf32>
    %c0_6 = arith.constant 0 : index
    %c0_7 = arith.constant 0 : index
    %c0_8 = arith.constant 0 : index
    %8 = vector.load %arg11[%c0_6, %c0_7, %c0_8] : memref<8x8x96xf32, #tpu.memory_space<vmem>>, vector<8x8x96xf32>
    tpu.vector_store %arg11[%c0_6, %c0_7, %c0_8], %7 {strides = array<i32>} : memref<8x8x96xf32, #tpu.memory_space<vmem>>, vector<8x8x96xf32>,
    %c0_9 = arith.constant 0 : index
    %c0_10 = arith.constant 0 : index
    %c0_11 = arith.constant 0 : index
    %9 = vector.load %arg1[%c0_9, %c0_10, %c0_11] : memref<8x8x32xf32, #tpu.memory_space<vmem>>, vector<8x1x32xf32>
    %10 = vector.shape_cast %9 : vector<8x1x32xf32> to vector<8x32xf32>
    %c0_12 = arith.constant 0 : index
    %c0_13 = arith.constant 0 : index
    %c0_14 = arith.constant 0 : index
    %11 = vector.load %arg11[%c0_12, %c0_13, %c0_14] : memref<8x8x96xf32, #tpu.memory_space<vmem>>, vector<8x1x96xf32>
    %12 = vector.shape_cast %11 : vector<8x1x96xf32> to vector<8x96xf32>
    %c0_15 = arith.constant 0 : index
    %c0_16 = arith.constant 0 : index
    %13 = vector.load %arg4[%c0_15, %c0_16] : memref<32x96xf32, #tpu.memory_space<vmem>>, vector<32x96xf32>
    %cst_17 = arith.constant dense<0.000000e+00> : vector<8x96xf32>
    %14 = tpu.matmul %10, %13, %cst_17 {dimension_numbers = #tpu.dot_dimension_numbers<[1], [0], [0], [1], [0, 0, 1, 1], [], []>} : vector<8x32xf32>, vector<32x96xf32>, vector<8x96xf32> -> vector<8x96xf32>
    %15 = arith.addf %12, %14 : vector<8x96xf32>
    %c0_18 = arith.constant 0 : index
    %c0_19 = arith.constant 0 : index
    %16 = vector.load %arg5[%c0_18, %c0_19] : memref<32x96xf32, #tpu.memory_space<vmem>>, vector<32x96xf32>
    %c0_20 = arith.constant 0 : index
    %c0_21 = arith.constant 0 : index
    %17 = vector.load %arg7[%c0_20, %c0_21] : memref<1x32xf32, #tpu.memory_space<vmem>>, vector<1x32xf32>
    %c0_22 = arith.constant 0 : index
    %c0_23 = arith.constant 0 : index
    %18 = vector.load %arg8[%c0_22, %c0_23] : memref<1x32xf32, #tpu.memory_space<vmem>>, vector<1x32xf32>
    %c0_24 = arith.constant 0 : index
    %c0_25 = arith.constant 0 : index
    %19 = memref.load %arg9[%c0_24, %c0_25] : memref<1x1xf32, #tpu.memory_space<smem>>
    %c0_26 = arith.constant 0 : index
    %c0_27 = arith.constant 0 : index
    %20 = vector.load %arg2[%c0_26, %c0_27] : memref<8x32xf32, #tpu.memory_space<vmem>>, vector<8x32xf32>
    %cst_28 = arith.constant dense<0.000000e+00> : vector<8x96xf32>
    %21 = tpu.matmul %20, %16, %cst_28 {dimension_numbers = #tpu.dot_dimension_numbers<[1], [0], [0], [1], [0, 0, 1, 1], [], []>} : vector<8x32xf32>, vector<32x96xf32>, vector<8x96xf32> -> vector<8x96xf32>
    %22 = vector.extract_strided_slice %15 {offsets = [0, 0], sizes = [8, 32], strides = [1, 1]} : vector<8x96xf32> to vector<8x32xf32>
    %23 = vector.extract_strided_slice %21 {offsets = [0, 0], sizes = [8, 32], strides = [1, 1]} : vector<8x96xf32> to vector<8x32xf32>
    %24 = arith.addf %22, %23 : vector<8x32xf32>
    %25 = arith.negf %24 : vector<8x32xf32>
    %26 = math.exp %25 : vector<8x32xf32>
    %cst_29 = arith.constant 1.000000e+00 : f32
    %27 = vector.broadcast %cst_29 : f32 to vector<8x32xf32>
    %28 = arith.addf %27, %26 : vector<8x32xf32>
    %29 = arith.divf %27, %28 : vector<8x32xf32>
    %30 = vector.extract_strided_slice %15 {offsets = [0, 32], sizes = [8, 32], strides = [1, 1]} : vector<8x96xf32> to vector<8x32xf32>
    %31 = vector.extract_strided_slice %21 {offsets = [0, 32], sizes = [8, 32], strides = [1, 1]} : vector<8x96xf32> to vector<8x32xf32>
    %32 = arith.addf %30, %31 : vector<8x32xf32>
    %33 = arith.negf %32 : vector<8x32xf32>
    %34 = math.exp %33 : vector<8x32xf32>
    %cst_30 = arith.constant 1.000000e+00 : f32
    %35 = vector.broadcast %cst_30 : f32 to vector<8x32xf32>
    %36 = arith.addf %35, %34 : vector<8x32xf32>
    %37 = arith.divf %35, %36 : vector<8x32xf32>
    %38 = vector.extract_strided_slice %15 {offsets = [0, 64], sizes = [8, 32], strides = [1, 1]} : vector<8x96xf32> to vector<8x32xf32>
    %39 = vector.extract_strided_slice %21 {offsets = [0, 64], sizes = [8, 32], strides = [1, 1]} : vector<8x96xf32> to vector<8x32xf32>
    %40 = vector.broadcast %17 : vector<1x32xf32> to vector<8x32xf32>
    %41 = arith.addf %39, %40 : vector<8x32xf32>
    %42 = arith.mulf %29, %41 : vector<8x32xf32>
    %43 = arith.addf %38, %42 : vector<8x32xf32>
    %44 = math.tanh %43 : vector<8x32xf32>
    %cst_31 = arith.constant 1.000000e+00 : f32
    %45 = vector.broadcast %cst_31 : f32 to vector<8x32xf32>
    %46 = arith.subf %45, %37 : vector<8x32xf32>
    %47 = arith.mulf %46, %44 : vector<8x32xf32>
    %48 = arith.mulf %37, %20 : vector<8x32xf32>
    %49 = arith.addf %47, %48 : vector<8x32xf32>
    %50 = vector.broadcast %18 : vector<1x32xf32> to vector<8x32xf32>
    %51 = arith.mulf %49, %50 : vector<8x32xf32>
    %cst_32 = arith.constant dense<0.000000e+00> : vector<8xf32>
    %52 = vector.multi_reduction <add>, %51, %cst_32 [1] : vector<8x32xf32> to vector<8xf32>
    %53 = vector.shape_cast %52 : vector<8xf32> to vector<8x1xf32>
    %54 = vector.broadcast %19 : f32 to vector<8x1xf32>
    %55 = arith.addf %53, %54 : vector<8x1xf32>
    %c0_33 = arith.constant 0 : index
    %c0_34 = arith.constant 0 : index
    %56 = vector.load %arg10[%c0_33, %c0_34] : memref<8x8xf32, #tpu.memory_space<vmem>>, vector<8x1xf32>
    tpu.vector_store %arg10[%c0_33, %c0_34], %55 {strides = array<i32>} : memref<8x8xf32, #tpu.memory_space<vmem>>, vector<8x1xf32>,
    %c0_35 = arith.constant 0 : index
    %c1 = arith.constant 1 : index
    %c0_36 = arith.constant 0 : index
    %57 = vector.load %arg11[%c0_35, %c1, %c0_36] : memref<8x8x96xf32, #tpu.memory_space<vmem>>, vector<8x1x96xf32>
    %58 = vector.shape_cast %57 : vector<8x1x96xf32> to vector<8x96xf32>
    %cst_37 = arith.constant dense<0.000000e+00> : vector<8x96xf32>
    %59 = tpu.matmul %49, %16, %cst_37 {dimension_numbers = #tpu.dot_dimension_numbers<[1], [0], [0], [1], [0, 0, 1, 1], [], []>} : vector<8x32xf32>, vector<32x96xf32>, vector<8x96xf32> -> vector<8x96xf32>
    %60 = vector.extract_strided_slice %58 {offsets = [0, 0], sizes = [8, 32], strides = [1, 1]} : vector<8x96xf32> to vector<8x32xf32>
    %61 = vector.extract_strided_slice %59 {offsets = [0, 0], sizes = [8, 32], strides = [1, 1]} : vector<8x96xf32> to vector<8x32xf32>
    %62 = arith.addf %60, %61 : vector<8x32xf32>
    %63 = arith.negf %62 : vector<8x32xf32>
    %64 = math.exp %63 : vector<8x32xf32>
    %cst_38 = arith.constant 1.000000e+00 : f32
    %65 = vector.broadcast %cst_38 : f32 to vector<8x32xf32>
    %66 = arith.addf %65, %64 : vector<8x32xf32>
    %67 = arith.divf %65, %66 : vector<8x32xf32>
    %68 = vector.extract_strided_slice %58 {offsets = [0, 32], sizes = [8, 32], strides = [1, 1]} : vector<8x96xf32> to vector<8x32xf32>
    %69 = vector.extract_strided_slice %59 {offsets = [0, 32], sizes = [8, 32], strides = [1, 1]} : vector<8x96xf32> to vector<8x32xf32>
    %70 = arith.addf %68, %69 : vector<8x32xf32>
    %71 = arith.negf %70 : vector<8x32xf32>
    %72 = math.exp %71 : vector<8x32xf32>
    %cst_39 = arith.constant 1.000000e+00 : f32
    %73 = vector.broadcast %cst_39 : f32 to vector<8x32xf32>
    %74 = arith.addf %73, %72 : vector<8x32xf32>
    %75 = arith.divf %73, %74 : vector<8x32xf32>
    %76 = vector.extract_strided_slice %58 {offsets = [0, 64], sizes = [8, 32], strides = [1, 1]} : vector<8x96xf32> to vector<8x32xf32>
    %77 = vector.extract_strided_slice %59 {offsets = [0, 64], sizes = [8, 32], strides = [1, 1]} : vector<8x96xf32> to vector<8x32xf32>
    %78 = vector.broadcast %17 : vector<1x32xf32> to vector<8x32xf32>
    %79 = arith.addf %77, %78 : vector<8x32xf32>
    %80 = arith.mulf %67, %79 : vector<8x32xf32>
    %81 = arith.addf %76, %80 : vector<8x32xf32>
    %82 = math.tanh %81 : vector<8x32xf32>
    %cst_40 = arith.constant 1.000000e+00 : f32
    %83 = vector.broadcast %cst_40 : f32 to vector<8x32xf32>
    %84 = arith.subf %83, %75 : vector<8x32xf32>
    %85 = arith.mulf %84, %82 : vector<8x32xf32>
    %86 = arith.mulf %75, %49 : vector<8x32xf32>
    %87 = arith.addf %85, %86 : vector<8x32xf32>
    %88 = vector.broadcast %18 : vector<1x32xf32> to vector<8x32xf32>
    %89 = arith.mulf %87, %88 : vector<8x32xf32>
    %cst_41 = arith.constant dense<0.000000e+00> : vector<8xf32>
    %90 = vector.multi_reduction <add>, %89, %cst_41 [1] : vector<8x32xf32> to vector<8xf32>
    %91 = vector.shape_cast %90 : vector<8xf32> to vector<8x1xf32>
    %92 = vector.broadcast %19 : f32 to vector<8x1xf32>
    %93 = arith.addf %91, %92 : vector<8x1xf32>
    %c0_42 = arith.constant 0 : index
    %c1_43 = arith.constant 1 : index
    %94 = vector.load %arg10[%c0_42, %c1_43] : memref<8x8xf32, #tpu.memory_space<vmem>>, vector<8x1xf32>
    tpu.vector_store %arg10[%c0_42, %c1_43], %93 {strides = array<i32>} : memref<8x8xf32, #tpu.memory_space<vmem>>, vector<8x1xf32>,
    %c0_44 = arith.constant 0 : index
    %c2 = arith.constant 2 : index
    %c0_45 = arith.constant 0 : index
    %95 = vector.load %arg11[%c0_44, %c2, %c0_45] : memref<8x8x96xf32, #tpu.memory_space<vmem>>, vector<8x1x96xf32>
    %96 = vector.shape_cast %95 : vector<8x1x96xf32> to vector<8x96xf32>
    %cst_46 = arith.constant dense<0.000000e+00> : vector<8x96xf32>
    %97 = tpu.matmul %87, %16, %cst_46 {dimension_numbers = #tpu.dot_dimension_numbers<[1], [0], [0], [1], [0, 0, 1, 1], [], []>} : vector<8x32xf32>, vector<32x96xf32>, vector<8x96xf32> -> vector<8x96xf32>
    %98 = vector.extract_strided_slice %96 {offsets = [0, 0], sizes = [8, 32], strides = [1, 1]} : vector<8x96xf32> to vector<8x32xf32>
    %99 = vector.extract_strided_slice %97 {offsets = [0, 0], sizes = [8, 32], strides = [1, 1]} : vector<8x96xf32> to vector<8x32xf32>
    %100 = arith.addf %98, %99 : vector<8x32xf32>
    %101 = arith.negf %100 : vector<8x32xf32>
    %102 = math.exp %101 : vector<8x32xf32>
    %cst_47 = arith.constant 1.000000e+00 : f32
    %103 = vector.broadcast %cst_47 : f32 to vector<8x32xf32>
    %104 = arith.addf %103, %102 : vector<8x32xf32>
    %105 = arith.divf %103, %104 : vector<8x32xf32>
    %106 = vector.extract_strided_slice %96 {offsets = [0, 32], sizes = [8, 32], strides = [1, 1]} : vector<8x96xf32> to vector<8x32xf32>
    %107 = vector.extract_strided_slice %97 {offsets = [0, 32], sizes = [8, 32], strides = [1, 1]} : vector<8x96xf32> to vector<8x32xf32>
    %108 = arith.addf %106, %107 : vector<8x32xf32>
    %109 = arith.negf %108 : vector<8x32xf32>
    %110 = math.exp %109 : vector<8x32xf32>
    %cst_48 = arith.constant 1.000000e+00 : f32
    %111 = vector.broadcast %cst_48 : f32 to vector<8x32xf32>
    %112 = arith.addf %111, %110 : vector<8x32xf32>
    %113 = arith.divf %111, %112 : vector<8x32xf32>
    %114 = vector.extract_strided_slice %96 {offsets = [0, 64], sizes = [8, 32], strides = [1, 1]} : vector<8x96xf32> to vector<8x32xf32>
    %115 = vector.extract_strided_slice %97 {offsets = [0, 64], sizes = [8, 32], strides = [1, 1]} : vector<8x96xf32> to vector<8x32xf32>
    %116 = vector.broadcast %17 : vector<1x32xf32> to vector<8x32xf32>
    %117 = arith.addf %115, %116 : vector<8x32xf32>
    %118 = arith.mulf %105, %117 : vector<8x32xf32>
    %119 = arith.addf %114, %118 : vector<8x32xf32>
    %120 = math.tanh %119 : vector<8x32xf32>
    %cst_49 = arith.constant 1.000000e+00 : f32
    %121 = vector.broadcast %cst_49 : f32 to vector<8x32xf32>
    %122 = arith.subf %121, %113 : vector<8x32xf32>
    %123 = arith.mulf %122, %120 : vector<8x32xf32>
    %124 = arith.mulf %113, %87 : vector<8x32xf32>
    %125 = arith.addf %123, %124 : vector<8x32xf32>
    %126 = vector.broadcast %18 : vector<1x32xf32> to vector<8x32xf32>
    %127 = arith.mulf %125, %126 : vector<8x32xf32>
    %cst_50 = arith.constant dense<0.000000e+00> : vector<8xf32>
    %128 = vector.multi_reduction <add>, %127, %cst_50 [1] : vector<8x32xf32> to vector<8xf32>
    %129 = vector.shape_cast %128 : vector<8xf32> to vector<8x1xf32>
    %130 = vector.broadcast %19 : f32 to vector<8x1xf32>
    %131 = arith.addf %129, %130 : vector<8x1xf32>
    %c0_51 = arith.constant 0 : index
    %c2_52 = arith.constant 2 : index
    %132 = vector.load %arg10[%c0_51, %c2_52] : memref<8x8xf32, #tpu.memory_space<vmem>>, vector<8x1xf32>
    tpu.vector_store %arg10[%c0_51, %c2_52], %131 {strides = array<i32>} : memref<8x8xf32, #tpu.memory_space<vmem>>, vector<8x1xf32>,
    %c0_53 = arith.constant 0 : index
    %c3 = arith.constant 3 : index
    %c0_54 = arith.constant 0 : index
    %133 = vector.load %arg11[%c0_53, %c3, %c0_54] : memref<8x8x96xf32, #tpu.memory_space<vmem>>, vector<8x1x96xf32>
    %134 = vector.shape_cast %133 : vector<8x1x96xf32> to vector<8x96xf32>
    %cst_55 = arith.constant dense<0.000000e+00> : vector<8x96xf32>
    %135 = tpu.matmul %125, %16, %cst_55 {dimension_numbers = #tpu.dot_dimension_numbers<[1], [0], [0], [1], [0, 0, 1, 1], [], []>} : vector<8x32xf32>, vector<32x96xf32>, vector<8x96xf32> -> vector<8x96xf32>
    %136 = vector.extract_strided_slice %134 {offsets = [0, 0], sizes = [8, 32], strides = [1, 1]} : vector<8x96xf32> to vector<8x32xf32>
    %137 = vector.extract_strided_slice %135 {offsets = [0, 0], sizes = [8, 32], strides = [1, 1]} : vector<8x96xf32> to vector<8x32xf32>
    %138 = arith.addf %136, %137 : vector<8x32xf32>
    %139 = arith.negf %138 : vector<8x32xf32>
    %140 = math.exp %139 : vector<8x32xf32>
    %cst_56 = arith.constant 1.000000e+00 : f32
    %141 = vector.broadcast %cst_56 : f32 to vector<8x32xf32>
    %142 = arith.addf %141, %140 : vector<8x32xf32>
    %143 = arith.divf %141, %142 : vector<8x32xf32>
    %144 = vector.extract_strided_slice %134 {offsets = [0, 32], sizes = [8, 32], strides = [1, 1]} : vector<8x96xf32> to vector<8x32xf32>
    %145 = vector.extract_strided_slice %135 {offsets = [0, 32], sizes = [8, 32], strides = [1, 1]} : vector<8x96xf32> to vector<8x32xf32>
    %146 = arith.addf %144, %145 : vector<8x32xf32>
    %147 = arith.negf %146 : vector<8x32xf32>
    %148 = math.exp %147 : vector<8x32xf32>
    %cst_57 = arith.constant 1.000000e+00 : f32
    %149 = vector.broadcast %cst_57 : f32 to vector<8x32xf32>
    %150 = arith.addf %149, %148 : vector<8x32xf32>
    %151 = arith.divf %149, %150 : vector<8x32xf32>
    %152 = vector.extract_strided_slice %134 {offsets = [0, 64], sizes = [8, 32], strides = [1, 1]} : vector<8x96xf32> to vector<8x32xf32>
    %153 = vector.extract_strided_slice %135 {offsets = [0, 64], sizes = [8, 32], strides = [1, 1]} : vector<8x96xf32> to vector<8x32xf32>
    %154 = vector.broadcast %17 : vector<1x32xf32> to vector<8x32xf32>
    %155 = arith.addf %153, %154 : vector<8x32xf32>
    %156 = arith.mulf %143, %155 : vector<8x32xf32>
    %157 = arith.addf %152, %156 : vector<8x32xf32>
    %158 = math.tanh %157 : vector<8x32xf32>
    %cst_58 = arith.constant 1.000000e+00 : f32
    %159 = vector.broadcast %cst_58 : f32 to vector<8x32xf32>
    %160 = arith.subf %159, %151 : vector<8x32xf32>
    %161 = arith.mulf %160, %158 : vector<8x32xf32>
    %162 = arith.mulf %151, %125 : vector<8x32xf32>
    %163 = arith.addf %161, %162 : vector<8x32xf32>
    %164 = vector.broadcast %18 : vector<1x32xf32> to vector<8x32xf32>
    %165 = arith.mulf %163, %164 : vector<8x32xf32>
    %cst_59 = arith.constant dense<0.000000e+00> : vector<8xf32>
    %166 = vector.multi_reduction <add>, %165, %cst_59 [1] : vector<8x32xf32> to vector<8xf32>
    %167 = vector.shape_cast %166 : vector<8xf32> to vector<8x1xf32>
    %168 = vector.broadcast %19 : f32 to vector<8x1xf32>
    %169 = arith.addf %167, %168 : vector<8x1xf32>
    %c0_60 = arith.constant 0 : index
    %c3_61 = arith.constant 3 : index
    %170 = vector.load %arg10[%c0_60, %c3_61] : memref<8x8xf32, #tpu.memory_space<vmem>>, vector<8x1xf32>
    tpu.vector_store %arg10[%c0_60, %c3_61], %169 {strides = array<i32>} : memref<8x8xf32, #tpu.memory_space<vmem>>, vector<8x1xf32>,
    %c0_62 = arith.constant 0 : index
    %c4 = arith.constant 4 : index
    %c0_63 = arith.constant 0 : index
    %171 = vector.load %arg11[%c0_62, %c4, %c0_63] : memref<8x8x96xf32, #tpu.memory_space<vmem>>, vector<8x1x96xf32>
    %172 = vector.shape_cast %171 : vector<8x1x96xf32> to vector<8x96xf32>
    %cst_64 = arith.constant dense<0.000000e+00> : vector<8x96xf32>
    %173 = tpu.matmul %163, %16, %cst_64 {dimension_numbers = #tpu.dot_dimension_numbers<[1], [0], [0], [1], [0, 0, 1, 1], [], []>} : vector<8x32xf32>, vector<32x96xf32>, vector<8x96xf32> -> vector<8x96xf32>
    %174 = vector.extract_strided_slice %172 {offsets = [0, 0], sizes = [8, 32], strides = [1, 1]} : vector<8x96xf32> to vector<8x32xf32>
    %175 = vector.extract_strided_slice %173 {offsets = [0, 0], sizes = [8, 32], strides = [1, 1]} : vector<8x96xf32> to vector<8x32xf32>
    %176 = arith.addf %174, %175 : vector<8x32xf32>
    %177 = arith.negf %176 : vector<8x32xf32>
    %178 = math.exp %177 : vector<8x32xf32>
    %cst_65 = arith.constant 1.000000e+00 : f32
    %179 = vector.broadcast %cst_65 : f32 to vector<8x32xf32>
    %180 = arith.addf %179, %178 : vector<8x32xf32>
    %181 = arith.divf %179, %180 : vector<8x32xf32>
    %182 = vector.extract_strided_slice %172 {offsets = [0, 32], sizes = [8, 32], strides = [1, 1]} : vector<8x96xf32> to vector<8x32xf32>
    %183 = vector.extract_strided_slice %173 {offsets = [0, 32], sizes = [8, 32], strides = [1, 1]} : vector<8x96xf32> to vector<8x32xf32>
    %184 = arith.addf %182, %183 : vector<8x32xf32>
    %185 = arith.negf %184 : vector<8x32xf32>
    %186 = math.exp %185 : vector<8x32xf32>
    %cst_66 = arith.constant 1.000000e+00 : f32
    %187 = vector.broadcast %cst_66 : f32 to vector<8x32xf32>
    %188 = arith.addf %187, %186 : vector<8x32xf32>
    %189 = arith.divf %187, %188 : vector<8x32xf32>
    %190 = vector.extract_strided_slice %172 {offsets = [0, 64], sizes = [8, 32], strides = [1, 1]} : vector<8x96xf32> to vector<8x32xf32>
    %191 = vector.extract_strided_slice %173 {offsets = [0, 64], sizes = [8, 32], strides = [1, 1]} : vector<8x96xf32> to vector<8x32xf32>
    %192 = vector.broadcast %17 : vector<1x32xf32> to vector<8x32xf32>
    %193 = arith.addf %191, %192 : vector<8x32xf32>
    %194 = arith.mulf %181, %193 : vector<8x32xf32>
    %195 = arith.addf %190, %194 : vector<8x32xf32>
    %196 = math.tanh %195 : vector<8x32xf32>
    %cst_67 = arith.constant 1.000000e+00 : f32
    %197 = vector.broadcast %cst_67 : f32 to vector<8x32xf32>
    %198 = arith.subf %197, %189 : vector<8x32xf32>
    %199 = arith.mulf %198, %196 : vector<8x32xf32>
    %200 = arith.mulf %189, %163 : vector<8x32xf32>
    %201 = arith.addf %199, %200 : vector<8x32xf32>
    %202 = vector.broadcast %18 : vector<1x32xf32> to vector<8x32xf32>
    %203 = arith.mulf %201, %202 : vector<8x32xf32>
    %cst_68 = arith.constant dense<0.000000e+00> : vector<8xf32>
    %204 = vector.multi_reduction <add>, %203, %cst_68 [1] : vector<8x32xf32> to vector<8xf32>
    %205 = vector.shape_cast %204 : vector<8xf32> to vector<8x1xf32>
    %206 = vector.broadcast %19 : f32 to vector<8x1xf32>
    %207 = arith.addf %205, %206 : vector<8x1xf32>
    %c0_69 = arith.constant 0 : index
    %c4_70 = arith.constant 4 : index
    %208 = vector.load %arg10[%c0_69, %c4_70] : memref<8x8xf32, #tpu.memory_space<vmem>>, vector<8x1xf32>
    tpu.vector_store %arg10[%c0_69, %c4_70], %207 {strides = array<i32>} : memref<8x8xf32, #tpu.memory_space<vmem>>, vector<8x1xf32>,
    %c0_71 = arith.constant 0 : index
    %c5 = arith.constant 5 : index
    %c0_72 = arith.constant 0 : index
    %209 = vector.load %arg11[%c0_71, %c5, %c0_72] : memref<8x8x96xf32, #tpu.memory_space<vmem>>, vector<8x1x96xf32>
    %210 = vector.shape_cast %209 : vector<8x1x96xf32> to vector<8x96xf32>
    %cst_73 = arith.constant dense<0.000000e+00> : vector<8x96xf32>
    %211 = tpu.matmul %201, %16, %cst_73 {dimension_numbers = #tpu.dot_dimension_numbers<[1], [0], [0], [1], [0, 0, 1, 1], [], []>} : vector<8x32xf32>, vector<32x96xf32>, vector<8x96xf32> -> vector<8x96xf32>
    %212 = vector.extract_strided_slice %210 {offsets = [0, 0], sizes = [8, 32], strides = [1, 1]} : vector<8x96xf32> to vector<8x32xf32>
    %213 = vector.extract_strided_slice %211 {offsets = [0, 0], sizes = [8, 32], strides = [1, 1]} : vector<8x96xf32> to vector<8x32xf32>
    %214 = arith.addf %212, %213 : vector<8x32xf32>
    %215 = arith.negf %214 : vector<8x32xf32>
    %216 = math.exp %215 : vector<8x32xf32>
    %cst_74 = arith.constant 1.000000e+00 : f32
    %217 = vector.broadcast %cst_74 : f32 to vector<8x32xf32>
    %218 = arith.addf %217, %216 : vector<8x32xf32>
    %219 = arith.divf %217, %218 : vector<8x32xf32>
    %220 = vector.extract_strided_slice %210 {offsets = [0, 32], sizes = [8, 32], strides = [1, 1]} : vector<8x96xf32> to vector<8x32xf32>
    %221 = vector.extract_strided_slice %211 {offsets = [0, 32], sizes = [8, 32], strides = [1, 1]} : vector<8x96xf32> to vector<8x32xf32>
    %222 = arith.addf %220, %221 : vector<8x32xf32>
    %223 = arith.negf %222 : vector<8x32xf32>
    %224 = math.exp %223 : vector<8x32xf32>
    %cst_75 = arith.constant 1.000000e+00 : f32
    %225 = vector.broadcast %cst_75 : f32 to vector<8x32xf32>
    %226 = arith.addf %225, %224 : vector<8x32xf32>
    %227 = arith.divf %225, %226 : vector<8x32xf32>
    %228 = vector.extract_strided_slice %210 {offsets = [0, 64], sizes = [8, 32], strides = [1, 1]} : vector<8x96xf32> to vector<8x32xf32>
    %229 = vector.extract_strided_slice %211 {offsets = [0, 64], sizes = [8, 32], strides = [1, 1]} : vector<8x96xf32> to vector<8x32xf32>
    %230 = vector.broadcast %17 : vector<1x32xf32> to vector<8x32xf32>
    %231 = arith.addf %229, %230 : vector<8x32xf32>
    %232 = arith.mulf %219, %231 : vector<8x32xf32>
    %233 = arith.addf %228, %232 : vector<8x32xf32>
    %234 = math.tanh %233 : vector<8x32xf32>
    %cst_76 = arith.constant 1.000000e+00 : f32
    %235 = vector.broadcast %cst_76 : f32 to vector<8x32xf32>
    %236 = arith.subf %235, %227 : vector<8x32xf32>
    %237 = arith.mulf %236, %234 : vector<8x32xf32>
    %238 = arith.mulf %227, %201 : vector<8x32xf32>
    %239 = arith.addf %237, %238 : vector<8x32xf32>
    %240 = vector.broadcast %18 : vector<1x32xf32> to vector<8x32xf32>
    %241 = arith.mulf %239, %240 : vector<8x32xf32>
    %cst_77 = arith.constant dense<0.000000e+00> : vector<8xf32>
    %242 = vector.multi_reduction <add>, %241, %cst_77 [1] : vector<8x32xf32> to vector<8xf32>
    %243 = vector.shape_cast %242 : vector<8xf32> to vector<8x1xf32>
    %244 = vector.broadcast %19 : f32 to vector<8x1xf32>
    %245 = arith.addf %243, %244 : vector<8x1xf32>
    %c0_78 = arith.constant 0 : index
    %c5_79 = arith.constant 5 : index
    %246 = vector.load %arg10[%c0_78, %c5_79] : memref<8x8xf32, #tpu.memory_space<vmem>>, vector<8x1xf32>
    tpu.vector_store %arg10[%c0_78, %c5_79], %245 {strides = array<i32>} : memref<8x8xf32, #tpu.memory_space<vmem>>, vector<8x1xf32>,
    %c0_80 = arith.constant 0 : index
    %c6 = arith.constant 6 : index
    %c0_81 = arith.constant 0 : index
    %247 = vector.load %arg11[%c0_80, %c6, %c0_81] : memref<8x8x96xf32, #tpu.memory_space<vmem>>, vector<8x1x96xf32>
    %248 = vector.shape_cast %247 : vector<8x1x96xf32> to vector<8x96xf32>
    %cst_82 = arith.constant dense<0.000000e+00> : vector<8x96xf32>
    %249 = tpu.matmul %239, %16, %cst_82 {dimension_numbers = #tpu.dot_dimension_numbers<[1], [0], [0], [1], [0, 0, 1, 1], [], []>} : vector<8x32xf32>, vector<32x96xf32>, vector<8x96xf32> -> vector<8x96xf32>
    %250 = vector.extract_strided_slice %248 {offsets = [0, 0], sizes = [8, 32], strides = [1, 1]} : vector<8x96xf32> to vector<8x32xf32>
    %251 = vector.extract_strided_slice %249 {offsets = [0, 0], sizes = [8, 32], strides = [1, 1]} : vector<8x96xf32> to vector<8x32xf32>
    %252 = arith.addf %250, %251 : vector<8x32xf32>
    %253 = arith.negf %252 : vector<8x32xf32>
    %254 = math.exp %253 : vector<8x32xf32>
    %cst_83 = arith.constant 1.000000e+00 : f32
    %255 = vector.broadcast %cst_83 : f32 to vector<8x32xf32>
    %256 = arith.addf %255, %254 : vector<8x32xf32>
    %257 = arith.divf %255, %256 : vector<8x32xf32>
    %258 = vector.extract_strided_slice %248 {offsets = [0, 32], sizes = [8, 32], strides = [1, 1]} : vector<8x96xf32> to vector<8x32xf32>
    %259 = vector.extract_strided_slice %249 {offsets = [0, 32], sizes = [8, 32], strides = [1, 1]} : vector<8x96xf32> to vector<8x32xf32>
    %260 = arith.addf %258, %259 : vector<8x32xf32>
    %261 = arith.negf %260 : vector<8x32xf32>
    %262 = math.exp %261 : vector<8x32xf32>
    %cst_84 = arith.constant 1.000000e+00 : f32
    %263 = vector.broadcast %cst_84 : f32 to vector<8x32xf32>
    %264 = arith.addf %263, %262 : vector<8x32xf32>
    %265 = arith.divf %263, %264 : vector<8x32xf32>
    %266 = vector.extract_strided_slice %248 {offsets = [0, 64], sizes = [8, 32], strides = [1, 1]} : vector<8x96xf32> to vector<8x32xf32>
    %267 = vector.extract_strided_slice %249 {offsets = [0, 64], sizes = [8, 32], strides = [1, 1]} : vector<8x96xf32> to vector<8x32xf32>
    %268 = vector.broadcast %17 : vector<1x32xf32> to vector<8x32xf32>
    %269 = arith.addf %267, %268 : vector<8x32xf32>
    %270 = arith.mulf %257, %269 : vector<8x32xf32>
    %271 = arith.addf %266, %270 : vector<8x32xf32>
    %272 = math.tanh %271 : vector<8x32xf32>
    %cst_85 = arith.constant 1.000000e+00 : f32
    %273 = vector.broadcast %cst_85 : f32 to vector<8x32xf32>
    %274 = arith.subf %273, %265 : vector<8x32xf32>
    %275 = arith.mulf %274, %272 : vector<8x32xf32>
    %276 = arith.mulf %265, %239 : vector<8x32xf32>
    %277 = arith.addf %275, %276 : vector<8x32xf32>
    %278 = vector.broadcast %18 : vector<1x32xf32> to vector<8x32xf32>
    %279 = arith.mulf %277, %278 : vector<8x32xf32>
    %cst_86 = arith.constant dense<0.000000e+00> : vector<8xf32>
    %280 = vector.multi_reduction <add>, %279, %cst_86 [1] : vector<8x32xf32> to vector<8xf32>
    %281 = vector.shape_cast %280 : vector<8xf32> to vector<8x1xf32>
    %282 = vector.broadcast %19 : f32 to vector<8x1xf32>
    %283 = arith.addf %281, %282 : vector<8x1xf32>
    %c0_87 = arith.constant 0 : index
    %c6_88 = arith.constant 6 : index
    %284 = vector.load %arg10[%c0_87, %c6_88] : memref<8x8xf32, #tpu.memory_space<vmem>>, vector<8x1xf32>
    tpu.vector_store %arg10[%c0_87, %c6_88], %283 {strides = array<i32>} : memref<8x8xf32, #tpu.memory_space<vmem>>, vector<8x1xf32>,
    %c0_89 = arith.constant 0 : index
    %c7 = arith.constant 7 : index
    %c0_90 = arith.constant 0 : index
    %285 = vector.load %arg11[%c0_89, %c7, %c0_90] : memref<8x8x96xf32, #tpu.memory_space<vmem>>, vector<8x1x96xf32>
    %286 = vector.shape_cast %285 : vector<8x1x96xf32> to vector<8x96xf32>
    %cst_91 = arith.constant dense<0.000000e+00> : vector<8x96xf32>
    %287 = tpu.matmul %277, %16, %cst_91 {dimension_numbers = #tpu.dot_dimension_numbers<[1], [0], [0], [1], [0, 0, 1, 1], [], []>} : vector<8x32xf32>, vector<32x96xf32>, vector<8x96xf32> -> vector<8x96xf32>
    %288 = vector.extract_strided_slice %286 {offsets = [0, 0], sizes = [8, 32], strides = [1, 1]} : vector<8x96xf32> to vector<8x32xf32>
    %289 = vector.extract_strided_slice %287 {offsets = [0, 0], sizes = [8, 32], strides = [1, 1]} : vector<8x96xf32> to vector<8x32xf32>
    %290 = arith.addf %288, %289 : vector<8x32xf32>
    %291 = arith.negf %290 : vector<8x32xf32>
    %292 = math.exp %291 : vector<8x32xf32>
    %cst_92 = arith.constant 1.000000e+00 : f32
    %293 = vector.broadcast %cst_92 : f32 to vector<8x32xf32>
    %294 = arith.addf %293, %292 : vector<8x32xf32>
    %295 = arith.divf %293, %294 : vector<8x32xf32>
    %296 = vector.extract_strided_slice %286 {offsets = [0, 32], sizes = [8, 32], strides = [1, 1]} : vector<8x96xf32> to vector<8x32xf32>
    %297 = vector.extract_strided_slice %287 {offsets = [0, 32], sizes = [8, 32], strides = [1, 1]} : vector<8x96xf32> to vector<8x32xf32>
    %298 = arith.addf %296, %297 : vector<8x32xf32>
    %299 = arith.negf %298 : vector<8x32xf32>
    %300 = math.exp %299 : vector<8x32xf32>
    %cst_93 = arith.constant 1.000000e+00 : f32
    %301 = vector.broadcast %cst_93 : f32 to vector<8x32xf32>
    %302 = arith.addf %301, %300 : vector<8x32xf32>
    %303 = arith.divf %301, %302 : vector<8x32xf32>
    %304 = vector.extract_strided_slice %286 {offsets = [0, 64], sizes = [8, 32], strides = [1, 1]} : vector<8x96xf32> to vector<8x32xf32>
    %305 = vector.extract_strided_slice %287 {offsets = [0, 64], sizes = [8, 32], strides = [1, 1]} : vector<8x96xf32> to vector<8x32xf32>
    %306 = vector.broadcast %17 : vector<1x32xf32> to vector<8x32xf32>
    %307 = arith.addf %305, %306 : vector<8x32xf32>
    %308 = arith.mulf %295, %307 : vector<8x32xf32>
    %309 = arith.addf %304, %308 : vector<8x32xf32>
    %310 = math.tanh %309 : vector<8x32xf32>
    %cst_94 = arith.constant 1.000000e+00 : f32
    %311 = vector.broadcast %cst_94 : f32 to vector<8x32xf32>
    %312 = arith.subf %311, %303 : vector<8x32xf32>
    %313 = arith.mulf %312, %310 : vector<8x32xf32>
    %314 = arith.mulf %303, %277 : vector<8x32xf32>
    %315 = arith.addf %313, %314 : vector<8x32xf32>
    %316 = vector.broadcast %18 : vector<1x32xf32> to vector<8x32xf32>
    %317 = arith.mulf %315, %316 : vector<8x32xf32>
    %cst_95 = arith.constant dense<0.000000e+00> : vector<8xf32>
    %318 = vector.multi_reduction <add>, %317, %cst_95 [1] : vector<8x32xf32> to vector<8xf32>
    %319 = vector.shape_cast %318 : vector<8xf32> to vector<8x1xf32>
    %320 = vector.broadcast %19 : f32 to vector<8x1xf32>
    %321 = arith.addf %319, %320 : vector<8x1xf32>
    %c0_96 = arith.constant 0 : index
    %c7_97 = arith.constant 7 : index
    %322 = vector.load %arg10[%c0_96, %c7_97] : memref<8x8xf32, #tpu.memory_space<vmem>>, vector<8x1xf32>
    tpu.vector_store %arg10[%c0_96, %c7_97], %321 {strides = array<i32>} : memref<8x8xf32, #tpu.memory_space<vmem>>, vector<8x1xf32>,
    return
  }
  func.func @transform_0(%arg0: i32) -> (i32, i32, i32) {
    %c0_i32 = arith.constant 0 : i32
    %c0_i32_0 = arith.constant 0 : i32
    %c0_i32_1 = arith.constant 0 : i32
    return %arg0, %c0_i32, %c0_i32_0 : i32, i32, i32
  }
  func.func @transform_1(%arg0: i32) -> (i32, i32) {
    %c0_i32 = arith.constant 0 : i32
    %c0_i32_0 = arith.constant 0 : i32
    return %arg0, %c0_i32 : i32, i32
  }
  func.func @transform_2(%arg0: i32) -> (i32, i32) {
    %c0_i32 = arith.constant 0 : i32
    %c0_i32_0 = arith.constant 0 : i32
    %c0_i32_1 = arith.constant 0 : i32
    return %c0_i32, %c0_i32_0 : i32, i32
  }
  func.func @transform_3(%arg0: i32) -> (i32, i32) {
    %c0_i32 = arith.constant 0 : i32
    %c0_i32_0 = arith.constant 0 : i32
    %c0_i32_1 = arith.constant 0 : i32
    return %c0_i32, %c0_i32_0 : i32, i32
  }
  func.func @transform_4(%arg0: i32) -> (i32, i32) {
    %c0_i32 = arith.constant 0 : i32
    %c0_i32_0 = arith.constant 0 : i32
    %c0_i32_1 = arith.constant 0 : i32
    return %c0_i32, %c0_i32_0 : i32, i32
  }
  func.func @transform_5(%arg0: i32) -> (i32, i32) {
    %c0_i32 = arith.constant 0 : i32
    %c0_i32_0 = arith.constant 0 : i32
    %c0_i32_1 = arith.constant 0 : i32
    return %c0_i32, %c0_i32_0 : i32, i32
  }
  func.func @transform_6(%arg0: i32) -> (i32, i32) {
    %c0_i32 = arith.constant 0 : i32
    %c0_i32_0 = arith.constant 0 : i32
    %c0_i32_1 = arith.constant 0 : i32
    return %c0_i32, %c0_i32_0 : i32, i32
  }
  func.func @transform_7(%arg0: i32) -> (i32, i32) {
    %c0_i32 = arith.constant 0 : i32
    %c0_i32_0 = arith.constant 0 : i32
    %c0_i32_1 = arith.constant 0 : i32
    return %c0_i32, %c0_i32_0 : i32, i32
  }
  func.func @transform_8(%arg0: i32) -> (i32, i32) {
    %c0_i32 = arith.constant 0 : i32
    %c0_i32_0 = arith.constant 0 : i32
    %c0_i32_1 = arith.constant 0 : i32
    return %c0_i32, %c0_i32_0 : i32, i32
  }
  func.func @transform_9(%arg0: i32) -> (i32, i32) {
    %c0_i32 = arith.constant 0 : i32
    %c0_i32_0 = arith.constant 0 : i32
    return %arg0, %c0_i32 : i32, i32
  }
}

</mosaic_0001>

<bundles_post_ra>
// kernel: neural_click_forward.1
= control target key start
LH: loop header
LB: loop body
LE: loop exit
PB: predicated region body
PF: predicated region fallthrough
CT: control target
= control target key end

     0   :  { %s6365_s0 = inlined_call_operand.vmem [shape: f32[16,8,32], index: 0, kind: input, shape index: {}]   ;;  %s6366_s1 = inlined_call_operand.hbm [shape: f32[16,32], index: 1, kind: input, shape index: {}]   ;;  %s6367_s2 = inlined_call_operand.vmem [shape: f32[32,96], index: 2, kind: input, shape index: {}]   ;;  %s6368_s3 = inlined_call_operand.vmem [shape: f32[32,96], index: 3, kind: input, shape index: {}]   ;;  %s6369_s4 = inlined_call_operand.vmem [shape: f32[32,96], index: 4, kind: input, shape index: {}]   ;;  %s6370_s5 = inlined_call_operand.vmem [shape: f32[1,96], index: 5, kind: input, shape index: {}]   ;;  %s6371_s6 = inlined_call_operand.vmem [shape: f32[1,32], index: 6, kind: input, shape index: {}]   ;;  %s6372_s7 = inlined_call_operand.vmem [shape: f32[1,32], index: 7, kind: input, shape index: {}]   ;;  %s6373_s8 = inlined_call_operand.<no memory space> [shape: f32[1,1], index: 8, kind: input, shape index: {}]   ;;  %s6374_s9 = inlined_call_operand.hbm [shape: f32[16,8], index: 9, kind: output, shape index: {}]  }
   0x1   :  { %14 = sst [smem:[#allocation3]] %s6373_s8 }
   0x2   :  { %15 = vsyncpa [#allocation5], 0 }
   0x3   :  { %17 = vsyncpa [#allocation5 + $0x1], 0 }
   0x4   :  { %18 = vsyncpa [#allocation6], 0 }
   0x5   :  { %20 = vsyncpa [#allocation6 + $0x1], 0  ;;  %s4670_s11 = smov 0   ;;  %s4672_s12 = smov 0  }
   0x6   :  { %s4674_s13 = smov 0   ;;  %s4676_s14 = smov 0  }
   0x7 LB: > { %s4691_s8 = sadd.s32 4294967295, %s4607_s14   ;;  %s3739_s15 = sadd.s32 4294967294, %s4607_s14   ;;  %s4607_s14 = sphi %s4676_s14, %s6467_s14   ;;  %s4603_s13 = sphi %s4674_s13, %s6466_s13   ;;  %s4599_s12 = sphi %s4672_s12, %s6465_s12   ;;  %s4595_s11 = sphi %s4670_s11, %s6464_s11  }
   0x8   : > { %s4695_s16 = sadd.s32 1, %s4607_s14   ;;  %s59_s17 = sadd.s32 1, %s4603_s13 }
   0x9   : > { %s56_s18 = ssub.s32 %s4607_s14, %s4695_s16  ;;  %p66_p0 = scmp.ne.s32.totalorder %s4603_s13, %s4599_s12 }
   0xa   : > { %p57_p1 = scmp.eq.s32.totalorder %s56_s18, 0  ;;  %p67_p2 = scmp.eq.s32.totalorder %s4607_s14, 0 }
   0xb   : > { %p72_p3 = scmp.ne.s32.totalorder %s4599_s12, %s4595_s11  ;;  %p73_p4 = scmp.eq.s32.totalorder %s4691_s8, 0 }
   0xc   : > { %s4707_s19 = scalar_select %p57_p1, %s4603_s13, %s59_s17  }
   0xd   : > { %p4709_p5 = por %p67_p2, %p66_p0  ;;  %p4713_p6 = por %p73_p4, %p72_p3 }
   0xe   : > { %p243_p7 = scmp.eq.s32.totalorder %s4691_s8, 1  ;;  %p249_p8 = scmp.eq.s32.totalorder %s3739_s15, 1 }
   0xf   : > { %p4087_p10 = scmp.lt.s32.totalorder %s4607_s14, 2  ;;  %s299_s24 = sand.u32 1, %s4603_s13  }
  0x10   : > { %p4720_p11 = por %p243_p7, %p66_p0  ;;  %p4724_p12 = por %p249_p8, %p72_p3 }
  0x11   : > { %s3743_s25 = sshll.u32 %s4607_s14, 7  ;;  %s3742_s26 = sshll.u32 %s299_s24, 3 }
  0x12   : > { %s6407_s22 = scalar_select %p4720_p11, 1, 0 }
  0x13   : > { %s6408_s23 = scalar_select %p4724_p12, 1, 0 }
  0x14   : > { %s4733_s29 = scalar_lea.hbm %s6366_s1, %s3743_s25  ;;  %s303_s30 = scalar_lea.vmem [#allocation4], %s3742_s26 }
  0x15   : > { %s310_s10 = sshll.u32 %s303_s30, 4  ;;  %p4737_p13 = pnand %p4087_p10, %p4709_p5  ;;  %s4741_s10 = int_to_ptr.vmem [resolvable:$true] %s310_s10 }
  0x16   : > { %s300_s17 = scalar_lea.sflag [#allocation5], %s299_s24  ;;  %s4511_s18 = scalar_lea.hbm %s4733_s29, 128 }
  0x17   : > { %p4512_p2 = scmp.ne.s32.totalorder %s4733_s29, %s4511_s18  ;;  %p4513_p3 = pneg %p4737_p13 }
  0x18   : > { %s4516_s26 = scalar_lea.hbm %s6366_s1, 256  ;;  %p4517_p5 = scmp.lt.u32.totalorder %s4733_s29, %s6366_s1 }
  0x19   : > { %p4514_p4 = pnand %p4513_p3, %p4512_p2  ;;  %p4518_p8 = scmp.lt.u32.totalorder %s4516_s26, %s4511_s18 }
  0x1a   : > { %p4520_p9 = scmp.lt.u32.totalorder %s4511_s18, %s4733_s29 }
  0x1b   : > { %p4515_p7 = pneg %p4514_p4  ;;  %p4519_p10 = por %p4518_p8, %p4517_p5 }
  0x1d   : > { %p4521_p0 = por %p4520_p9, %p4519_p10 }
  0x1f   : > { %p4522_p1 = pnand %p4521_p0, %p4515_p7 }
  0x21   : > { %4525 = shalt.err (!%p4522_p1)
}
  0x22   : > { %s4526_s24 = scalar_lea.vmem %s4741_s10, 128  ;;  %s4609_s30 = smov [#allocation4]  }
  0x23   : > { %p4527_p2 = scmp.ne.s32.totalorder %s4741_s10, %s4526_s24  ;;  %s4531_s20 = sshll.u32 %s4609_s30, 4  ;;  %s4532_s20 = int_to_ptr.vmem [resolvable:$false] %s4531_s20 }
  0x24   : > { %s4533_s25 = scalar_lea.vmem %s4532_s20, 256  ;;  %p4534_p11 = scmp.lt.s32.totalorder %s4741_s10, %s4532_s20 }
  0x25   : > { %p4529_p4 = pnand %p4527_p2, %p4513_p3  ;;  %p4535_p5 = scmp.lt.s32.totalorder %s4533_s25, %s4526_s24 }
  0x27   : > { %p4530_p12 = pneg %p4529_p4  ;;  %p4536_p8 = por %p4535_p5, %p4534_p11 }
  0x29   : > { %p4537_p9 = pnand %p4536_p8, %p4530_p12 }
  0x2b   : > { %4540 = shalt.err (!%p4537_p9)
}
  0x2c   : > { %4082 = dma.hbm_to_vmem [thread:$0]  (!%p4737_p13), %s4733_s29, 128, %s4741_s10, %s300_s17  }
  0x2d   : > { %p6410_p0 = scmp.lt.s32.totalorder %s4607_s14, 3  ;;  %p6411_p1 = scmp.ge.s32.totalorder %s4607_s14, 1 }
  0x2f   : > { %p316_p3 = pnand %p6411_p1, %p6410_p0 }
  0x31   : > { %319 = sbr.rel (%p316_p3) target bundleno = 6119 (0x17e7), region = 56 }
  0x38   : > { %s4775_s18 = sand.u32 1, %s4599_s12  }
  0x39   : > { %s6376_s26 = sshll.u32 %s4775_s18, 3  ;;  %s322_s27 = scalar_lea.sflag [#allocation5], %s4775_s18 }
  0x3a   : > { %s4781_s15 = scalar_lea.vmem [#allocation4], %s6376_s26 }
  0x3b   : > { %4586 = dma.done.wait (%p4713_p6), %s322_s27, 128  }
  0x3c   : > { %4588 = vsyncadd (%p4713_p6), %s322_s27, 4294967168  ;;  %s3747_s29 = sshll.u32 %s4691_s8, 3  ;;  %v4610_v0 = vmov 0.0|0.0   ;;  %vm4611_vm0 = vmmov 0   ;;  %v4612_v1 = vmov 0.0   ;;  %v379_v2 = vld [vmem:[%s6367_s2] sm:$0xff] }
  0x3d   : > { %4021 = vmatprep.subr.bf16.mxu1 %v4610_v0  ;;  %3922 = vmatprep.mubr.msk.f32.mxu1 %vm4611_vm0, %v4612_v1  ;;  %p366_p11 = scmp.lt.s32.totalorder %s3747_s29, 15  ;;  %v380_v3 = vld [vmem:[%s6367_s2 + $0x8] sm:$0xff]  ;;  %v545_v4 = vld [vmem:[%s6368_s3] sm:$0xff]  ;;  %vm390_vm1 = vcmask 261120   ;;  %v381_v7 = vld [vmem:[%s6367_s2 + $0x10] sm:$0xff]  ;;  %vm558_vm2 = vcmask 1041409  }
  0x3e   : > { %v4013_v5 = vpack.c.bf16 %v380_v3, %v379_v2  ;;  %v546_v6 = vld [vmem:[%s6368_s3 + $0x8] sm:$0xff]  ;;  %v382_v8 = vld [vmem:[%s6367_s2 + $0x18] sm:$0xff]  ;;  %v547_v11 = vld [vmem:[%s6368_s3 + $0x10] sm:$0xff]  ;;  %vm561_vm3 = vcmask 1042434   ;;  %vm564_vm4 = vcmask 1043459   ;;  %vm567_vm5 = vcmask 1044484  }
  0x3f   : > { %s6469_s29 = smov (!%p366_p11, %s3747_s29), 15  ;;  %v4022_v9 = vpack.c.bf16 %v546_v6, %v545_v4  ;;  %v4017_v10 = vpack.c.bf16 %v382_v8, %v381_v7  ;;  %v548_v12 = vld [vmem:[%s6368_s3 + $0x18] sm:$0xff]  ;;  %v674_v29 = vld [vmem:[%s6369_s4] sm:$0xff]  ;;  %v675_v30 = vld [vmem:[%s6369_s4 + $0x8] sm:$0xff]  ;;  %vm570_vm6 = vcmask 1045509   ;;  %vm573_vm7 = vcmask 1046534  }
  0x40   : > { %s3748_s10 = sshll.u32 %s6469_s29, 3  ;;  %4014 = vmatprep.subr.bf16.mxu0 %v4013_v5  ;;  %v4025_v17 = vpack.c.bf16 %v548_v12, %v547_v11  ;;  %vm576_vm8 = vcmask 1047559   ;;  %v4845_v38 = vpack.c.bf16 %v675_v30, %v674_v29  ;;  %v3768_v39 = vld [vmem:[%s6371_s6] ss:$0 sm:$0xff]  ;;  %v676_v43 = vld [vmem:[%s6369_s4 + $0x10] sm:$0xff]  ;;  %v677_v44 = vld [vmem:[%s6369_s4 + $0x18] sm:$0xff] }
  0x41   : > { %s4803_s26 = scalar_lea.vmem %s6365_s0, %s3748_s10  ;;  %4023 = vmatpush3.bf16.msra.mxu1 %v4022_v9  ;;  %4016 = vmatpush3.bf16.msra.mxu0 %v4013_v5  ;;  %s4613_s10 = smov 64   ;;  %v4869_v47 = vpack.c.bf16 %v677_v44, %v676_v43  ;;  %v4881_v50 = vld [vmem:[%s4781_s15] sm:$0xff]  ;;  %vm520_vm9 = vcmask 785408   ;;  %vm1065_vm10 = vcmask 7168   ;;  %vm1433_vm11 = vcmask 15368  }
  0x42   : > { %v371_v13 = vld [vmem:[%s4803_s26] sm:$0xff]  ;;  %v530_v15 = vld [vmem:[%s4803_s26 + $0x8] sm:$0x1]  ;;  %v531_v16 = vld [vmem:[%s4803_s26 + $0x10] sm:$0x1]  ;;  %4024 = vmatprep.subr.bf16.mxu1 %v4610_v0  ;;  %4018 = vmatprep.subr.bf16.mxu0 %v4017_v10  ;;  %s4614_s17 = smov 32  }
  0x43   : > { %3902 = vmatprep.mubr.msk.f32.mxu0 %vm390_vm1, %v371_v13  ;;  %v529_v14 = vld [vmem:[%s4803_s26] sm:$0x1]  ;;  %v532_v18 = vld [vmem:[%s4803_s26 + $0x18] sm:$0x1]  ;;  %v534_v20 = vld [vmem:[%s4803_s26 + $0x28] sm:$0x1]  ;;  %832 = vrot.lane.b32.xlu0 %v3768_v39, %s4613_s10 }
  0x44   : > { %v533_v19 = vld [vmem:[%s4803_s26 + $0x20] sm:$0x1]  ;;  %v535_v21 = vld [vmem:[%s4803_s26 + $0x30] sm:$0x1]  ;;  %v557_v22 = vrot.slane %v530_v15, 7  ;;  %v560_v23 = vrot.slane %v531_v16, 6 }
  0x45   : > { %v536_v24 = vld [vmem:[%s4803_s26 + $0x38] sm:$0x1]  ;;  %v563_v25 = vrot.slane %v532_v18, 5  ;;  %v566_v26 = vrot.slane %v533_v19, 4  ;;  %v569_v28 = vrot.slane %v534_v20, 3  ;;  %4026 = vmatpush3.bf16.msra.mxu1 %v4025_v17  ;;  %4020 = vmatpush3.bf16.msra.mxu0 %v4017_v10  ;;  %v572_v32 = vrot.slane %v535_v21, 2 }
  0x46   : > { %v559_v27 = vsel %vm558_vm2, %v557_v22, %v529_v14  ;;  %v372_v33 = vld [vmem:[%s4803_s26 + $0x8] sm:$0xff]  ;;  %v575_v35 = vrot.slane %v536_v24, 1  ;;  %4027 = vmatprep.subr.bf16.mxu1 %v4610_v0  ;;  %v373_v36 = vld [vmem:[%s4803_s26 + $0x10] sm:$0xff]  ;;  %4033 = vmatprep.subr.bf16.mxu0 %v4610_v0  ;;  %v374_v42 = vld [vmem:[%s4803_s26 + $0x18] sm:$0xff]  ;;  %s4615_s28 = smov 96   ;;  %s680_s30 = sld [smem:[#allocation3]] }
  0x47   : > { %v562_v31 = vsel %vm561_vm3, %v560_v23, %v559_v27  ;;  %v375_v46 = vld [vmem:[%s4803_s26 + $0x20] sm:$0xff]  ;;  %v376_v48 = vld [vmem:[%s4803_s26 + $0x28] sm:$0xff]  ;;  %v377_v49 = vld [vmem:[%s4803_s26 + $0x30] sm:$0xff]  ;;  %vm1801_vm12 = vcmask 23568   ;;  %vm2169_vm13 = vcmask 31768   ;;  %vm2537_vm14 = vcmask 39968  }
  0x48   : > { %v565_v34 = vsel %vm564_vm4, %v563_v25, %v562_v31  ;;  %3903 = vmatmul.mubr.msk.f32.vlgmr.msra.gmra.mrb[0].mxu0 %vm390_vm1, %v372_v33  ;;  %v378_v51 = vld [vmem:[%s4803_s26 + $0x38] sm:$0xff]  ;;  %v3749_v52 = vld [vmem:[%s6370_s5] ss:$0 sm:$0xff]  ;;  %vm2905_vm15 = vcmask 48168   ;;  %s3834_s25 = sshll.u32 %s4691_s8, 7  ;;  %p6461_p12 = scmp.ne.s32.totalorder %s6407_s22, 0 }
  0x49   : > { %v568_v37 = vsel %vm567_vm5, %v566_v26, %v565_v34  ;;  %3905 = vmatprep.mubr.msk.f32.mxu0 %vm390_vm1, %v373_v36  ;;  %4035 = vmatpush3.bf16.msra.mxu0 %v4845_v38  ;;  %s6320_s15 = scalar_lea.hbm %s6374_s9, %s3834_s25  ;;  %s4616_s8 = smov [#allocation7]  }
  0x4a   : > { %v571_v40 = vsel %vm570_vm6, %v569_v28, %v568_v37  ;;  %4036 = vmatprep.subr.bf16.mxu0 %v4610_v0  ;;  %s4545_s24 = sshll.u32 %s4616_s8, 4  ;;  %s4546_s24 = int_to_ptr.vmem [resolvable:$false] %s4545_s24 }
  0x4b   : > { %v574_v41 = vsel %vm573_vm7, %v572_v32, %v571_v40  ;;  %s4547_s21 = scalar_lea.vmem %s4546_s24, 256 }
  0x4c   : > { %v577_v45 = vsel %vm576_vm8, %v575_v35, %v574_v41  ;;  %3906 = vmatmul.mubr.msk.f32.gmra.mrb[2].mxu0 %vm390_vm1, %v374_v42 }
  0x4d   : > { %3923 = vmatmul.mubr.msk.f32.vlgmr.msra.gmra.mrb[0].mxu1 %vm390_vm1, %v577_v45  ;;  %3908 = vmatprep.mubr.msk.f32.mxu0 %vm390_vm1, %v375_v46 }
  0x4e   : > { %4029 = vmatpush3.bf16.msra.mxu1 %v4845_v38  ;;  %3933 = vmatprep.mubr.msk.f32.mxu1 %vm4611_vm0, %v4612_v1 }
  0x4f   : > { %4030 = vmatprep.subr.bf16.mxu1 %v4610_v0  ;;  %4038 = vmatpush3.bf16.msra.mxu0 %v4869_v47 }
  0x50   : > { %4045 = vmatprep.subr.bf16.mxu0 %v4610_v0  ;;  %3909 = vmatmul.mubr.msk.f32.gmra.mrb[4].mxu0 %vm390_vm1, %v376_v48 }
  0x51   : > { %3911 = vmatprep.mubr.msk.f32.mxu0 %vm390_vm1, %v377_v49 }
  0x52   : > { %4032 = vmatpush3.bf16.msra.mxu1 %v4869_v47 }
  0x53   : > { %4039 = vmatprep.subr.bf16.mxu1 %v4610_v0 }
  0x54   : > { %3912 = vmatmul.mubr.msk.f32.gmra.mrb[6].mxu0 %vm390_vm1, %v378_v51 }
  0x55   : > { %3934 = vmatmul.mubr.msk.f32.vlgmr.msra.gmra.mrb[2].mxu1 %vm390_vm1, %v4881_v50  ;;  %3944 = vmatprep.mubr.msk.f32.mxu0 %vm4611_vm0, %v4612_v1 }
  0x56   : > { %4041 = vmatpush3.bf16.msra.mxu1 %v4845_v38  ;;  %3955 = vmatprep.mubr.msk.f32.mxu1 %vm4611_vm0, %v4612_v1 }
  0x57   : > { %4042 = vmatprep.subr.bf16.mxu1 %v4610_v0 }
  0x5a   : > { %4044 = vmatpush3.bf16.msra.mxu1 %v4869_v47 }
  0x5b   : > { %4051 = vmatprep.subr.bf16.mxu1 %v4610_v0 }
  0xb5   : > { %v4907_v5 = vpop.permute.xlu0 %832 }
 0x11b   : > { %v3904_v53 = vpop.f32.mrb[0].mxu0 }
 0x11c   : > { %v487_v54 = vadd.f32 %v3904_v53, %v3749_v52  ;;  %v481_v55 = vpop.f32.mrb[1].mxu0 }
 0x11d   : > { %v482_v56 = vadd.f32 %v3749_v52, %v481_v55 }
 0x11e   : > { %522 = vst.msk [vmem:[#allocation2 + $0x8] sm:$0xff] %vm520_vm9, %v487_v54 }
 0x11f   : > { %521 = vst.msk [vmem:[#allocation2] sm:$0xff] %vm520_vm9, %v482_v56  ;;  %v3907_v59 = vpop.f32.mrb[2].mxu0 }
 0x120   : > { %v4901_v57 = vpop.f32.mrb[0].mxu1  ;;  %v497_v60 = vadd.f32 %v3907_v59, %v3749_v52  ;;  %v491_v61 = vpop.f32.mrb[3].mxu0 }
 0x121   : > { %v3924_v58 = vpop.f32.mrb[1].mxu1  ;;  %v492_v62 = vadd.f32 %v3749_v52, %v491_v61  ;;  %v651_v23 = vrot.slane %v4901_v57, 1  ;;  %v652_v25 = vrot.slane %v4901_v57, 2  ;;  %v653_v30 = vrot.slane %v4901_v57, 3 }
 0x122   : > { %524 = vst.msk [vmem:[#allocation2 + $0x18] sm:$0xff] %vm520_vm9, %v497_v60  ;;  %v654_v33 = vrot.slane %v4901_v57, 4  ;;  %v655_v42 = vrot.slane %v4901_v57, 5  ;;  %v656_v45 = vrot.slane %v4901_v57, 6  ;;  %v657_v58 = vrot.slane %v4901_v57, 7 }
 0x123   : > { %523 = vst.msk [vmem:[#allocation2 + $0x10] sm:$0xff] %vm520_vm9, %v492_v62  ;;  %v3910_v63 = vpop.f32.mrb[4].mxu0 }
 0x124   : > { %v507_v2 = vadd.f32 %v3910_v63, %v3749_v52  ;;  %v501_v3 = vpop.f32.mrb[5].mxu0 }
 0x125   : > { %v502_v4 = vadd.f32 %v3749_v52, %v501_v3  ;;  %v538_v21 = vld [vmem:[#allocation2 + $0x8] sm:$0x1] }
 0x126   : > { %526 = vst.msk [vmem:[#allocation2 + $0x28] sm:$0xff] %vm520_vm9, %v507_v2  ;;  %v537_v20 = vld [vmem:[#allocation2] sm:$0x1]  ;;  %v4930_v26 = vadd.f32 %v651_v23, %v538_v21 }
 0x127   : > { %525 = vst.msk [vmem:[#allocation2 + $0x20] sm:$0xff] %vm520_vm9, %v502_v4  ;;  %v3913_v8 = vpop.f32.mrb[6].mxu0  ;;  %v4926_v22 = vadd.f32 %v4901_v57, %v537_v20 }
 0x128   : > { %v4909_v6 = vpop.f32.mrb[2].mxu1  ;;  %v511_v9 = vpop.f32.mrb[7].mxu0  ;;  %v517_v11 = vadd.f32 %v3913_v8, %v3749_v52 }
 0x129   : > { %v3935_v7 = vpop.f32.mrb[3].mxu1  ;;  %v835_v10 = vadd.f32 %v4907_v5, %v4909_v6  ;;  %v512_v12 = vadd.f32 %v3749_v52, %v511_v9  ;;  %v540_v27 = vld [vmem:[#allocation2 + $0x18] sm:$0x1]  ;;  %v771_v29 = vadd.f32 %v4909_v6, %v4926_v22  ;;  %v756_v31 = vrot.slane %v4909_v6, 1 }
 0x12a   : > { %528 = vst.msk [vmem:[#allocation2 + $0x38] sm:$0xff] %vm520_vm9, %v517_v11  ;;  %v539_v24 = vld [vmem:[#allocation2 + $0x10] sm:$0x1]  ;;  %v757_v34 = vrot.slane %v4909_v6, 2  ;;  %v4940_v35 = vadd.f32 %v653_v30, %v540_v27  ;;  %v758_v43 = vrot.slane %v4909_v6, 3  ;;  %v759_v46 = vrot.slane %v4909_v6, 4 }
 0x12b   : > { %844 = vrot.lane.b32.xlu1 %v835_v10, %s4613_s10  ;;  %v837_v13 = vrot.slane %v835_v10, 1  ;;  %527 = vst.msk [vmem:[#allocation2 + $0x30] sm:$0xff] %vm520_vm9, %v512_v12  ;;  %v838_v14 = vrot.slane %v835_v10, 2  ;;  %v839_v15 = vrot.slane %v835_v10, 3  ;;  %v840_v16 = vrot.slane %v835_v10, 4 }
 0x12c   : > { %v841_v17 = vrot.slane %v835_v10, 5  ;;  %v842_v18 = vrot.slane %v835_v10, 6  ;;  %v843_v19 = vrot.slane %v835_v10, 7  ;;  %v4932_v28 = vadd.f32 %v652_v25, %v539_v24 }
 0x12d   : > { %846 = vrot.lane.b32.xlu0 %v837_v13, %s4613_s10  ;;  %v772_v36 = vadd.f32 %v756_v31, %v4930_v26  ;;  %v3760_v39 = vmul.f32 -1.442695, %v771_v29  ;;  %v542_v41 = vld [vmem:[#allocation2 + $0x28] sm:$0x1]  ;;  %v774_v48 = vadd.f32 %v758_v43, %v4940_v35  ;;  %v760_v55 = vrot.slane %v4909_v6, 5 }
 0x12e   : > { %v541_v32 = vld [vmem:[#allocation2 + $0x20] sm:$0x1]  ;;  %v773_v37 = vadd.f32 %v757_v34, %v4932_v28  ;;  %v4951_v51 = vadd.f32 %v655_v42, %v542_v41  ;;  %v761_v59 = vrot.slane %v4909_v6, 6  ;;  %v762_v3 = vrot.slane %v4909_v6, 7 }
 0x12f   : > { %848 = vrot.lane.b32.xlu1 %v838_v14, %s4613_s10  ;;  %v4944_v40 = vadd.f32 %v654_v33, %v541_v32  ;;  %v3761_v49 = vmul.f32 -1.442695, %v772_v36  ;;  %4127 = vpow2.f32 %v3760_v39  ;;  %v3763_v60 = vmul.f32 -1.442695, %v774_v48 }
 0x130   : > { %v3762_v52 = vmul.f32 -1.442695, %v773_v37  ;;  %v776_v61 = vadd.f32 %v760_v55, %v4951_v51 }
 0x131   : > { %850 = vrot.lane.b32.xlu0 %v839_v15, %s4613_s10  ;;  %v775_v53 = vadd.f32 %v759_v46, %v4944_v40  ;;  %v544_v56 = vld [vmem:[#allocation2 + $0x38] sm:$0x1]  ;;  %4129 = vpow2.f32 %v3761_v49 }
 0x132   : > { %v543_v44 = vld [vmem:[#allocation2 + $0x30] sm:$0x1]  ;;  %4131 = vpow2.f32 %v3762_v52  ;;  %v4961_v2 = vadd.f32 %v657_v58, %v544_v56  ;;  %v3765_v4 = vmul.f32 -1.442695, %v776_v61  ;;  %v974_v61 = vrot.slane %v4881_v50, 3 }
 0x133   : > { %852 = vrot.lane.b32.xlu1 %v840_v16, %s4613_s10  ;;  %v4954_v54 = vadd.f32 %v656_v45, %v543_v44  ;;  %v3764_v62 = vmul.f32 -1.442695, %v775_v53  ;;  %4133 = vpow2.f32 %v3763_v60  ;;  %v973_v60 = vrot.slane %v4881_v50, 2 }
 0x134   : > { %v778_v57 = vadd.f32 %v762_v3, %v4961_v2  ;;  %v977_v3 = vrot.slane %v4881_v50, 6 }
 0x135   : > { %854 = vrot.lane.b32.xlu0 %v841_v17, %s4613_s10  ;;  %v777_v63 = vadd.f32 %v761_v59, %v4954_v54  ;;  %4135 = vpow2.f32 %v3764_v62  ;;  %v972_v59 = vrot.slane %v4881_v50, 1  ;;  %v975_v62 = vrot.slane %v4881_v50, 4 }
 0x136   : > { %4137 = vpow2.f32 %v3765_v4  ;;  %v3767_v9 = vmul.f32 -1.442695, %v778_v57 }
 0x137   : > { %856 = vrot.lane.b32.xlu1 %v842_v18, %s4613_s10  ;;  %v3766_v7 = vmul.f32 -1.442695, %v777_v63  ;;  %v976_v63 = vrot.slane %v4881_v50, 5 }
 0x139   : > { %858 = vrot.lane.b32.xlu0 %v843_v19, %s4613_s10  ;;  %v4128_v8 = vpop.eup %4127  ;;  %4139 = vpow2.f32 %v3766_v7 }
 0x13a   : > { %v803_v11 = vadd.f32 1.0, %v4128_v8  ;;  %4141 = vpow2.f32 %v3767_v9 }
 0x13b   : > { %v4130_v10 = vpop.eup %4129 }
 0x13c   : > { %v4132_v12 = vpop.eup %4131  ;;  %v804_v13 = vadd.f32 1.0, %v4130_v10  ;;  %4143 = vrcp.f32 %v803_v11 }
 0x13d   : > { %v4134_v14 = vpop.eup %4133  ;;  %v805_v15 = vadd.f32 1.0, %v4132_v12 }
 0x13e   : > { %4145 = vrcp.f32 %v804_v13  ;;  %v806_v6 = vadd.f32 1.0, %v4134_v14 }
 0x13f   : > { %v4136_v16 = vpop.eup %4135  ;;  %4147 = vrcp.f32 %v805_v15 }
 0x140   : > { %v4138_v17 = vpop.eup %4137  ;;  %v807_v18 = vadd.f32 1.0, %v4136_v16  ;;  %4149 = vrcp.f32 %v806_v6 }
 0x141   : > { %v808_v20 = vadd.f32 1.0, %v4138_v17 }
 0x142   : > { %4151 = vrcp.f32 %v807_v18 }
 0x143   : > { %v4140_v19 = vpop.eup %4139  ;;  %4153 = vrcp.f32 %v808_v20 }
 0x144   : > { %v809_v21 = vadd.f32 1.0, %v4140_v19  ;;  %v4142_v23 = vpop.eup %4141 }
 0x145   : > { %v810_v30 = vadd.f32 1.0, %v4142_v23 }
 0x146   : > { %v4965_v24 = vpop.eup %4143  ;;  %4155 = vrcp.f32 %v809_v21 }
 0x147   : > { %4157 = vrcp.f32 %v810_v30 }
 0x148   : > { %v4968_v31 = vpop.eup %4145 }
 0x149   : > { %v4971_v32 = vpop.eup %4147 }
 0x14a   : > { %v4975_v39 = vpop.eup %4149 }
 0x14c   : > { %v4979_v41 = vpop.eup %4151 }
 0x14d   : > { %v4983_v46 = vpop.eup %4153 }
 0x150   : > { %v4987_v48 = vpop.eup %4155 }
 0x151   : > { %v4993_v56 = vpop.eup %4157 }
 0x19d   : > { %v845_v25 = vpop.permute.xlu1 %844 }
 0x19e   : > { %v868_v27 = vmul.f32 %v4965_v24, %v845_v25 }
 0x19f   : > { %v847_v29 = vpop.permute.xlu0 %846 }
 0x1a0   : > { %884 = vrot.lane.b32.xlu1 %v868_v27, %s4613_s10  ;;  %v869_v34 = vmul.f32 %v4968_v31, %v847_v29 }
 0x1a1   : > { %v849_v33 = vpop.permute.xlu1 %848 }
 0x1a2   : > { %v870_v36 = vmul.f32 %v4971_v32, %v849_v33 }
 0x1a3   : > { %v851_v37 = vpop.permute.xlu0 %850 }
 0x1a4   : > { %888 = vrot.lane.b32.xlu0 %v870_v36, %s4613_s10  ;;  %886 = vrot.lane.b32.xlu1 %v869_v34, %s4613_s10  ;;  %v871_v43 = vmul.f32 %v4975_v39, %v851_v37  ;;  %v925_v37 = vsub.f32 1.0, %v4968_v31 }
 0x1a5   : > { %v853_v42 = vpop.permute.xlu1 %852 }
 0x1a6   : > { %v872_v44 = vmul.f32 %v4979_v41, %v853_v42  ;;  %v926_v42 = vsub.f32 1.0, %v4971_v32 }
 0x1a7   : > { %v855_v45 = vpop.permute.xlu0 %854 }
 0x1a8   : > { %890 = vrot.lane.b32.xlu0 %v871_v43, %s4613_s10  ;;  %892 = vrot.lane.b32.xlu1 %v872_v44, %s4613_s10  ;;  %v873_v52 = vmul.f32 %v4983_v46, %v855_v45 }
 0x1a9   : > { %v857_v49 = vpop.permute.xlu1 %856 }
 0x1aa   : > { %v874_v53 = vmul.f32 %v4987_v48, %v857_v49 }
 0x1ab   : > { %v859_v55 = vpop.permute.xlu0 %858 }
 0x1ac   : > { %894 = vrot.lane.b32.xlu0 %v873_v52, %s4613_s10  ;;  %896 = vrot.lane.b32.xlu1 %v874_v53, %s4613_s10  ;;  %v875_v58 = vmul.f32 %v4993_v56, %v859_v55  ;;  %v927_v53 = vsub.f32 1.0, %v4975_v39 }
 0x1b0   : > { %898 = vrot.lane.b32.xlu0 %v875_v58, %s4613_s10  ;;  %979 = vrot.lane.b32.xlu1 %v4881_v50, %s4614_s17  ;;  %v928_v58 = vsub.f32 1.0, %v4979_v41 }
 0x1b4   : > { %981 = vrot.lane.b32.xlu0 %v972_v59, %s4614_s17  ;;  %v924_v59 = vsub.f32 1.0, %v4965_v24 }
 0x1b8   : > { %983 = vrot.lane.b32.xlu0 %v973_v60, %s4614_s17 }
 0x1bc   : > { %985 = vrot.lane.b32.xlu0 %v974_v61, %s4614_s17 }
 0x1c0   : > { %987 = vrot.lane.b32.xlu0 %v975_v62, %s4614_s17  ;;  %v929_v62 = vsub.f32 1.0, %v4983_v46 }
 0x1c4   : > { %989 = vrot.lane.b32.xlu0 %v976_v63, %s4614_s17 }
 0x1c8   : > { %991 = vrot.lane.b32.xlu0 %v977_v3, %s4614_s17 }
 0x212   : > { %v885_v4 = vpop.permute.xlu1 %884 }
 0x213   : > { %v908_v7 = vadd.f32 %v885_v4, %v4926_v22 }
 0x215   : > { %4159 = vtanh.f32 %v908_v7 }
 0x216   : > { %v889_v57 = vpop.permute.xlu0 %888  ;;  %v887_v8 = vpop.permute.xlu1 %886 }
 0x217   : > { %v909_v9 = vadd.f32 %v887_v8, %v4930_v26  ;;  %v910_v10 = vadd.f32 %v889_v57, %v4932_v28 }
 0x219   : > { %4161 = vtanh.f32 %v909_v9 }
 0x21a   : > { %v891_v11 = vpop.permute.xlu0 %890  ;;  %v893_v13 = vpop.permute.xlu1 %892 }
 0x21b   : > { %v911_v12 = vadd.f32 %v891_v11, %v4940_v35  ;;  %v912_v14 = vadd.f32 %v893_v13, %v4944_v40  ;;  %v978_v40 = vrot.slane %v4881_v50, 7 }
 0x21d   : > { %4163 = vtanh.f32 %v911_v12 }
 0x21e   : > { %4165 = vtanh.f32 %v910_v10  ;;  %v895_v16 = vpop.permute.xlu0 %894  ;;  %v897_v26 = vpop.permute.xlu1 %896 }
 0x21f   : > { %v4160_v15 = vpop.eup %4159  ;;  %4167 = vtanh.f32 %v912_v14  ;;  %v913_v22 = vadd.f32 %v895_v16, %v4951_v51  ;;  %v914_v28 = vadd.f32 %v897_v26, %v4954_v54 }
 0x220   : > { %940 = vrot.lane.b32.xlu1 %v4160_v15, %s4615_s28 }
 0x221   : > { %4169 = vtanh.f32 %v913_v22 }
 0x222   : > { %v899_v17 = vpop.permute.xlu0 %898  ;;  %4171 = vtanh.f32 %v914_v28  ;;  %v980_v27 = vpop.permute.xlu1 %979  ;;  %v931_v28 = vsub.f32 1.0, %v4993_v56 }
 0x223   : > { %v4162_v6 = vpop.eup %4161  ;;  %v915_v19 = vadd.f32 %v899_v17, %v4961_v2  ;;  %v1003_v9 = vmul.f32 %v4965_v24, %v980_v27 }
 0x224   : > { %942 = vrot.lane.b32.xlu1 %v4162_v6, %s4615_s28 }
 0x225   : > { %4173 = vtanh.f32 %v915_v19 }
 0x226   : > { %v982_v50 = vpop.permute.xlu0 %981 }
 0x227   : > { %v4164_v35 = vpop.eup %4163  ;;  %v1004_v52 = vmul.f32 %v4968_v31, %v982_v50 }
 0x228   : > { %v4166_v18 = vpop.eup %4165  ;;  %946 = vrot.lane.b32.xlu0 %v4164_v35, %s4615_s28 }
 0x229   : > { %944 = vrot.lane.b32.xlu1 %v4166_v18, %s4615_s28  ;;  %v4168_v51 = vpop.eup %4167 }
 0x22a   : > { %v984_v23 = vpop.permute.xlu0 %983 }
 0x22b   : > { %v4170_v20 = vpop.eup %4169  ;;  %v1005_v55 = vmul.f32 %v4971_v32, %v984_v23  ;;  %v930_v32 = vsub.f32 1.0, %v4987_v48 }
 0x22c   : > { %993 = vrot.lane.b32.xlu0 %v978_v40, %s4614_s17  ;;  %v4172_v54 = vpop.eup %4171 }
 0x22d   : > { %948 = vrot.lane.b32.xlu1 %v4168_v51, %s4615_s28 }
 0x22e   : > { %v986_v25 = vpop.permute.xlu0 %985 }
 0x22f   : > { %v4174_v21 = vpop.eup %4173  ;;  %v1006_v7 = vmul.f32 %v4975_v39, %v986_v25 }
 0x231   : > { %950 = vrot.lane.b32.xlu1 %v4170_v20, %s4615_s28 }
 0x232   : > { %v988_v2 = vpop.permute.xlu0 %987 }
 0x233   : > { %v1007_v8 = vmul.f32 %v4979_v41, %v988_v2 }
 0x235   : > { %952 = vrot.lane.b32.xlu1 %v4172_v54, %s4615_s28 }
 0x236   : > { %v990_v30 = vpop.permute.xlu0 %989 }
 0x237   : > { %v1008_v10 = vmul.f32 %v4983_v46, %v990_v30 }
 0x239   : > { %954 = vrot.lane.b32.xlu1 %v4174_v21, %s4615_s28 }
 0x23a   : > { %v992_v34 = vpop.permute.xlu0 %991 }
 0x23b   : > { %v1009_v39 = vmul.f32 %v4987_v48, %v992_v34 }
 0x292   : > { %v941_v29 = vpop.permute.xlu1 %940 }
 0x293   : > { %v964_v31 = vmul.f32 %v941_v29, %v924_v59 }
 0x295   : > { %v5053_v16 = vadd.f32 %v1003_v9, %v964_v31 }
 0x296   : > { %v943_v33 = vpop.permute.xlu1 %942 }
 0x297   : > { %v965_v43 = vmul.f32 %v943_v33, %v925_v37 }
 0x299   : > { %v5036_v60 = vadd.f32 %v1004_v52, %v965_v43 }
 0x29a   : > { %v947_v44 = vpop.permute.xlu0 %946 }
 0x29b   : > { %v945_v36 = vpop.permute.xlu1 %944  ;;  %v967_v61 = vmul.f32 %v947_v44, %v927_v53  ;;  %v1083_v11 = vrot.slane %v5036_v60, 7 }
 0x29c   : > { %v966_v45 = vmul.f32 %v945_v36, %v926_v42 }
 0x29d   : > { %v5047_v12 = vadd.f32 %v1006_v7, %v967_v61  ;;  %v1084_v24 = vsel %vm558_vm2, %v1083_v11, %v5053_v16  ;;  %v5099_v61 = vld [vmem:[#allocation2 + $0x9] sm:$0x1]  ;;  %v5102_v7 = vld [vmem:[#allocation2 + $0x19] sm:$0x1] }
 0x29e   : > { %v5039_v63 = vadd.f32 %v1005_v55, %v966_v45  ;;  %v994_v26 = vpop.permute.xlu0 %993  ;;  %v5096_v55 = vld [vmem:[#allocation2 + $0x11] sm:$0x1] }
 0x29f   : > { %v949_v49 = vpop.permute.xlu1 %948  ;;  %v1087_v46 = vrot.slane %v5047_v12, 5  ;;  %v1010_v18 = vmul.f32 %v4993_v56, %v994_v26  ;;  %v5111_v26 = vld [vmem:[#allocation2 + $0x31] sm:$0x1] }
 0x2a0   : > { %v968_v3 = vmul.f32 %v949_v49, %v928_v58  ;;  %v1085_v13 = vrot.slane %v5039_v63, 6  ;;  %v5093_v49 = vld [vmem:[#allocation2 + $0x1] sm:$0x1] }
 0x2a2   : > { %v5050_v14 = vadd.f32 %v1007_v8, %v968_v3  ;;  %v1086_v35 = vsel %vm561_vm3, %v1085_v13, %v1084_v24  ;;  %v5108_v13 = vld [vmem:[#allocation2 + $0x29] sm:$0x1] }
 0x2a3   : > { %v951_v4 = vpop.permute.xlu1 %950  ;;  %v1088_v54 = vsel %vm564_vm4, %v1087_v46, %v1086_v35 }
 0x2a4   : > { %v969_v57 = vmul.f32 %v951_v4, %v929_v62  ;;  %v1089_v17 = vrot.slane %v5050_v14, 4 }
 0x2a6   : > { %v5055_v41 = vadd.f32 %v1008_v10, %v969_v57  ;;  %v1090_v21 = vsel %vm567_vm5, %v1089_v17, %v1088_v54 }
 0x2a7   : > { %v953_v15 = vpop.permute.xlu1 %952 }
 0x2a8   : > { %v970_v22 = vmul.f32 %v953_v15, %v930_v32  ;;  %v1091_v40 = vrot.slane %v5055_v41, 3  ;;  %v5105_v32 = vld [vmem:[#allocation2 + $0x21] sm:$0x1] }
 0x2aa   : > { %v5060_v6 = vadd.f32 %v1009_v39, %v970_v22  ;;  %v1092_v50 = vsel %vm570_vm6, %v1091_v40, %v1090_v21 }
 0x2ab   : > { %v955_v48 = vpop.permute.xlu1 %954 }
 0x2ac   : > { %v971_v19 = vmul.f32 %v955_v48, %v931_v28  ;;  %v1093_v51 = vrot.slane %v5060_v6, 2  ;;  %v5114_v28 = vld [vmem:[#allocation2 + $0x39] sm:$0x1] }
 0x2ae   : > { %v5068_v20 = vadd.f32 %v1010_v18, %v971_v19  ;;  %v1094_v25 = vsel %vm573_vm7, %v1093_v51, %v1092_v50 }
 0x2b0   : > { %v1095_v23 = vrot.slane %v5068_v20, 1 }
 0x2b2   : > { %v1096_v27 = vsel %vm576_vm8, %v1095_v23, %v1094_v25 }
 0x2b3   : > { %1097 = vrot.lane.b32.xlu1 %v1096_v27, %s4615_s28 }
 0x325   : > { %v1098_v56 = vpop.permute.xlu1 %1097 }
 0x326   : > { %3945 = vmatmul.mubr.msk.f32.vlgmr.msra.gmra.mrb[8].mxu0 %vm390_vm1, %v1098_v56 }
 0x327   : > { %4047 = vmatpush3.bf16.msra.mxu0 %v4845_v38  ;;  %3966 = vmatprep.mubr.msk.f32.mxu0 %vm4611_vm0, %v4612_v1 }
 0x328   : > { %4048 = vmatprep.subr.bf16.mxu0 %v4610_v0 }
 0x32b   : > { %4050 = vmatpush3.bf16.msra.mxu0 %v4869_v47 }
 0x32c   : > { %4057 = vmatprep.subr.bf16.mxu0 %v4610_v0 }
 0x3f9   : > { %v1167_v2 = vpop.f32.mrb[8].mxu0 }
 0x3fa   : > { %v3946_v29 = vpop.f32.mrb[9].mxu0  ;;  %v1243_v30 = vadd.f32 %v1167_v2, %v4907_v5  ;;  %v1173_v45 = vrot.slane %v1167_v2, 2  ;;  %v1172_v52 = vrot.slane %v1167_v2, 1  ;;  %v1187_v53 = vadd.f32 %v1167_v2, %v5093_v49 }
 0x3fb   : > { %v1174_v58 = vrot.slane %v1167_v2, 3  ;;  %v1175_v62 = vrot.slane %v1167_v2, 4  ;;  %v1176_v31 = vrot.slane %v1167_v2, 5  ;;  %v1177_v9 = vrot.slane %v1167_v2, 6 }
 0x3fc   : > { %1252 = vrot.lane.b32.xlu0 %v1243_v30, %s4613_s10  ;;  %v1246_v33 = vrot.slane %v1243_v30, 2  ;;  %v1245_v34 = vrot.slane %v1243_v30, 1  ;;  %v1247_v36 = vrot.slane %v1243_v30, 3  ;;  %v1248_v37 = vrot.slane %v1243_v30, 4 }
 0x3fd   : > { %v1249_v42 = vrot.slane %v1243_v30, 5  ;;  %v1250_v43 = vrot.slane %v1243_v30, 6  ;;  %v1251_v44 = vrot.slane %v1243_v30, 7  ;;  %v1189_v59 = vadd.f32 %v1173_v45, %v5096_v55 }
 0x3fe   : > { %1256 = vrot.lane.b32.xlu1 %v1246_v33, %s4613_s10  ;;  %v1188_v3 = vadd.f32 %v1172_v52, %v5099_v61  ;;  %v3771_v4 = vmul.f32 -1.442695, %v1187_v53  ;;  %v1190_v57 = vadd.f32 %v1174_v58, %v5102_v7  ;;  %v1191_v10 = vadd.f32 %v1175_v62, %v5105_v32 }
 0x3ff   : > { %v3773_v8 = vmul.f32 -1.442695, %v1189_v59  ;;  %v1178_v15 = vrot.slane %v1167_v2, 7  ;;  %v1192_v39 = vadd.f32 %v1176_v31, %v5108_v13  ;;  %v1193_v24 = vadd.f32 %v1177_v9, %v5111_v26 }
 0x400   : > { %1254 = vrot.lane.b32.xlu0 %v1245_v34, %s4613_s10  ;;  %4175 = vpow2.f32 %v3771_v4  ;;  %v3772_v11 = vmul.f32 -1.442695, %v1188_v3  ;;  %v3774_v22 = vmul.f32 -1.442695, %v1190_v57  ;;  %v3775_v46 = vmul.f32 -1.442695, %v1191_v10 }
 0x401   : > { %4177 = vpow2.f32 %v3773_v8  ;;  %v1194_v35 = vadd.f32 %v1178_v15, %v5114_v28  ;;  %v3776_v17 = vmul.f32 -1.442695, %v1192_v39  ;;  %v3777_v48 = vmul.f32 -1.442695, %v1193_v24 }
 0x402   : > { %1258 = vrot.lane.b32.xlu1 %v1247_v36, %s4613_s10  ;;  %4179 = vpow2.f32 %v3772_v11 }
 0x403   : > { %4181 = vpow2.f32 %v3774_v22  ;;  %v3778_v40 = vmul.f32 -1.442695, %v1194_v35 }
 0x404   : > { %1260 = vrot.lane.b32.xlu0 %v1248_v37, %s4613_s10  ;;  %4183 = vpow2.f32 %v3775_v46 }
 0x405   : > { %4185 = vpow2.f32 %v3776_v17 }
 0x406   : > { %1262 = vrot.lane.b32.xlu1 %v1249_v42, %s4613_s10  ;;  %4187 = vpow2.f32 %v3777_v48 }
 0x407   : > { %4189 = vpow2.f32 %v3778_v40 }
 0x408   : > { %1264 = vrot.lane.b32.xlu0 %v1250_v43, %s4613_s10 }
 0x40a   : > { %1266 = vrot.lane.b32.xlu1 %v1251_v44, %s4613_s10  ;;  %v4176_v18 = vpop.eup %4175 }
 0x40b   : > { %v4178_v19 = vpop.eup %4177  ;;  %v1219_v51 = vadd.f32 1.0, %v4176_v18 }
 0x40c   : > { %v4180_v54 = vpop.eup %4179  ;;  %v1221_v21 = vadd.f32 1.0, %v4178_v19 }
 0x40d   : > { %v4182_v50 = vpop.eup %4181  ;;  %4191 = vrcp.f32 %v1219_v51  ;;  %v1220_v23 = vadd.f32 1.0, %v4180_v54 }
 0x40e   : > { %v4184_v25 = vpop.eup %4183  ;;  %4193 = vrcp.f32 %v1221_v21  ;;  %v1222_v27 = vadd.f32 1.0, %v4182_v50 }
 0x40f   : > { %v4186_v56 = vpop.eup %4185  ;;  %4195 = vrcp.f32 %v1220_v23  ;;  %v1223_v2 = vadd.f32 1.0, %v4184_v25 }
 0x410   : > { %v4188_v29 = vpop.eup %4187  ;;  %4197 = vrcp.f32 %v1222_v27  ;;  %v1224_v30 = vadd.f32 1.0, %v4186_v56 }
 0x411   : > { %v4190_v33 = vpop.eup %4189  ;;  %4199 = vrcp.f32 %v1223_v2  ;;  %v1225_v34 = vadd.f32 1.0, %v4188_v29 }
 0x412   : > { %4201 = vrcp.f32 %v1224_v30  ;;  %v1226_v42 = vadd.f32 1.0, %v4190_v33 }
 0x413   : > { %4203 = vrcp.f32 %v1225_v34 }
 0x414   : > { %4205 = vrcp.f32 %v1226_v42 }
 0x417   : > { %v5117_v36 = vpop.eup %4191 }
 0x418   : > { %v5120_v44 = vpop.eup %4193  ;;  %v1332_v42 = vsub.f32 1.0, %v5117_v36 }
 0x419   : > { %v5124_v53 = vpop.eup %4195  ;;  %v1334_v34 = vsub.f32 1.0, %v5120_v44 }
 0x41a   : > { %v5128_v62 = vpop.eup %4197 }
 0x41b   : > { %v5132_v31 = vpop.eup %4199 }
 0x41c   : > { %v5136_v9 = vpop.eup %4201 }
 0x41d   : > { %v5140_v15 = vpop.eup %4203 }
 0x41e   : > { %v5144_v24 = vpop.eup %4205 }
 0x46e   : > { %v1253_v37 = vpop.permute.xlu0 %1252 }
 0x46f   : > { %v1276_v43 = vmul.f32 %v5117_v36, %v1253_v37 }
 0x470   : > { %v1257_v45 = vpop.permute.xlu1 %1256 }
 0x471   : > { %v1278_v52 = vmul.f32 %v5120_v44, %v1257_v45  ;;  %1292 = vrot.lane.b32.xlu0 %v1276_v43, %s4613_s10  ;;  %v1333_v45 = vsub.f32 1.0, %v5124_v53 }
 0x472   : > { %v1255_v58 = vpop.permute.xlu0 %1254 }
 0x473   : > { %v1277_v59 = vmul.f32 %v5124_v53, %v1255_v58  ;;  %1296 = vrot.lane.b32.xlu1 %v1278_v52, %s4613_s10  ;;  %v1382_v52 = vmul.f32 %v5120_v44, %v5039_v63 }
 0x474   : > { %v1259_v3 = vpop.permute.xlu1 %1258 }
 0x475   : > { %v1279_v4 = vmul.f32 %v5128_v62, %v1259_v3  ;;  %1294 = vrot.lane.b32.xlu0 %v1277_v59, %s4613_s10  ;;  %v1381_v3 = vmul.f32 %v5124_v53, %v5036_v60  ;;  %v1384_v53 = vmul.f32 %v5132_v31, %v5050_v14 }
 0x476   : > { %v1261_v57 = vpop.permute.xlu0 %1260 }
 0x477   : > { %v1280_v8 = vmul.f32 %v5132_v31, %v1261_v57  ;;  %1298 = vrot.lane.b32.xlu1 %v1279_v4, %s4613_s10  ;;  %v1335_v57 = vsub.f32 1.0, %v5128_v62 }
 0x478   : > { %v1263_v10 = vpop.permute.xlu1 %1262 }
 0x479   : > { %v1281_v11 = vmul.f32 %v5136_v9, %v1263_v10  ;;  %1300 = vrot.lane.b32.xlu0 %v1280_v8, %s4613_s10  ;;  %v1380_v8 = vmul.f32 %v5117_v36, %v5053_v16 }
 0x47a   : > { %v1265_v39 = vpop.permute.xlu0 %1264 }
 0x47b   : > { %v1282_v22 = vmul.f32 %v5140_v15, %v1265_v39  ;;  %1302 = vrot.lane.b32.xlu1 %v1281_v11, %s4613_s10 }
 0x47c   : > { %v1267_v46 = vpop.permute.xlu1 %1266 }
 0x47d   : > { %v1283_v35 = vmul.f32 %v5144_v24, %v1267_v46  ;;  %1304 = vrot.lane.b32.xlu0 %v1282_v22, %s4613_s10  ;;  %v1383_v22 = vmul.f32 %v5128_v62, %v5047_v12  ;;  %v1336_v46 = vsub.f32 1.0, %v5132_v31  ;;  %v1385_v62 = vmul.f32 %v5136_v9, %v5055_v41 }
 0x47f   : > { %1306 = vrot.lane.b32.xlu1 %v1283_v35, %s4613_s10 }
 0x4e3   : > { %v1293_v17 = vpop.permute.xlu0 %1292 }
 0x4e4   : > { %v1316_v48 = vadd.f32 %v1293_v17, %v5093_v49  ;;  %v1337_v17 = vsub.f32 1.0, %v5136_v9 }
 0x4e5   : > { %v1297_v18 = vpop.permute.xlu1 %1296 }
 0x4e6   : > { %4207 = vtanh.f32 %v1316_v48  ;;  %v1318_v40 = vadd.f32 %v1297_v18, %v5096_v55 }
 0x4e7   : > { %v1295_v19 = vpop.permute.xlu0 %1294 }
 0x4e8   : > { %4209 = vtanh.f32 %v1318_v40  ;;  %v1317_v51 = vadd.f32 %v1295_v19, %v5099_v61 }
 0x4e9   : > { %v1299_v54 = vpop.permute.xlu1 %1298 }
 0x4ea   : > { %4211 = vtanh.f32 %v1317_v51  ;;  %v1319_v21 = vadd.f32 %v1299_v54, %v5102_v7  ;;  %v1338_v54 = vsub.f32 1.0, %v5140_v15 }
 0x4eb   : > { %v1301_v50 = vpop.permute.xlu0 %1300 }
 0x4ec   : > { %4213 = vtanh.f32 %v1319_v21  ;;  %v1320_v23 = vadd.f32 %v1301_v50, %v5105_v32 }
 0x4ed   : > { %v1303_v25 = vpop.permute.xlu1 %1302 }
 0x4ee   : > { %4215 = vtanh.f32 %v1320_v23  ;;  %v1321_v49 = vadd.f32 %v1303_v25, %v5108_v13  ;;  %v1386_v25 = vmul.f32 %v5140_v15, %v5060_v6 }
 0x4ef   : > { %v1305_v27 = vpop.permute.xlu0 %1304 }
 0x4f0   : > { %v4208_v56 = vpop.eup %4207  ;;  %4217 = vtanh.f32 %v1321_v49  ;;  %v1322_v55 = vadd.f32 %v1305_v27, %v5111_v26  ;;  %v1339_v27 = vsub.f32 1.0, %v5144_v24 }
 0x4f1   : > { %v1307_v2 = vpop.permute.xlu1 %1306  ;;  %1348 = vrot.lane.b32.xlu0 %v4208_v56, %s4615_s28 }
 0x4f2   : > { %v4210_v61 = vpop.eup %4209  ;;  %4219 = vtanh.f32 %v1322_v55  ;;  %v1323_v7 = vadd.f32 %v1307_v2, %v5114_v28 }
 0x4f3   : > { %1352 = vrot.lane.b32.xlu1 %v4210_v61, %s4615_s28 }
 0x4f4   : > { %v4212_v29 = vpop.eup %4211  ;;  %4221 = vtanh.f32 %v1323_v7  ;;  %v1387_v7 = vmul.f32 %v5144_v24, %v5068_v20 }
 0x4f5   : > { %1350 = vrot.lane.b32.xlu0 %v4212_v29, %s4615_s28 }
 0x4f6   : > { %v4214_v32 = vpop.eup %4213 }
 0x4f7   : > { %1354 = vrot.lane.b32.xlu1 %v4214_v32, %s4615_s28 }
 0x4f8   : > { %v4216_v13 = vpop.eup %4215 }
 0x4f9   : > { %1356 = vrot.lane.b32.xlu0 %v4216_v13, %s4615_s28 }
 0x4fa   : > { %v4218_v26 = vpop.eup %4217 }
 0x4fb   : > { %1358 = vrot.lane.b32.xlu1 %v4218_v26, %s4615_s28 }
 0x4fc   : > { %v4220_v30 = vpop.eup %4219 }
 0x4fd   : > { %1360 = vrot.lane.b32.xlu0 %v4220_v30, %s4615_s28 }
 0x4fe   : > { %v4222_v33 = vpop.eup %4221 }
 0x4ff   : > { %1362 = vrot.lane.b32.xlu1 %v4222_v33, %s4615_s28 }
 0x563   : > { %v1349_v28 = vpop.permute.xlu0 %1348 }
 0x564   : > { %v1372_v59 = vmul.f32 %v1349_v28, %v1332_v42 }
 0x565   : > { %v1353_v37 = vpop.permute.xlu1 %1352 }
 0x566   : > { %v1374_v43 = vmul.f32 %v1353_v37, %v1334_v34  ;;  %v5185_v48 = vadd.f32 %v1380_v8, %v1372_v59 }
 0x567   : > { %v1351_v58 = vpop.permute.xlu0 %1350 }
 0x568   : > { %v1373_v4 = vmul.f32 %v1351_v58, %v1333_v45  ;;  %v5175_v10 = vadd.f32 %v1382_v52, %v1374_v43 }
 0x569   : > { %v1355_v11 = vpop.permute.xlu1 %1354 }
 0x56a   : > { %v5177_v39 = vadd.f32 %v1381_v3, %v1373_v4  ;;  %v1375_v44 = vmul.f32 %v1355_v11, %v1335_v57  ;;  %v1453_v19 = vrot.slane %v5175_v10, 6 }
 0x56b   : > { %v1357_v35 = vpop.permute.xlu0 %1356 }
 0x56c   : > { %v1451_v36 = vrot.slane %v5177_v39, 7  ;;  %v5188_v18 = vadd.f32 %v1383_v22, %v1375_v44  ;;  %v1376_v40 = vmul.f32 %v1357_v35, %v1336_v46  ;;  %v5237_v44 = vld [vmem:[#allocation2 + $0x2] sm:$0x1]  ;;  %v5240_v35 = vld [vmem:[#allocation2 + $0x12] sm:$0x1] }
 0x56d   : > { %v1359_v51 = vpop.permute.xlu1 %1358 }
 0x56e   : > { %v1452_v31 = vsel %vm558_vm2, %v1451_v36, %v5185_v48  ;;  %v1455_v21 = vrot.slane %v5188_v18, 5  ;;  %v5197_v50 = vadd.f32 %v1384_v53, %v1376_v40  ;;  %v1377_v23 = vmul.f32 %v1359_v51, %v1337_v17  ;;  %v5243_v40 = vld [vmem:[#allocation2 + $0xa] sm:$0x1] }
 0x56f   : > { %v1361_v49 = vpop.permute.xlu0 %1360  ;;  %v1454_v56 = vsel %vm561_vm3, %v1453_v19, %v1452_v31 }
 0x570   : > { %v1457_v9 = vrot.slane %v5197_v50, 4  ;;  %v5204_v55 = vadd.f32 %v1385_v62, %v1377_v23  ;;  %v1378_v2 = vmul.f32 %v1361_v49, %v1338_v54  ;;  %v1456_v61 = vsel %vm564_vm4, %v1455_v21, %v1454_v56  ;;  %v5246_v54 = vld [vmem:[#allocation2 + $0x1a] sm:$0x1] }
 0x571   : > { %v1363_v29 = vpop.permute.xlu1 %1362 }
 0x572   : > { %v1459_v32 = vrot.slane %v5204_v55, 3  ;;  %v5210_v13 = vadd.f32 %v1386_v25, %v1378_v2  ;;  %v1379_v15 = vmul.f32 %v1363_v29, %v1339_v27  ;;  %v1458_v26 = vsel %vm567_vm5, %v1457_v9, %v1456_v61  ;;  %v5249_v25 = vld [vmem:[#allocation2 + $0x22] sm:$0x1]  ;;  %v5252_v9 = vld [vmem:[#allocation2 + $0x2a] sm:$0x1] }
 0x573   : > { %v5255_v29 = vld [vmem:[#allocation2 + $0x32] sm:$0x1] }
 0x574   : > { %v1461_v30 = vrot.slane %v5210_v13, 2  ;;  %v5214_v33 = vadd.f32 %v1387_v7, %v1379_v15  ;;  %v1460_v28 = vsel %vm570_vm6, %v1459_v32, %v1458_v26  ;;  %v5258_v26 = vld [vmem:[#allocation2 + $0x3a] sm:$0x1] }
 0x576   : > { %v1462_v34 = vsel %vm573_vm7, %v1461_v30, %v1460_v28  ;;  %v1463_v37 = vrot.slane %v5214_v33, 1 }
 0x578   : > { %v1464_v24 = vsel %vm576_vm8, %v1463_v37, %v1462_v34 }
 0x579   : > { %1465 = vrot.lane.b32.xlu0 %v1464_v24, %s4615_s28 }
 0x5eb   : > { %v1466_v42 = vpop.permute.xlu0 %1465 }
 0x5ec   : > { %3956 = vmatmul.mubr.msk.f32.vlgmr.msra.gmra.mrb[4].mxu1 %vm390_vm1, %v1466_v42 }
 0x5ed   : > { %4053 = vmatpush3.bf16.msra.mxu1 %v4845_v38  ;;  %3977 = vmatprep.mubr.msk.f32.mxu1 %vm4611_vm0, %v4612_v1 }
 0x5ee   : > { %4054 = vmatprep.subr.bf16.mxu1 %v4610_v0 }
 0x5f1   : > { %4056 = vmatpush3.bf16.msra.mxu1 %v4869_v47 }
 0x5f2   : > { %4063 = vmatprep.subr.bf16.mxu1 %v4610_v0 }
 0x6bf   : > { %v1535_v43 = vpop.f32.mrb[4].mxu1 }
 0x6c0   : > { %v3957_v45 = vpop.f32.mrb[5].mxu1  ;;  %v1611_v52 = vadd.f32 %v1535_v43, %v4907_v5  ;;  %v1541_v22 = vrot.slane %v1535_v43, 2  ;;  %v1540_v46 = vrot.slane %v1535_v43, 1  ;;  %v1555_v53 = vadd.f32 %v1535_v43, %v5237_v44 }
 0x6c1   : > { %v1542_v17 = vrot.slane %v1535_v43, 3  ;;  %v1543_v19 = vrot.slane %v1535_v43, 4  ;;  %v1544_v31 = vrot.slane %v1535_v43, 5  ;;  %v1545_v49 = vrot.slane %v1535_v43, 6 }
 0x6c2   : > { %1620 = vrot.lane.b32.xlu1 %v1611_v52, %s4613_s10  ;;  %v1614_v58 = vrot.slane %v1611_v52, 2  ;;  %v1613_v59 = vrot.slane %v1611_v52, 1  ;;  %v1615_v3 = vrot.slane %v1611_v52, 3  ;;  %v1616_v4 = vrot.slane %v1611_v52, 4 }
 0x6c3   : > { %v1617_v57 = vrot.slane %v1611_v52, 5  ;;  %v1618_v8 = vrot.slane %v1611_v52, 6  ;;  %v1619_v11 = vrot.slane %v1611_v52, 7  ;;  %v1557_v36 = vadd.f32 %v1541_v22, %v5240_v35 }
 0x6c4   : > { %1624 = vrot.lane.b32.xlu0 %v1614_v58, %s4613_s10  ;;  %v1556_v62 = vadd.f32 %v1540_v46, %v5243_v40  ;;  %v3780_v51 = vmul.f32 -1.442695, %v1555_v53  ;;  %v1558_v21 = vadd.f32 %v1542_v17, %v5246_v54  ;;  %v1559_v27 = vadd.f32 %v1543_v19, %v5249_v25 }
 0x6c5   : > { %v3782_v23 = vmul.f32 -1.442695, %v1557_v36  ;;  %v1546_v2 = vrot.slane %v1535_v43, 7  ;;  %v1560_v61 = vadd.f32 %v1544_v31, %v5252_v9  ;;  %v1561_v32 = vadd.f32 %v1545_v49, %v5255_v29 }
 0x6c6   : > { %1622 = vrot.lane.b32.xlu1 %v1613_v59, %s4613_s10  ;;  %4223 = vpow2.f32 %v3780_v51  ;;  %v3781_v56 = vmul.f32 -1.442695, %v1556_v62  ;;  %v3783_v7 = vmul.f32 -1.442695, %v1558_v21  ;;  %v3784_v15 = vmul.f32 -1.442695, %v1559_v27 }
 0x6c7   : > { %4225 = vpow2.f32 %v3782_v23  ;;  %v1562_v30 = vadd.f32 %v1546_v2, %v5258_v26  ;;  %v3785_v28 = vmul.f32 -1.442695, %v1560_v61  ;;  %v3786_v34 = vmul.f32 -1.442695, %v1561_v32 }
 0x6c8   : > { %1626 = vrot.lane.b32.xlu0 %v1615_v3, %s4613_s10  ;;  %4227 = vpow2.f32 %v3781_v56 }
 0x6c9   : > { %4229 = vpow2.f32 %v3783_v7  ;;  %v3787_v24 = vmul.f32 -1.442695, %v1562_v30 }
 0x6ca   : > { %1628 = vrot.lane.b32.xlu1 %v1616_v4, %s4613_s10  ;;  %4231 = vpow2.f32 %v3784_v15 }
 0x6cb   : > { %4233 = vpow2.f32 %v3785_v28 }
 0x6cc   : > { %1630 = vrot.lane.b32.xlu0 %v1617_v57, %s4613_s10  ;;  %4235 = vpow2.f32 %v3786_v34 }
 0x6cd   : > { %4237 = vpow2.f32 %v3787_v24 }
 0x6ce   : > { %1632 = vrot.lane.b32.xlu1 %v1618_v8, %s4613_s10 }
 0x6d0   : > { %1634 = vrot.lane.b32.xlu0 %v1619_v11, %s4613_s10  ;;  %v4224_v37 = vpop.eup %4223 }
 0x6d1   : > { %v4226_v42 = vpop.eup %4225  ;;  %v1587_v43 = vadd.f32 1.0, %v4224_v37 }
 0x6d2   : > { %v4228_v45 = vpop.eup %4227  ;;  %v1589_v52 = vadd.f32 1.0, %v4226_v42 }
 0x6d3   : > { %v4230_v58 = vpop.eup %4229  ;;  %4239 = vrcp.f32 %v1587_v43  ;;  %v1588_v59 = vadd.f32 1.0, %v4228_v45 }
 0x6d4   : > { %v4232_v3 = vpop.eup %4231  ;;  %4241 = vrcp.f32 %v1589_v52  ;;  %v1590_v4 = vadd.f32 1.0, %v4230_v58 }
 0x6d5   : > { %v4234_v57 = vpop.eup %4233  ;;  %4243 = vrcp.f32 %v1588_v59  ;;  %v1591_v8 = vadd.f32 1.0, %v4232_v3 }
 0x6d6   : > { %v4236_v11 = vpop.eup %4235  ;;  %4245 = vrcp.f32 %v1590_v4  ;;  %v1592_v22 = vadd.f32 1.0, %v4234_v57 }
 0x6d7   : > { %v4238_v46 = vpop.eup %4237  ;;  %4247 = vrcp.f32 %v1591_v8  ;;  %v1593_v53 = vadd.f32 1.0, %v4236_v11 }
 0x6d8   : > { %4249 = vrcp.f32 %v1592_v22  ;;  %v1594_v19 = vadd.f32 1.0, %v4238_v46 }
 0x6d9   : > { %4251 = vrcp.f32 %v1593_v53 }
 0x6da   : > { %4253 = vrcp.f32 %v1594_v19 }
 0x6dd   : > { %v5261_v17 = vpop.eup %4239 }
 0x6de   : > { %v5264_v51 = vpop.eup %4241 }
 0x6df   : > { %v5268_v23 = vpop.eup %4243 }
 0x6e0   : > { %v5272_v56 = vpop.eup %4245 }
 0x6e1   : > { %v5276_v7 = vpop.eup %4247 }
 0x6e2   : > { %v5280_v30 = vpop.eup %4249 }
 0x6e3   : > { %v5284_v37 = vpop.eup %4251 }
 0x6e4   : > { %v5288_v43 = vpop.eup %4253 }
 0x734   : > { %v1621_v36 = vpop.permute.xlu1 %1620 }
 0x735   : > { %v1644_v62 = vmul.f32 %v5261_v17, %v1621_v36 }
 0x736   : > { %v1625_v31 = vpop.permute.xlu0 %1624 }
 0x737   : > { %v1646_v21 = vmul.f32 %v5264_v51, %v1625_v31  ;;  %1660 = vrot.lane.b32.xlu1 %v1644_v62, %s4613_s10 }
 0x738   : > { %v1623_v49 = vpop.permute.xlu1 %1622 }
 0x739   : > { %v1645_v27 = vmul.f32 %v5268_v23, %v1623_v49  ;;  %1664 = vrot.lane.b32.xlu0 %v1646_v21, %s4613_s10 }
 0x73a   : > { %v1627_v2 = vpop.permute.xlu0 %1626 }
 0x73b   : > { %v1647_v61 = vmul.f32 %v5272_v56, %v1627_v2  ;;  %1662 = vrot.lane.b32.xlu1 %v1645_v27, %s4613_s10  ;;  %v1702_v2 = vsub.f32 1.0, %v5264_v51 }
 0x73c   : > { %v1629_v32 = vpop.permute.xlu1 %1628 }
 0x73d   : > { %v1648_v15 = vmul.f32 %v5276_v7, %v1629_v32  ;;  %1666 = vrot.lane.b32.xlu0 %v1647_v61, %s4613_s10  ;;  %v1700_v32 = vsub.f32 1.0, %v5261_v17 }
 0x73e   : > { %v1631_v28 = vpop.permute.xlu0 %1630 }
 0x73f   : > { %v1649_v34 = vmul.f32 %v5280_v30, %v1631_v28  ;;  %1668 = vrot.lane.b32.xlu1 %v1648_v15, %s4613_s10  ;;  %v1701_v28 = vsub.f32 1.0, %v5268_v23 }
 0x740   : > { %v1633_v24 = vpop.permute.xlu1 %1632 }
 0x741   : > { %v1650_v42 = vmul.f32 %v5284_v37, %v1633_v24  ;;  %1670 = vrot.lane.b32.xlu0 %v1649_v34, %s4613_s10  ;;  %v1750_v34 = vmul.f32 %v5264_v51, %v5175_v10 }
 0x742   : > { %v1635_v45 = vpop.permute.xlu0 %1634 }
 0x743   : > { %v1651_v52 = vmul.f32 %v5288_v43, %v1635_v45  ;;  %1672 = vrot.lane.b32.xlu1 %v1650_v42, %s4613_s10  ;;  %v1749_v45 = vmul.f32 %v5268_v23, %v5177_v39  ;;  %v1752_v23 = vmul.f32 %v5276_v7, %v5197_v50 }
 0x745   : > { %1674 = vrot.lane.b32.xlu0 %v1651_v52, %s4613_s10 }
 0x7a9   : > { %v1661_v58 = vpop.permute.xlu1 %1660 }
 0x7aa   : > { %v1684_v59 = vadd.f32 %v1661_v58, %v5237_v44  ;;  %v1703_v58 = vsub.f32 1.0, %v5272_v56 }
 0x7ab   : > { %v1665_v3 = vpop.permute.xlu0 %1664 }
 0x7ac   : > { %4255 = vtanh.f32 %v1684_v59  ;;  %v1686_v4 = vadd.f32 %v1665_v3, %v5240_v35  ;;  %v1748_v59 = vmul.f32 %v5261_v17, %v5185_v48 }
 0x7ad   : > { %v1663_v57 = vpop.permute.xlu1 %1662 }
 0x7ae   : > { %4257 = vtanh.f32 %v1686_v4  ;;  %v1685_v8 = vadd.f32 %v1663_v57, %v5243_v40 }
 0x7af   : > { %v1667_v11 = vpop.permute.xlu0 %1666 }
 0x7b0   : > { %4259 = vtanh.f32 %v1685_v8  ;;  %v1687_v22 = vadd.f32 %v1667_v11, %v5246_v54  ;;  %v1751_v8 = vmul.f32 %v5272_v56, %v5188_v18  ;;  %v1704_v11 = vsub.f32 1.0, %v5276_v7 }
 0x7b1   : > { %v1669_v46 = vpop.permute.xlu1 %1668  ;;  %v1753_v56 = vmul.f32 %v5280_v30, %v5204_v55 }
 0x7b2   : > { %4261 = vtanh.f32 %v1687_v22  ;;  %v1688_v53 = vadd.f32 %v1669_v46, %v5249_v25  ;;  %v1705_v46 = vsub.f32 1.0, %v5280_v30 }
 0x7b3   : > { %v1671_v36 = vpop.permute.xlu0 %1670 }
 0x7b4   : > { %4263 = vtanh.f32 %v1688_v53  ;;  %v1689_v44 = vadd.f32 %v1671_v36, %v5252_v9 }
 0x7b5   : > { %v1673_v19 = vpop.permute.xlu1 %1672 }
 0x7b6   : > { %v4256_v62 = vpop.eup %4255  ;;  %4265 = vtanh.f32 %v1689_v44  ;;  %v1690_v35 = vadd.f32 %v1673_v19, %v5255_v29 }
 0x7b7   : > { %v1675_v31 = vpop.permute.xlu0 %1674  ;;  %1716 = vrot.lane.b32.xlu1 %v4256_v62, %s4615_s28 }
 0x7b8   : > { %v4258_v40 = vpop.eup %4257  ;;  %4267 = vtanh.f32 %v1690_v35  ;;  %v1691_v54 = vadd.f32 %v1675_v31, %v5258_v26  ;;  %v1706_v35 = vsub.f32 1.0, %v5284_v37 }
 0x7b9   : > { %1720 = vrot.lane.b32.xlu0 %v4258_v40, %s4615_s28 }
 0x7ba   : > { %v4260_v21 = vpop.eup %4259  ;;  %4269 = vtanh.f32 %v1691_v54 }
 0x7bb   : > { %1718 = vrot.lane.b32.xlu1 %v4260_v21, %s4615_s28  ;;  %v1754_v21 = vmul.f32 %v5284_v37, %v5210_v13 }
 0x7bc   : > { %v4262_v25 = vpop.eup %4261 }
 0x7bd   : > { %1722 = vrot.lane.b32.xlu0 %v4262_v25, %s4615_s28 }
 0x7be   : > { %v4264_v9 = vpop.eup %4263 }
 0x7bf   : > { %1724 = vrot.lane.b32.xlu1 %v4264_v9, %s4615_s28  ;;  %v1707_v9 = vsub.f32 1.0, %v5288_v43 }
 0x7c0   : > { %v4266_v29 = vpop.eup %4265 }
 0x7c1   : > { %1726 = vrot.lane.b32.xlu0 %v4266_v29, %s4615_s28 }
 0x7c2   : > { %v4268_v49 = vpop.eup %4267 }
 0x7c3   : > { %1728 = vrot.lane.b32.xlu1 %v4268_v49, %s4615_s28 }
 0x7c4   : > { %v4270_v27 = vpop.eup %4269 }
 0x7c5   : > { %1730 = vrot.lane.b32.xlu0 %v4270_v27, %s4615_s28 }
 0x829   : > { %v1717_v26 = vpop.permute.xlu1 %1716 }
 0x82a   : > { %v1740_v42 = vmul.f32 %v1717_v26, %v1700_v32 }
 0x82b   : > { %v1721_v61 = vpop.permute.xlu0 %1720 }
 0x82c   : > { %v1742_v15 = vmul.f32 %v1721_v61, %v1702_v2  ;;  %v5329_v53 = vadd.f32 %v1748_v59, %v1740_v42  ;;  %v1755_v2 = vmul.f32 %v5288_v43, %v5214_v33 }
 0x82d   : > { %v1719_v24 = vpop.permute.xlu1 %1718 }
 0x82e   : > { %v1741_v52 = vmul.f32 %v1719_v24, %v1701_v28  ;;  %v5319_v3 = vadd.f32 %v1750_v34, %v1742_v15 }
 0x82f   : > { %v1723_v4 = vpop.permute.xlu0 %1722 }
 0x830   : > { %v5321_v57 = vadd.f32 %v1749_v45, %v1741_v52  ;;  %v1743_v51 = vmul.f32 %v1723_v4, %v1703_v58  ;;  %v1821_v19 = vrot.slane %v5319_v3, 6 }
 0x831   : > { %v1725_v22 = vpop.permute.xlu1 %1724 }
 0x832   : > { %v1819_v17 = vrot.slane %v5321_v57, 7  ;;  %v5332_v36 = vadd.f32 %v1751_v8, %v1743_v51  ;;  %v1744_v44 = vmul.f32 %v1725_v22, %v1704_v11 }
 0x833   : > { %v1727_v62 = vpop.permute.xlu0 %1726 }
 0x834   : > { %v1820_v7 = vsel %vm558_vm2, %v1819_v17, %v5329_v53  ;;  %v1823_v31 = vrot.slane %v5332_v36, 5  ;;  %v5341_v40 = vadd.f32 %v1752_v23, %v1744_v44  ;;  %v1745_v54 = vmul.f32 %v1727_v62, %v1705_v46 }
 0x835   : > { %v1729_v25 = vpop.permute.xlu1 %1728  ;;  %v1822_v29 = vsel %vm561_vm3, %v1821_v19, %v1820_v7  ;;  %v5384_v7 = vld [vmem:[#allocation2 + $0x13] sm:$0x1] }
 0x836   : > { %v1825_v30 = vrot.slane %v5341_v40, 4  ;;  %v5348_v49 = vadd.f32 %v1753_v56, %v1745_v54  ;;  %v1746_v27 = vmul.f32 %v1729_v25, %v1706_v35  ;;  %v1824_v26 = vsel %vm564_vm4, %v1823_v31, %v1822_v29  ;;  %v5381_v56 = vld [vmem:[#allocation2 + $0x3] sm:$0x1] }
 0x837   : > { %v1731_v61 = vpop.permute.xlu0 %1730 }
 0x838   : > { %v1827_v32 = vrot.slane %v5348_v49, 3  ;;  %v5354_v15 = vadd.f32 %v1754_v21, %v1746_v27  ;;  %v1747_v37 = vmul.f32 %v1731_v61, %v1707_v9  ;;  %v1826_v28 = vsel %vm567_vm5, %v1825_v30, %v1824_v26  ;;  %v5387_v21 = vld [vmem:[#allocation2 + $0xb] sm:$0x1]  ;;  %v5390_v30 = vld [vmem:[#allocation2 + $0x1b] sm:$0x1] }
 0x839   : > { %v5393_v61 = vld [vmem:[#allocation2 + $0x23] sm:$0x1] }
 0x83a   : > { %v1829_v34 = vrot.slane %v5354_v15, 2  ;;  %v5358_v24 = vadd.f32 %v1755_v2, %v1747_v37  ;;  %v1828_v42 = vsel %vm570_vm6, %v1827_v32, %v1826_v28 }
 0x83c   : > { %v1830_v45 = vsel %vm573_vm7, %v1829_v34, %v1828_v42  ;;  %v1831_v52 = vrot.slane %v5358_v24, 1  ;;  %v5396_v34 = vld [vmem:[#allocation2 + $0x2b] sm:$0x1] }
 0x83e   : > { %v1832_v43 = vsel %vm576_vm8, %v1831_v52, %v1830_v45 }
 0x83f   : > { %1833 = vrot.lane.b32.xlu1 %v1832_v43, %s4615_s28  ;;  %v5399_v43 = vld [vmem:[#allocation2 + $0x33] sm:$0x1] }
 0x8b1   : > { %v1834_v58 = vpop.permute.xlu1 %1833 }
 0x8b2   : > { %3967 = vmatmul.mubr.msk.f32.vlgmr.msra.gmra.mrb[10].mxu0 %vm390_vm1, %v1834_v58 }
 0x8b3   : > { %4059 = vmatpush3.bf16.msra.mxu0 %v4845_v38  ;;  %3988 = vmatprep.mubr.msk.f32.mxu0 %vm4611_vm0, %v4612_v1 }
 0x8b4   : > { %4060 = vmatprep.subr.bf16.mxu0 %v4610_v0 }
 0x8b7   : > { %4062 = vmatpush3.bf16.msra.mxu0 %v4869_v47 }
 0x8b8   : > { %4069 = vmatprep.subr.bf16.mxu0 %v4610_v0 }
 0x985   : > { %v1903_v59 = vpop.f32.mrb[10].mxu0 }
 0x986   : > { %v3968_v4 = vpop.f32.mrb[11].mxu0  ;;  %v1979_v8 = vadd.f32 %v1903_v59, %v4907_v5  ;;  %v1909_v19 = vrot.slane %v1903_v59, 2  ;;  %v1908_v62 = vrot.slane %v1903_v59, 1  ;;  %v1923_v35 = vadd.f32 %v1903_v59, %v5381_v56 }
 0x987   : > { %v1910_v31 = vrot.slane %v1903_v59, 3  ;;  %v1911_v25 = vrot.slane %v1903_v59, 4  ;;  %v1912_v27 = vrot.slane %v1903_v59, 5  ;;  %v1913_v32 = vrot.slane %v1903_v59, 6 }
 0x988   : > { %1988 = vrot.lane.b32.xlu0 %v1979_v8, %s4613_s10  ;;  %v1982_v51 = vrot.slane %v1979_v8, 2  ;;  %v1981_v11 = vrot.slane %v1979_v8, 1  ;;  %v1983_v23 = vrot.slane %v1979_v8, 3  ;;  %v1984_v22 = vrot.slane %v1979_v8, 4 }
 0x989   : > { %v1985_v46 = vrot.slane %v1979_v8, 5  ;;  %v1986_v17 = vrot.slane %v1979_v8, 6  ;;  %v1987_v44 = vrot.slane %v1979_v8, 7  ;;  %v1925_v54 = vadd.f32 %v1909_v19, %v5384_v7  ;;  %v5402_v8 = vld [vmem:[#allocation2 + $0x3b] sm:$0x1] }
 0x98a   : > { %1992 = vrot.lane.b32.xlu1 %v1982_v51, %s4613_s10  ;;  %v1924_v9 = vadd.f32 %v1908_v62, %v5387_v21  ;;  %v3789_v29 = vmul.f32 -1.442695, %v1923_v35  ;;  %v1926_v26 = vadd.f32 %v1910_v31, %v5390_v30  ;;  %v1927_v37 = vadd.f32 %v1911_v25, %v5393_v61 }
 0x98b   : > { %v3791_v2 = vmul.f32 -1.442695, %v1925_v54  ;;  %v1914_v42 = vrot.slane %v1903_v59, 7  ;;  %v1928_v45 = vadd.f32 %v1912_v27, %v5396_v34  ;;  %v1929_v58 = vadd.f32 %v1913_v32, %v5399_v43 }
 0x98c   : > { %1990 = vrot.lane.b32.xlu0 %v1981_v11, %s4613_s10  ;;  %4271 = vpow2.f32 %v3789_v29  ;;  %v3790_v28 = vmul.f32 -1.442695, %v1924_v9  ;;  %v3792_v52 = vmul.f32 -1.442695, %v1926_v26  ;;  %v3793_v4 = vmul.f32 -1.442695, %v1927_v37 }
 0x98d   : > { %4273 = vpow2.f32 %v3791_v2  ;;  %v1930_v51 = vadd.f32 %v1914_v42, %v5402_v8  ;;  %v3794_v11 = vmul.f32 -1.442695, %v1928_v45 }
 0x98e   : > { %1994 = vrot.lane.b32.xlu1 %v1983_v23, %s4613_s10  ;;  %4275 = vpow2.f32 %v3790_v28  ;;  %v3795_v23 = vmul.f32 -1.442695, %v1929_v58 }
 0x98f   : > { %4277 = vpow2.f32 %v3792_v52  ;;  %v3796_v59 = vmul.f32 -1.442695, %v1930_v51 }
 0x990   : > { %1996 = vrot.lane.b32.xlu0 %v1984_v22, %s4613_s10  ;;  %4279 = vpow2.f32 %v3793_v4 }
 0x991   : > { %4281 = vpow2.f32 %v3794_v11 }
 0x992   : > { %1998 = vrot.lane.b32.xlu1 %v1985_v46, %s4613_s10  ;;  %4283 = vpow2.f32 %v3795_v23 }
 0x993   : > { %4285 = vpow2.f32 %v3796_v59 }
 0x994   : > { %2000 = vrot.lane.b32.xlu0 %v1986_v17, %s4613_s10 }
 0x996   : > { %2002 = vrot.lane.b32.xlu1 %v1987_v44, %s4613_s10  ;;  %v4272_v22 = vpop.eup %4271 }
 0x997   : > { %v4274_v46 = vpop.eup %4273  ;;  %v1955_v17 = vadd.f32 1.0, %v4272_v22 }
 0x998   : > { %v4276_v44 = vpop.eup %4275  ;;  %v1957_v19 = vadd.f32 1.0, %v4274_v46 }
 0x999   : > { %v4278_v62 = vpop.eup %4277  ;;  %4287 = vrcp.f32 %v1955_v17  ;;  %v1956_v35 = vadd.f32 1.0, %v4276_v44 }
 0x99a   : > { %v4280_v31 = vpop.eup %4279  ;;  %4289 = vrcp.f32 %v1957_v19  ;;  %v1958_v54 = vadd.f32 1.0, %v4278_v62 }
 0x99b   : > { %v4282_v25 = vpop.eup %4281  ;;  %4291 = vrcp.f32 %v1956_v35  ;;  %v1959_v9 = vadd.f32 1.0, %v4280_v31 }
 0x99c   : > { %v4284_v29 = vpop.eup %4283  ;;  %4293 = vrcp.f32 %v1958_v54  ;;  %v1960_v27 = vadd.f32 1.0, %v4282_v25 }
 0x99d   : > { %v4286_v26 = vpop.eup %4285  ;;  %4295 = vrcp.f32 %v1959_v9  ;;  %v1961_v2 = vadd.f32 1.0, %v4284_v29 }
 0x99e   : > { %4297 = vrcp.f32 %v1960_v27  ;;  %v1962_v28 = vadd.f32 1.0, %v4286_v26 }
 0x99f   : > { %4299 = vrcp.f32 %v1961_v2 }
 0x9a0   : > { %4301 = vrcp.f32 %v1962_v28 }
 0x9a3   : > { %v5405_v32 = vpop.eup %4287 }
 0x9a4   : > { %v5408_v45 = vpop.eup %4289 }
 0x9a5   : > { %v5412_v4 = vpop.eup %4291 }
 0x9a6   : > { %v5416_v23 = vpop.eup %4293 }
 0x9a7   : > { %v5420_v46 = vpop.eup %4295 }
 0x9a8   : > { %v5424_v19 = vpop.eup %4297 }
 0x9a9   : > { %v5428_v31 = vpop.eup %4299 }
 0x9aa   : > { %v5432_v9 = vpop.eup %4301 }
 0x9fa   : > { %v1989_v37 = vpop.permute.xlu0 %1988 }
 0x9fb   : > { %v2012_v42 = vmul.f32 %v5405_v32, %v1989_v37 }
 0x9fc   : > { %v1993_v52 = vpop.permute.xlu1 %1992 }
 0x9fd   : > { %v2014_v58 = vmul.f32 %v5408_v45, %v1993_v52  ;;  %2028 = vrot.lane.b32.xlu0 %v2012_v42, %s4613_s10 }
 0x9fe   : > { %v1991_v51 = vpop.permute.xlu0 %1990 }
 0x9ff   : > { %v2013_v11 = vmul.f32 %v5412_v4, %v1991_v51  ;;  %2032 = vrot.lane.b32.xlu1 %v2014_v58, %s4613_s10 }
 0xa00   : > { %v1995_v22 = vpop.permute.xlu1 %1994 }
 0xa01   : > { %v2015_v59 = vmul.f32 %v5416_v23, %v1995_v22  ;;  %2030 = vrot.lane.b32.xlu0 %v2013_v11, %s4613_s10 }
 0xa02   : > { %v1997_v17 = vpop.permute.xlu0 %1996 }
 0xa03   : > { %v2016_v44 = vmul.f32 %v5420_v46, %v1997_v17  ;;  %2034 = vrot.lane.b32.xlu1 %v2015_v59, %s4613_s10 }
 0xa04   : > { %v1999_v62 = vpop.permute.xlu1 %1998 }
 0xa05   : > { %v2017_v35 = vmul.f32 %v5424_v19, %v1999_v62  ;;  %2036 = vrot.lane.b32.xlu0 %v2016_v44, %s4613_s10 }
 0xa06   : > { %v2001_v54 = vpop.permute.xlu0 %2000 }
 0xa07   : > { %v2018_v25 = vmul.f32 %v5428_v31, %v2001_v54  ;;  %2038 = vrot.lane.b32.xlu1 %v2017_v35, %s4613_s10 }
 0xa08   : > { %v2003_v29 = vpop.permute.xlu1 %2002 }
 0xa09   : > { %v2019_v27 = vmul.f32 %v5432_v9, %v2003_v29  ;;  %2040 = vrot.lane.b32.xlu0 %v2018_v25, %s4613_s10  ;;  %v2070_v29 = vsub.f32 1.0, %v5408_v45 }
 0xa0b   : > { %2042 = vrot.lane.b32.xlu1 %v2019_v27, %s4613_s10 }
 0xa6f   : > { %v2029_v26 = vpop.permute.xlu0 %2028 }
 0xa70   : > { %v2052_v2 = vadd.f32 %v2029_v26, %v5381_v56  ;;  %v2068_v26 = vsub.f32 1.0, %v5405_v32 }
 0xa71   : > { %v2033_v37 = vpop.permute.xlu1 %2032 }
 0xa72   : > { %4303 = vtanh.f32 %v2052_v2  ;;  %v2054_v28 = vadd.f32 %v2033_v37, %v5384_v7  ;;  %v2069_v37 = vsub.f32 1.0, %v5412_v4 }
 0xa73   : > { %v2031_v42 = vpop.permute.xlu0 %2030 }
 0xa74   : > { %4305 = vtanh.f32 %v2054_v28  ;;  %v2053_v52 = vadd.f32 %v2031_v42, %v5387_v21  ;;  %v2118_v28 = vmul.f32 %v5408_v45, %v5319_v3 }
 0xa75   : > { %v2035_v58 = vpop.permute.xlu1 %2034 }
 0xa76   : > { %4307 = vtanh.f32 %v2053_v52  ;;  %v2055_v51 = vadd.f32 %v2035_v58, %v5390_v30  ;;  %v2117_v58 = vmul.f32 %v5412_v4, %v5321_v57  ;;  %v2120_v4 = vmul.f32 %v5420_v46, %v5341_v40 }
 0xa77   : > { %v2037_v11 = vpop.permute.xlu0 %2036 }
 0xa78   : > { %4309 = vtanh.f32 %v2055_v51  ;;  %v2056_v22 = vadd.f32 %v2037_v11, %v5393_v61  ;;  %v2071_v11 = vsub.f32 1.0, %v5416_v23 }
 0xa79   : > { %v2039_v59 = vpop.permute.xlu1 %2038 }
 0xa7a   : > { %4311 = vtanh.f32 %v2056_v22  ;;  %v2057_v56 = vadd.f32 %v2039_v59, %v5396_v34  ;;  %v2116_v22 = vmul.f32 %v5405_v32, %v5329_v53 }
 0xa7b   : > { %v2041_v17 = vpop.permute.xlu0 %2040 }
 0xa7c   : > { %v4304_v44 = vpop.eup %4303  ;;  %4313 = vtanh.f32 %v2057_v56  ;;  %v2058_v7 = vadd.f32 %v2041_v17, %v5399_v43 }
 0xa7d   : > { %v2043_v62 = vpop.permute.xlu1 %2042  ;;  %2084 = vrot.lane.b32.xlu0 %v4304_v44, %s4615_s28  ;;  %v2119_v44 = vmul.f32 %v5416_v23, %v5332_v36  ;;  %v2121_v23 = vmul.f32 %v5424_v19, %v5348_v49 }
 0xa7e   : > { %v4306_v21 = vpop.eup %4305  ;;  %4315 = vtanh.f32 %v2058_v7  ;;  %v2059_v30 = vadd.f32 %v2043_v62, %v5402_v8  ;;  %v2072_v7 = vsub.f32 1.0, %v5420_v46 }
 0xa7f   : > { %2088 = vrot.lane.b32.xlu1 %v4306_v21, %s4615_s28  ;;  %v2073_v21 = vsub.f32 1.0, %v5424_v19 }
 0xa80   : > { %v4308_v35 = vpop.eup %4307  ;;  %4317 = vtanh.f32 %v2059_v30 }
 0xa81   : > { %2086 = vrot.lane.b32.xlu0 %v4308_v35, %s4615_s28 }
 0xa82   : > { %v4310_v61 = vpop.eup %4309 }
 0xa83   : > { %2090 = vrot.lane.b32.xlu1 %v4310_v61, %s4615_s28 }
 0xa84   : > { %v4312_v34 = vpop.eup %4311 }
 0xa85   : > { %2092 = vrot.lane.b32.xlu0 %v4312_v34, %s4615_s28 }
 0xa86   : > { %v4314_v43 = vpop.eup %4313 }
 0xa87   : > { %2094 = vrot.lane.b32.xlu1 %v4314_v43, %s4615_s28 }
 0xa88   : > { %v4316_v54 = vpop.eup %4315 }
 0xa89   : > { %2096 = vrot.lane.b32.xlu0 %v4316_v54, %s4615_s28  ;;  %v2074_v54 = vsub.f32 1.0, %v5428_v31 }
 0xa8a   : > { %v4318_v25 = vpop.eup %4317 }
 0xa8b   : > { %2098 = vrot.lane.b32.xlu1 %v4318_v25, %s4615_s28 }
 0xaef   : > { %v2085_v8 = vpop.permute.xlu0 %2084 }
 0xaf0   : > { %v2108_v52 = vmul.f32 %v2085_v8, %v2068_v26 }
 0xaf1   : > { %v2089_v27 = vpop.permute.xlu1 %2088 }
 0xaf2   : > { %v2110_v2 = vmul.f32 %v2089_v27, %v2070_v29  ;;  %v5473_v30 = vadd.f32 %v2116_v22, %v2108_v52  ;;  %v2122_v27 = vmul.f32 %v5428_v31, %v5354_v15 }
 0xaf3   : > { %v2087_v42 = vpop.permute.xlu0 %2086 }
 0xaf4   : > { %v2109_v51 = vmul.f32 %v2087_v42, %v2069_v37  ;;  %v5463_v59 = vadd.f32 %v2118_v28, %v2110_v2  ;;  %v2075_v2 = vsub.f32 1.0, %v5432_v9 }
 0xaf5   : > { %v2091_v56 = vpop.permute.xlu1 %2090 }
 0xaf6   : > { %v5465_v17 = vadd.f32 %v2117_v58, %v2109_v51  ;;  %v2111_v45 = vmul.f32 %v2091_v56, %v2071_v11  ;;  %v2189_v34 = vrot.slane %v5463_v59, 6  ;;  %v2123_v58 = vmul.f32 %v5432_v9, %v5358_v24 }
 0xaf7   : > { %v2093_v62 = vpop.permute.xlu0 %2092 }
 0xaf8   : > { %v2187_v32 = vrot.slane %v5465_v17, 7  ;;  %v5476_v35 = vadd.f32 %v2119_v44, %v2111_v45  ;;  %v2112_v61 = vmul.f32 %v2093_v62, %v2072_v7 }
 0xaf9   : > { %v2095_v43 = vpop.permute.xlu1 %2094 }
 0xafa   : > { %6412 = vst [vmem:[#allocation10_spill] sm:$0xff] %v5476_v35  ;;  %v2188_v46 = vsel %vm558_vm2, %v2187_v32, %v5473_v30  ;;  %v2191_v25 = vrot.slane %v5476_v35, 5  ;;  %v5485_v8 = vadd.f32 %v2120_v4, %v2112_v61  ;;  %v2113_v29 = vmul.f32 %v2095_v43, %v2073_v21 }
 0xafb   : > { %v2097_v26 = vpop.permute.xlu0 %2096  ;;  %v2190_v37 = vsel %vm561_vm3, %v2189_v34, %v2188_v46 }
 0xafc   : > { %6413 = vst [vmem:[#allocation11_spill] sm:$0xff] %v5485_v8  ;;  %v2193_v19 = vrot.slane %v5485_v8, 4  ;;  %v5492_v28 = vadd.f32 %v2121_v23, %v2113_v29  ;;  %v2114_v42 = vmul.f32 %v2097_v26, %v2074_v54  ;;  %v2192_v52 = vsel %vm564_vm4, %v2191_v25, %v2190_v37 }
 0xafd   : > { %v2099_v51 = vpop.permute.xlu1 %2098 }
 0xafe   : > { %6414 = vst [vmem:[#allocation12_spill] sm:$0xff] %v5492_v28  ;;  %v2195_v11 = vrot.slane %v5492_v28, 3  ;;  %v5498_v22 = vadd.f32 %v2122_v27, %v2114_v42  ;;  %v2115_v31 = vmul.f32 %v2099_v51, %v2075_v2  ;;  %v2194_v56 = vsel %vm567_vm5, %v2193_v19, %v2192_v52  ;;  %v5524_v2 = vld [vmem:[#allocation2 + $0x4] sm:$0x1]  ;;  %v5527_v42 = vld [vmem:[#allocation2 + $0x14] sm:$0x1] }
 0xaff   : > { %v5530_v51 = vld [vmem:[#allocation2 + $0xc] sm:$0x1] }
 0xb00   : > { %6415 = vst [vmem:[#allocation13_spill] sm:$0xff] %v5498_v22  ;;  %v2197_v44 = vrot.slane %v5498_v22, 2  ;;  %v5502_v45 = vadd.f32 %v2123_v58, %v2115_v31  ;;  %v2196_v7 = vsel %vm570_vm6, %v2195_v11, %v2194_v56 }
 0xb02   : > { %6416 = vst [vmem:[#allocation14_spill] sm:$0xff] %v5502_v45  ;;  %v2198_v4 = vsel %vm573_vm7, %v2197_v44, %v2196_v7  ;;  %v2199_v62 = vrot.slane %v5502_v45, 1  ;;  %v5533_v44 = vld [vmem:[#allocation2 + $0x1c] sm:$0x1] }
 0xb04   : > { %v2200_v9 = vsel %vm576_vm8, %v2199_v62, %v2198_v4 }
 0xb05   : > { %2201 = vrot.lane.b32.xlu0 %v2200_v9, %s4615_s28  ;;  %v5536_v9 = vld [vmem:[#allocation2 + $0x24] sm:$0x1] }
 0xb77   : > { %v2202_v21 = vpop.permute.xlu0 %2201 }
 0xb78   : > { %3978 = vmatmul.mubr.msk.f32.vlgmr.msra.gmra.mrb[6].mxu1 %vm390_vm1, %v2202_v21 }
 0xb79   : > { %4065 = vmatpush3.bf16.msra.mxu1 %v4845_v38  ;;  %3999 = vmatprep.mubr.msk.f32.mxu1 %vm4611_vm0, %v4612_v1 }
 0xb7a   : > { %4066 = vmatprep.subr.bf16.mxu1 %v4610_v0 }
 0xb7d   : > { %4068 = vmatpush3.bf16.msra.mxu1 %v4869_v47 }
 0xc4b   : > { %v2271_v32 = vpop.f32.mrb[6].mxu1 }
 0xc4c   : > { %v3979_v61 = vpop.f32.mrb[7].mxu1  ;;  %v2347_v34 = vadd.f32 %v2271_v32, %v4907_v5  ;;  %v2277_v26 = vrot.slane %v2271_v32, 2  ;;  %v2276_v37 = vrot.slane %v2271_v32, 1  ;;  %v2291_v19 = vadd.f32 %v2271_v32, %v5524_v2 }
 0xc4d   : > { %v2278_v52 = vrot.slane %v2271_v32, 3  ;;  %v2279_v11 = vrot.slane %v2271_v32, 4  ;;  %v2280_v7 = vrot.slane %v2271_v32, 5  ;;  %v2281_v21 = vrot.slane %v2271_v32, 6 }
 0xc4e   : > { %2356 = vrot.lane.b32.xlu1 %v2347_v34, %s4613_s10  ;;  %v2350_v23 = vrot.slane %v2347_v34, 2  ;;  %v2349_v43 = vrot.slane %v2347_v34, 1  ;;  %v2351_v54 = vrot.slane %v2347_v34, 3  ;;  %v2352_v46 = vrot.slane %v2347_v34, 4 }
 0xc4f   : > { %v2353_v25 = vrot.slane %v2347_v34, 5  ;;  %v2354_v29 = vrot.slane %v2347_v34, 6  ;;  %v2355_v27 = vrot.slane %v2347_v34, 7  ;;  %v2293_v58 = vadd.f32 %v2277_v26, %v5527_v42  ;;  %v5545_v26 = vld [vmem:[#allocation2 + $0x3c] sm:$0x1] }
 0xc50   : > { %2360 = vrot.lane.b32.xlu0 %v2350_v23, %s4613_s10  ;;  %v2292_v31 = vadd.f32 %v2276_v37, %v5530_v51  ;;  %v3798_v56 = vmul.f32 -1.442695, %v2291_v19  ;;  %v2294_v4 = vadd.f32 %v2278_v52, %v5533_v44  ;;  %v2295_v61 = vadd.f32 %v2279_v11, %v5536_v9  ;;  %v5539_v23 = vld [vmem:[#allocation2 + $0x2c] sm:$0x1] }
 0xc51   : > { %v3800_v62 = vmul.f32 -1.442695, %v2293_v58 }
 0xc52   : > { %2358 = vrot.lane.b32.xlu1 %v2349_v43, %s4613_s10  ;;  %4319 = vpow2.f32 %v3798_v56  ;;  %v3799_v34 = vmul.f32 -1.442695, %v2292_v31  ;;  %v2282_v43 = vrot.slane %v2271_v32, 7 }
 0xc53   : > { %4321 = vpow2.f32 %v3800_v62 }
 0xc54   : > { %2362 = vrot.lane.b32.xlu0 %v2351_v54, %s4613_s10  ;;  %v2296_v54 = vadd.f32 %v2280_v7, %v5539_v23  ;;  %4323 = vpow2.f32 %v3799_v34  ;;  %v2298_v37 = vadd.f32 %v2282_v43, %v5545_v26 }
 0xc56   : > { %2364 = vrot.lane.b32.xlu1 %v2352_v46, %s4613_s10  ;;  %v3801_v46 = vmul.f32 -1.442695, %v2294_v4  ;;  %v3803_v19 = vmul.f32 -1.442695, %v2296_v54  ;;  %v3805_v32 = vmul.f32 -1.442695, %v2298_v37 }
 0xc58   : > { %2366 = vrot.lane.b32.xlu0 %v2353_v25, %s4613_s10  ;;  %v5542_v25 = vld [vmem:[#allocation2 + $0x34] sm:$0x1]  ;;  %4325 = vpow2.f32 %v3801_v46 }
 0xc5a   : > { %2368 = vrot.lane.b32.xlu1 %v2354_v29, %s4613_s10  ;;  %v2297_v29 = vadd.f32 %v2281_v21, %v5542_v25 }
 0xc5c   : > { %2370 = vrot.lane.b32.xlu0 %v2355_v27, %s4613_s10  ;;  %v3802_v27 = vmul.f32 -1.442695, %v2295_v61  ;;  %v3804_v52 = vmul.f32 -1.442695, %v2297_v29  ;;  %v4320_v58 = vpop.eup %4319 }
 0xc5d   : > { %v4322_v11 = vpop.eup %4321  ;;  %v2323_v31 = vadd.f32 1.0, %v4320_v58 }
 0xc5e   : > { %4327 = vpow2.f32 %v3802_v27  ;;  %v4324_v56 = vpop.eup %4323  ;;  %v2325_v7 = vadd.f32 1.0, %v4322_v11 }
 0xc5f   : > { %4329 = vpow2.f32 %v3803_v19  ;;  %v2324_v62 = vadd.f32 1.0, %v4324_v56 }
 0xc60   : > { %4331 = vpow2.f32 %v3804_v52 }
 0xc61   : > { %4333 = vpow2.f32 %v3805_v32 }
 0xc62   : > { %v4326_v4 = vpop.eup %4325  ;;  %4335 = vrcp.f32 %v2323_v31 }
 0xc63   : > { %4337 = vrcp.f32 %v2325_v7  ;;  %v2326_v61 = vadd.f32 1.0, %v4326_v4 }
 0xc64   : > { %4339 = vrcp.f32 %v2324_v62 }
 0xc65   : > { %4341 = vrcp.f32 %v2326_v61 }
 0xc68   : > { %v4328_v21 = vpop.eup %4327 }
 0xc69   : > { %v4330_v34 = vpop.eup %4329  ;;  %v2327_v43 = vadd.f32 1.0, %v4328_v21 }
 0xc6a   : > { %v4332_v54 = vpop.eup %4331  ;;  %v2328_v46 = vadd.f32 1.0, %v4330_v34 }
 0xc6b   : > { %v4334_v29 = vpop.eup %4333  ;;  %4343 = vrcp.f32 %v2327_v43  ;;  %v2329_v27 = vadd.f32 1.0, %v4332_v54 }
 0xc6c   : > { %v5548_v37 = vpop.eup %4335  ;;  %4345 = vrcp.f32 %v2328_v46  ;;  %v2330_v52 = vadd.f32 1.0, %v4334_v29 }
 0xc6d   : > { %v5551_v32 = vpop.eup %4337  ;;  %4347 = vrcp.f32 %v2329_v27 }
 0xc6e   : > { %v5555_v56 = vpop.eup %4339  ;;  %4349 = vrcp.f32 %v2330_v52 }
 0xc6f   : > { %v5559_v62 = vpop.eup %4341 }
 0xc75   : > { %v5563_v34 = vpop.eup %4343 }
 0xc76   : > { %v5567_v46 = vpop.eup %4345 }
 0xcc0   : > { %v2357_v19 = vpop.permute.xlu1 %2356 }
 0xcc1   : > { %v2380_v58 = vmul.f32 %v5548_v37, %v2357_v19  ;;  %v5571_v19 = vpop.eup %4347 }
 0xcc2   : > { %v2361_v11 = vpop.permute.xlu0 %2360 }
 0xcc3   : > { %v2382_v31 = vmul.f32 %v5551_v32, %v2361_v11  ;;  %2396 = vrot.lane.b32.xlu1 %v2380_v58, %s4613_s10  ;;  %v5575_v11 = vpop.eup %4349 }
 0xcc4   : > { %v2359_v7 = vpop.permute.xlu1 %2358 }
 0xcc5   : > { %v2381_v4 = vmul.f32 %v5555_v56, %v2359_v7  ;;  %2400 = vrot.lane.b32.xlu0 %v2382_v31, %s4613_s10 }
 0xcc6   : > { %v2363_v21 = vpop.permute.xlu0 %2362 }
 0xcc7   : > { %v2383_v61 = vmul.f32 %v5559_v62, %v2363_v21  ;;  %2398 = vrot.lane.b32.xlu1 %v2381_v4, %s4613_s10 }
 0xcc8   : > { %v2365_v43 = vpop.permute.xlu1 %2364 }
 0xcc9   : > { %v2384_v54 = vmul.f32 %v5563_v34, %v2365_v43  ;;  %2402 = vrot.lane.b32.xlu0 %v2383_v61, %s4613_s10 }
 0xcca   : > { %v2367_v29 = vpop.permute.xlu0 %2366 }
 0xccb   : > { %v2385_v27 = vmul.f32 %v5567_v46, %v2367_v29  ;;  %2404 = vrot.lane.b32.xlu1 %v2384_v54, %s4613_s10 }
 0xccc   : > { %v2369_v52 = vpop.permute.xlu1 %2368 }
 0xccd   : > { %v2386_v58 = vmul.f32 %v5571_v19, %v2369_v52  ;;  %2406 = vrot.lane.b32.xlu0 %v2385_v27, %s4613_s10 }
 0xcce   : > { %v2371_v31 = vpop.permute.xlu0 %2370 }
 0xccf   : > { %v2387_v7 = vmul.f32 %v5575_v11, %v2371_v31  ;;  %2408 = vrot.lane.b32.xlu1 %v2386_v58, %s4613_s10 }
 0xcd1   : > { %2410 = vrot.lane.b32.xlu0 %v2387_v7, %s4613_s10 }
 0xd35   : > { %v2397_v4 = vpop.permute.xlu1 %2396 }
 0xd36   : > { %v2420_v21 = vadd.f32 %v2397_v4, %v5524_v2 }
 0xd37   : > { %v2401_v61 = vpop.permute.xlu0 %2400 }
 0xd38   : > { %4351 = vtanh.f32 %v2420_v21  ;;  %v2422_v43 = vadd.f32 %v2401_v61, %v5527_v42 }
 0xd39   : > { %v2399_v54 = vpop.permute.xlu1 %2398 }
 0xd3a   : > { %4353 = vtanh.f32 %v2422_v43  ;;  %v2421_v29 = vadd.f32 %v2399_v54, %v5530_v51 }
 0xd3b   : > { %v2403_v27 = vpop.permute.xlu0 %2402 }
 0xd3c   : > { %4355 = vtanh.f32 %v2421_v29  ;;  %v2423_v52 = vadd.f32 %v2403_v27, %v5533_v44  ;;  %v2438_v27 = vsub.f32 1.0, %v5551_v32 }
 0xd3d   : > { %v2405_v31 = vpop.permute.xlu1 %2404 }
 0xd3e   : > { %4357 = vtanh.f32 %v2423_v52  ;;  %v2424_v58 = vadd.f32 %v2405_v31, %v5536_v9  ;;  %v2436_v31 = vsub.f32 1.0, %v5548_v37 }
 0xd3f   : > { %v2407_v7 = vpop.permute.xlu0 %2406 }
 0xd40   : > { %4359 = vtanh.f32 %v2424_v58  ;;  %v2425_v2 = vadd.f32 %v2407_v7, %v5539_v23  ;;  %v2437_v7 = vsub.f32 1.0, %v5555_v56 }
 0xd41   : > { %v2409_v4 = vpop.permute.xlu1 %2408 }
 0xd42   : > { %v4352_v21 = vpop.eup %4351  ;;  %4361 = vtanh.f32 %v2425_v2  ;;  %v2426_v42 = vadd.f32 %v2409_v4, %v5542_v25  ;;  %v2486_v2 = vmul.f32 %v5551_v32, %v5463_v59 }
 0xd43   : > { %v2411_v61 = vpop.permute.xlu0 %2410  ;;  %2452 = vrot.lane.b32.xlu1 %v4352_v21, %s4615_s28 }
 0xd44   : > { %v4354_v51 = vpop.eup %4353  ;;  %4363 = vtanh.f32 %v2426_v42  ;;  %v2427_v44 = vadd.f32 %v2411_v61, %v5545_v26  ;;  %v2485_v42 = vmul.f32 %v5555_v56, %v5465_v17  ;;  %v2488_v56 = vmul.f32 %v5563_v34, %v5485_v8 }
 0xd45   : > { %2456 = vrot.lane.b32.xlu0 %v4354_v51, %s4615_s28  ;;  %v2439_v51 = vsub.f32 1.0, %v5559_v62 }
 0xd46   : > { %v4356_v43 = vpop.eup %4355  ;;  %4365 = vtanh.f32 %v2427_v44  ;;  %v2484_v44 = vmul.f32 %v5548_v37, %v5473_v30 }
 0xd47   : > { %2454 = vrot.lane.b32.xlu1 %v4356_v43, %s4615_s28 }
 0xd48   : > { %v4358_v9 = vpop.eup %4357 }
 0xd49   : > { %2458 = vrot.lane.b32.xlu0 %v4358_v9, %s4615_s28 }
 0xd4a   : > { %v4360_v23 = vpop.eup %4359 }
 0xd4b   : > { %2460 = vrot.lane.b32.xlu1 %v4360_v23, %s4615_s28 }
 0xd4c   : > { %v4362_v25 = vpop.eup %4361 }
 0xd4d   : > { %2462 = vrot.lane.b32.xlu0 %v4362_v25, %s4615_s28  ;;  %v2487_v25 = vmul.f32 %v5559_v62, %v5476_v35  ;;  %v2489_v62 = vmul.f32 %v5567_v46, %v5492_v28 }
 0xd4e   : > { %v4364_v54 = vpop.eup %4363 }
 0xd4f   : > { %2464 = vrot.lane.b32.xlu1 %v4364_v54, %s4615_s28  ;;  %v2440_v54 = vsub.f32 1.0, %v5563_v34 }
 0xd50   : > { %v4366_v29 = vpop.eup %4365 }
 0xd51   : > { %2466 = vrot.lane.b32.xlu0 %v4366_v29, %s4615_s28 }
 0xdb5   : > { %v2453_v26 = vpop.permute.xlu1 %2452 }
 0xdb6   : > { %v2476_v21 = vmul.f32 %v2453_v26, %v2436_v31  ;;  %v2441_v26 = vsub.f32 1.0, %v5567_v46 }
 0xdb7   : > { %v2457_v52 = vpop.permute.xlu0 %2456 }
 0xdb8   : > { %v2478_v58 = vmul.f32 %v2457_v52, %v2438_v27  ;;  %v5616_v27 = vadd.f32 %v2484_v44, %v2476_v21 }
 0xdb9   : > { %v2455_v4 = vpop.permute.xlu1 %2454 }
 0xdba   : > { %v2477_v61 = vmul.f32 %v2455_v4, %v2437_v7  ;;  %v5606_v43 = vadd.f32 %v2486_v2, %v2478_v58  ;;  %6418 = vst [vmem:[#allocation16_spill] sm:$0xff] %v5616_v27  ;;  %v2442_v2 = vsub.f32 1.0, %v5571_v19 }
 0xdbb   : > { %v2459_v9 = vpop.permute.xlu0 %2458 }
 0xdbc   : > { %6417 = vst [vmem:[#allocation15_spill] sm:$0xff] %v5606_v43  ;;  %v5608_v23 = vadd.f32 %v2485_v42, %v2477_v61  ;;  %v2479_v32 = vmul.f32 %v2459_v9, %v2439_v51  ;;  %v2557_v58 = vrot.slane %v5606_v43, 6  ;;  %v2490_v51 = vmul.f32 %v5571_v19, %v5498_v22 }
 0xdbd   : > { %v2461_v29 = vpop.permute.xlu1 %2460  ;;  %v2443_v9 = vsub.f32 1.0, %v5575_v11 }
 0xdbe   : > { %v2555_v37 = vrot.slane %v5608_v23, 7  ;;  %v5619_v52 = vadd.f32 %v2487_v25, %v2479_v32  ;;  %v2480_v31 = vmul.f32 %v2461_v29, %v2440_v54 }
 0xdbf   : > { %v2463_v7 = vpop.permute.xlu0 %2462 }
 0xdc0   : > { %6419 = vst [vmem:[#allocation17_spill] sm:$0xff] %v5619_v52  ;;  %v2556_v34 = vsel %vm558_vm2, %v2555_v37, %v5616_v27  ;;  %v2559_v4 = vrot.slane %v5619_v52, 5  ;;  %v5628_v21 = vadd.f32 %v2488_v56, %v2480_v31  ;;  %v2481_v42 = vmul.f32 %v2463_v7, %v2441_v26 }
 0xdc1   : > { %v2558_v61 = vsel %vm561_vm3, %v2557_v58, %v2556_v34  ;;  %v2465_v44 = vpop.permute.xlu1 %2464  ;;  %v2491_v56 = vmul.f32 %v5575_v11, %v5502_v45 }
 0xdc2   : > { %6420 = vst [vmem:[#allocation18_spill] sm:$0xff] %v5628_v21  ;;  %v2560_v46 = vsel %vm564_vm4, %v2559_v4, %v2558_v61  ;;  %v2561_v25 = vrot.slane %v5628_v21, 4  ;;  %v5636_v32 = vadd.f32 %v2489_v62, %v2481_v42  ;;  %v2482_v54 = vmul.f32 %v2465_v44, %v2442_v2 }
 0xdc3   : > { %v2467_v29 = vpop.permute.xlu0 %2466 }
 0xdc4   : > { %6421 = vst [vmem:[#allocation19_spill] sm:$0xff] %v5636_v32  ;;  %v2563_v26 = vrot.slane %v5636_v32, 3  ;;  %v5641_v37 = vadd.f32 %v2490_v51, %v2482_v54  ;;  %v2483_v31 = vmul.f32 %v2467_v29, %v2443_v9  ;;  %v2562_v19 = vsel %vm567_vm5, %v2561_v25, %v2560_v46  ;;  %v5667_v54 = vld [vmem:[#allocation2 + $0x5] sm:$0x1] }
 0xdc6   : > { %6422 = vst [vmem:[#allocation20_spill] sm:$0xff] %v5641_v37  ;;  %v2565_v58 = vrot.slane %v5641_v37, 2  ;;  %v5645_v7 = vadd.f32 %v2491_v56, %v2483_v31  ;;  %v2564_v34 = vsel %vm570_vm6, %v2563_v26, %v2562_v19  ;;  %v5670_v26 = vld [vmem:[#allocation2 + $0x15] sm:$0x1] }
 0xdc8   : > { %6423 = vst [vmem:[#allocation21_spill] sm:$0xff] %v5645_v7  ;;  %v2567_v62 = vrot.slane %v5645_v7, 1  ;;  %v2566_v2 = vsel %vm573_vm7, %v2565_v58, %v2564_v34  ;;  %v5673_v58 = vld [vmem:[#allocation2 + $0xd] sm:$0x1] }
 0xdca   : > { %v2568_v11 = vsel %vm576_vm8, %v2567_v62, %v2566_v2 }
 0xdcb   : > { %2569 = vrot.lane.b32.xlu1 %v2568_v11, %s4615_s28  ;;  %v5676_v11 = vld [vmem:[#allocation2 + $0x1d] sm:$0x1] }
 0xe3d   : > { %v2570_v4 = vpop.permute.xlu1 %2569 }
 0xe3e   : > { %3989 = vmatmul.mubr.msk.f32.vlgmr.msra.gmra.mrb[12].mxu0 %vm390_vm1, %v2570_v4 }
 0xe3f   : > { %4071 = vmatpush3.bf16.msra.mxu0 %v4845_v38  ;;  %4010 = vmatprep.mubr.msk.f32.mxu0 %vm4611_vm0, %v4612_v1  ;;  %vm3273_vm0 = vcmask 56368  }
 0xe40   : > { %4072 = vmatprep.subr.bf16.mxu0 %v4610_v0 }
 0xe43   : > { %4074 = vmatpush3.bf16.msra.mxu0 %v4869_v47 }
 0xf11   : > { %v2639_v42 = vpop.f32.mrb[12].mxu0 }
 0xf12   : > { %v3990_v61 = vpop.f32.mrb[13].mxu0  ;;  %v2715_v51 = vadd.f32 %v2639_v42, %v4907_v5  ;;  %v2645_v25 = vrot.slane %v2639_v42, 2  ;;  %v2644_v56 = vrot.slane %v2639_v42, 1  ;;  %v2659_v29 = vadd.f32 %v2639_v42, %v5667_v54 }
 0xf13   : > { %v2646_v31 = vrot.slane %v2639_v42, 3  ;;  %v2647_v34 = vrot.slane %v2639_v42, 4  ;;  %v2648_v4 = vrot.slane %v2639_v42, 5 }
 0xf14   : > { %2724 = vrot.lane.b32.xlu0 %v2715_v51, %s4613_s10  ;;  %v2718_v44 = vrot.slane %v2715_v51, 2  ;;  %v2717_v9 = vrot.slane %v2715_v51, 1  ;;  %v2719_v38 = vrot.slane %v2715_v51, 3  ;;  %v2720_v1 = vrot.slane %v2715_v51, 4 }
 0xf15   : > { %v2721_v0 = vrot.slane %v2715_v51, 5  ;;  %v2722_v47 = vrot.slane %v2715_v51, 6  ;;  %v2723_v46 = vrot.slane %v2715_v51, 7  ;;  %v2661_v19 = vadd.f32 %v2645_v25, %v5670_v26 }
 0xf16   : > { %2728 = vrot.lane.b32.xlu1 %v2718_v44, %s4613_s10  ;;  %v2660_v62 = vadd.f32 %v2644_v56, %v5673_v58  ;;  %v3807_v2 = vmul.f32 -1.442695, %v2659_v29  ;;  %v2662_v61 = vadd.f32 %v2646_v31, %v5676_v11  ;;  %v5679_v44 = vld [vmem:[#allocation2 + $0x25] sm:$0x1]  ;;  %v5685_v56 = vld [vmem:[#allocation2 + $0x35] sm:$0x1] }
 0xf17   : > { %v3809_v51 = vmul.f32 -1.442695, %v2661_v19  ;;  %v5688_v19 = vld [vmem:[#allocation2 + $0x3d] sm:$0x1] }
 0xf18   : > { %2726 = vrot.lane.b32.xlu0 %v2717_v9, %s4613_s10  ;;  %v2649_v9 = vrot.slane %v2639_v42, 6  ;;  %4367 = vpow2.f32 %v3807_v2  ;;  %v3810_v25 = vmul.f32 -1.442695, %v2662_v61 }
 0xf19   : > { %4369 = vpow2.f32 %v3809_v51 }
 0xf1a   : > { %2730 = vrot.lane.b32.xlu1 %v2719_v38, %s4613_s10  ;;  %v2663_v38 = vadd.f32 %v2647_v34, %v5679_v44  ;;  %v2665_v29 = vadd.f32 %v2649_v9, %v5685_v56 }
 0xf1c   : > { %2732 = vrot.lane.b32.xlu0 %v2720_v1, %s4613_s10  ;;  %v3808_v1 = vmul.f32 -1.442695, %v2660_v62  ;;  %v3811_v31 = vmul.f32 -1.442695, %v2663_v38  ;;  %v3813_v62 = vmul.f32 -1.442695, %v2665_v29 }
 0xf1e   : > { %2734 = vrot.lane.b32.xlu1 %v2721_v0, %s4613_s10  ;;  %v5682_v0 = vld [vmem:[#allocation2 + $0x2d] sm:$0x1]  ;;  %4371 = vpow2.f32 %v3808_v1 }
 0xf1f   : > { %4373 = vpow2.f32 %v3810_v25 }
 0xf20   : > { %2736 = vrot.lane.b32.xlu0 %v2722_v47, %s4613_s10  ;;  %v2650_v47 = vrot.slane %v2639_v42, 7  ;;  %4375 = vpow2.f32 %v3811_v31 }
 0xf22   : > { %2738 = vrot.lane.b32.xlu1 %v2723_v46, %s4613_s10  ;;  %v2664_v46 = vadd.f32 %v2648_v4, %v5682_v0  ;;  %v2666_v45 = vadd.f32 %v2650_v47, %v5688_v19  ;;  %v4368_v2 = vpop.eup %4367 }
 0xf23   : > { %v4370_v4 = vpop.eup %4369  ;;  %v2691_v61 = vadd.f32 1.0, %v4368_v2 }
 0xf24   : > { %v3812_v34 = vmul.f32 -1.442695, %v2664_v46  ;;  %v3814_v42 = vmul.f32 -1.442695, %v2666_v45  ;;  %v2693_v22 = vadd.f32 1.0, %v4370_v4 }
 0xf26   : > { %4377 = vpow2.f32 %v3812_v34 }
 0xf27   : > { %4379 = vpow2.f32 %v3813_v62 }
 0xf28   : > { %v4372_v51 = vpop.eup %4371  ;;  %4381 = vpow2.f32 %v3814_v42 }
 0xf29   : > { %v4374_v9 = vpop.eup %4373  ;;  %4383 = vrcp.f32 %v2691_v61  ;;  %v2692_v38 = vadd.f32 1.0, %v4372_v51 }
 0xf2a   : > { %v4376_v1 = vpop.eup %4375  ;;  %4385 = vrcp.f32 %v2693_v22  ;;  %v2694_v28 = vadd.f32 1.0, %v4374_v9 }
 0xf2b   : > { %4387 = vrcp.f32 %v2692_v38  ;;  %v2695_v46 = vadd.f32 1.0, %v4376_v1 }
 0xf2c   : > { %4389 = vrcp.f32 %v2694_v28 }
 0xf2d   : > { %4391 = vrcp.f32 %v2695_v46 }
 0xf30   : > { %v4378_v47 = vpop.eup %4377 }
 0xf31   : > { %v4380_v25 = vpop.eup %4379  ;;  %v2696_v29 = vadd.f32 1.0, %v4378_v47 }
 0xf32   : > { %v4382_v31 = vpop.eup %4381  ;;  %v2697_v45 = vadd.f32 1.0, %v4380_v25 }
 0xf33   : > { %v5691_v34 = vpop.eup %4383  ;;  %4393 = vrcp.f32 %v2696_v29  ;;  %v2698_v2 = vadd.f32 1.0, %v4382_v31 }
 0xf34   : > { %v5694_v4 = vpop.eup %4385  ;;  %4395 = vrcp.f32 %v2697_v45 }
 0xf35   : > { %v5698_v28 = vpop.eup %4387  ;;  %4397 = vrcp.f32 %v2698_v2 }
 0xf36   : > { %v5702_v38 = vpop.eup %4389 }
 0xf37   : > { %v5706_v46 = vpop.eup %4391 }
 0xf3d   : > { %v5710_v31 = vpop.eup %4393 }
 0xf3e   : > { %v5714_v2 = vpop.eup %4395 }
 0xf86   : > { %v2725_v62 = vpop.permute.xlu0 %2724 }
 0xf87   : > { %v2748_v42 = vmul.f32 %v5691_v34, %v2725_v62 }
 0xf88   : > { %v2729_v22 = vpop.permute.xlu1 %2728 }
 0xf89   : > { %v2750_v61 = vmul.f32 %v5694_v4, %v2729_v22  ;;  %2764 = vrot.lane.b32.xlu0 %v2748_v42, %s4613_s10 }
 0xf8a   : > { %v2727_v51 = vpop.permute.xlu0 %2726 }
 0xf8b   : > { %v2749_v9 = vmul.f32 %v5698_v28, %v2727_v51  ;;  %2768 = vrot.lane.b32.xlu1 %v2750_v61, %s4613_s10  ;;  %v5718_v61 = vpop.eup %4397 }
 0xf8c   : > { %v2731_v1 = vpop.permute.xlu1 %2730 }
 0xf8d   : > { %v2751_v47 = vmul.f32 %v5702_v38, %v2731_v1  ;;  %2766 = vrot.lane.b32.xlu0 %v2749_v9, %s4613_s10 }
 0xf8e   : > { %v2733_v25 = vpop.permute.xlu0 %2732 }
 0xf8f   : > { %v2752_v29 = vmul.f32 %v5706_v46, %v2733_v25  ;;  %2770 = vrot.lane.b32.xlu1 %v2751_v47, %s4613_s10 }
 0xf90   : > { %v2735_v45 = vpop.permute.xlu1 %2734 }
 0xf91   : > { %v2753_v62 = vmul.f32 %v5710_v31, %v2735_v45  ;;  %2772 = vrot.lane.b32.xlu0 %v2752_v29, %s4613_s10 }
 0xf92   : > { %v2737_v42 = vpop.permute.xlu0 %2736 }
 0xf93   : > { %v2754_v22 = vmul.f32 %v5714_v2, %v2737_v42  ;;  %2774 = vrot.lane.b32.xlu1 %v2753_v62, %s4613_s10 }
 0xf94   : > { %v2739_v51 = vpop.permute.xlu1 %2738 }
 0xf95   : > { %v2755_v9 = vmul.f32 %v5718_v61, %v2739_v51  ;;  %2776 = vrot.lane.b32.xlu0 %v2754_v22, %s4613_s10 }
 0xf97   : > { %2778 = vrot.lane.b32.xlu1 %v2755_v9, %s4613_s10 }
 0xffb   : > { %v2765_v1 = vpop.permute.xlu0 %2764 }
 0xffc   : > { %v2788_v47 = vadd.f32 %v2765_v1, %v5667_v54 }
 0xffd   : > { %v2769_v25 = vpop.permute.xlu1 %2768 }
 0xffe   : > { %4399 = vtanh.f32 %v2788_v47  ;;  %v2790_v29 = vadd.f32 %v2769_v25, %v5670_v26 }
 0xfff   : > { %v2767_v45 = vpop.permute.xlu0 %2766 }
0x1000   : > { %4401 = vtanh.f32 %v2790_v29  ;;  %v2789_v62 = vadd.f32 %v2767_v45, %v5673_v58 }
0x1001   : > { %v2771_v42 = vpop.permute.xlu1 %2770 }
0x1002   : > { %4403 = vtanh.f32 %v2789_v62  ;;  %v2791_v8 = vadd.f32 %v2771_v42, %v5676_v11  ;;  %v2806_v62 = vsub.f32 1.0, %v5694_v4 }
0x1003   : > { %v2773_v51 = vpop.permute.xlu0 %2772 }
0x1004   : > { %4405 = vtanh.f32 %v2791_v8  ;;  %v2792_v22 = vadd.f32 %v2773_v51, %v5679_v44  ;;  %v2804_v51 = vsub.f32 1.0, %v5691_v34 }
0x1005   : > { %v2775_v9 = vpop.permute.xlu1 %2774 }
0x1006   : > { %4407 = vtanh.f32 %v2792_v22  ;;  %v2793_v54 = vadd.f32 %v2775_v9, %v5682_v0  ;;  %v2805_v9 = vsub.f32 1.0, %v5698_v28 }
0x1007   : > { %v2777_v1 = vpop.permute.xlu0 %2776 }
0x1008   : > { %v4400_v47 = vpop.eup %4399  ;;  %4409 = vtanh.f32 %v2793_v54  ;;  %v2794_v26 = vadd.f32 %v2777_v1, %v5685_v56  ;;  %v2854_v54 = vmul.f32 %v5694_v4, %v5606_v43 }
0x1009   : > { %v2779_v25 = vpop.permute.xlu1 %2778  ;;  %2820 = vrot.lane.b32.xlu0 %v4400_v47, %s4615_s28 }
0x100a   : > { %v4402_v58 = vpop.eup %4401  ;;  %4411 = vtanh.f32 %v2794_v26  ;;  %v2795_v11 = vadd.f32 %v2779_v25, %v5688_v19  ;;  %v2853_v26 = vmul.f32 %v5698_v28, %v5608_v23  ;;  %v2856_v28 = vmul.f32 %v5706_v46, %v5628_v21 }
0x100b   : > { %2824 = vrot.lane.b32.xlu1 %v4402_v58, %s4615_s28  ;;  %v2807_v58 = vsub.f32 1.0, %v5702_v38 }
0x100c   : > { %v4404_v8 = vpop.eup %4403  ;;  %4413 = vtanh.f32 %v2795_v11  ;;  %v2852_v11 = vmul.f32 %v5691_v34, %v5616_v27 }
0x100d   : > { %2822 = vrot.lane.b32.xlu0 %v4404_v8, %s4615_s28 }
0x100e   : > { %v4406_v44 = vpop.eup %4405 }
0x100f   : > { %2826 = vrot.lane.b32.xlu1 %v4406_v44, %s4615_s28 }
0x1010   : > { %v4408_v0 = vpop.eup %4407 }
0x1011   : > { %2828 = vrot.lane.b32.xlu0 %v4408_v0, %s4615_s28 }
0x1012   : > { %v4410_v56 = vpop.eup %4409 }
0x1013   : > { %2830 = vrot.lane.b32.xlu1 %v4410_v56, %s4615_s28  ;;  %v2855_v56 = vmul.f32 %v5702_v38, %v5619_v52  ;;  %v2857_v38 = vmul.f32 %v5710_v31, %v5636_v32 }
0x1014   : > { %v4412_v29 = vpop.eup %4411 }
0x1015   : > { %2832 = vrot.lane.b32.xlu0 %v4412_v29, %s4615_s28  ;;  %v2808_v29 = vsub.f32 1.0, %v5706_v46 }
0x1016   : > { %v4414_v45 = vpop.eup %4413 }
0x1017   : > { %2834 = vrot.lane.b32.xlu1 %v4414_v45, %s4615_s28 }
0x107b   : > { %v2821_v19 = vpop.permute.xlu0 %2820 }
0x107c   : > { %v2844_v47 = vmul.f32 %v2821_v19, %v2804_v51  ;;  %v2809_v19 = vsub.f32 1.0, %v5710_v31 }
0x107d   : > { %v2825_v42 = vpop.permute.xlu1 %2824 }
0x107e   : > { %v2846_v22 = vmul.f32 %v2825_v42, %v2806_v62  ;;  %v5759_v62 = vadd.f32 %v2852_v11, %v2844_v47 }
0x107f   : > { %v2823_v1 = vpop.permute.xlu0 %2822 }
0x1080   : > { %v2845_v25 = vmul.f32 %v2823_v1, %v2805_v9  ;;  %v5749_v8 = vadd.f32 %v2854_v54, %v2846_v22  ;;  %6426 = vst [vmem:[#allocation24_spill] sm:$0xff] %v5759_v62  ;;  %v2810_v54 = vsub.f32 1.0, %v5714_v2 }
0x1081   : > { %v2827_v44 = vpop.permute.xlu1 %2826 }
0x1082   : > { %6424 = vst [vmem:[#allocation22_spill] sm:$0xff] %v5749_v8  ;;  %v5751_v0 = vadd.f32 %v2853_v26, %v2845_v25  ;;  %v2847_v4 = vmul.f32 %v2827_v44, %v2807_v58  ;;  %v2925_v22 = vrot.slane %v5749_v8, 6  ;;  %v2858_v58 = vmul.f32 %v5714_v2, %v5641_v37 }
0x1083   : > { %v2829_v45 = vpop.permute.xlu0 %2828  ;;  %v2811_v44 = vsub.f32 1.0, %v5718_v61 }
0x1084   : > { %6425 = vst [vmem:[#allocation23_spill] sm:$0xff] %v5751_v0  ;;  %v2923_v34 = vrot.slane %v5751_v0, 7  ;;  %v5762_v42 = vadd.f32 %v2855_v56, %v2847_v4  ;;  %v2848_v51 = vmul.f32 %v2829_v45, %v2808_v29 }
0x1085   : > { %v2831_v9 = vpop.permute.xlu1 %2830 }
0x1086   : > { %6427 = vst [vmem:[#allocation25_spill] sm:$0xff] %v5762_v42  ;;  %v2924_v46 = vsel %vm558_vm2, %v2923_v34, %v5759_v62  ;;  %v2927_v1 = vrot.slane %v5762_v42, 5  ;;  %v5771_v47 = vadd.f32 %v2856_v28, %v2848_v51  ;;  %v2849_v26 = vmul.f32 %v2831_v9, %v2809_v19 }
0x1087   : > { %v2926_v25 = vsel %vm561_vm3, %v2925_v22, %v2924_v46  ;;  %v2833_v11 = vpop.permute.xlu0 %2832  ;;  %v2859_v28 = vmul.f32 %v5718_v61, %v5645_v7 }
0x1088   : > { %6428 = vst [vmem:[#allocation26_spill] sm:$0xff] %v5771_v47  ;;  %v2928_v31 = vsel %vm564_vm4, %v2927_v1, %v2926_v25  ;;  %v2929_v56 = vrot.slane %v5771_v47, 4  ;;  %v5779_v4 = vadd.f32 %v2857_v38, %v2849_v26  ;;  %v2850_v29 = vmul.f32 %v2833_v11, %v2810_v54 }
0x1089   : > { %v2835_v45 = vpop.permute.xlu1 %2834 }
0x108a   : > { %6429 = vst [vmem:[#allocation27_spill] sm:$0xff] %v5779_v4  ;;  %v2931_v19 = vrot.slane %v5779_v4, 3  ;;  %v5784_v34 = vadd.f32 %v2858_v58, %v2850_v29  ;;  %v2851_v51 = vmul.f32 %v2835_v45, %v2811_v44  ;;  %v2930_v2 = vsel %vm567_vm5, %v2929_v56, %v2928_v31 }
0x108c   : > { %6430 = vst [vmem:[#allocation28_spill] sm:$0xff] %v5784_v34  ;;  %v2933_v22 = vrot.slane %v5784_v34, 2  ;;  %v5788_v9 = vadd.f32 %v2859_v28, %v2851_v51  ;;  %v2932_v46 = vsel %vm570_vm6, %v2931_v19, %v2930_v2  ;;  %v5805_v51 = vld [vmem:[#allocation2 + $0x6] sm:$0x1] }
0x108e   : > { %6431 = vst [vmem:[#allocation29_spill] sm:$0xff] %v5788_v9  ;;  %v2935_v38 = vrot.slane %v5788_v9, 1  ;;  %v2934_v54 = vsel %vm573_vm7, %v2933_v22, %v2932_v46  ;;  %v5808_v46 = vld [vmem:[#allocation2 + $0x16] sm:$0x1] }
0x1090   : > { %v2936_v61 = vsel %vm576_vm8, %v2935_v38, %v2934_v54 }
0x1091   : > { %2937 = vrot.lane.b32.xlu0 %v2936_v61, %s4615_s28  ;;  %v5811_v61 = vld [vmem:[#allocation2 + $0xe] sm:$0x1] }
0x1103   : > { %v2938_v1 = vpop.permute.xlu0 %2937 }
0x1104   : > { %4000 = vmatmul.mubr.msk.f32.vlgmr.msra.gmra.mrb[8].mxu1 %vm390_vm1, %v2938_v1 }
0x11d7   : > { %v3007_v26 = vpop.f32.mrb[8].mxu1 }
0x11d8   : > { %v4001_v25 = vpop.f32.mrb[9].mxu1  ;;  %v3083_v58 = vadd.f32 %v3007_v26, %v4907_v5  ;;  %v3013_v19 = vrot.slane %v3007_v26, 2  ;;  %v3012_v2 = vrot.slane %v3007_v26, 1  ;;  %v3027_v22 = vadd.f32 %v3007_v26, %v5805_v51 }
0x11d9   : > { %v3014_v38 = vrot.slane %v3007_v26, 3  ;;  %v3015_v1 = vrot.slane %v3007_v26, 4  ;;  %v3018_v37 = vrot.slane %v3007_v26, 7 }
0x11da   : > { %3092 = vrot.lane.b32.xlu1 %v3083_v58, %s4613_s10  ;;  %v3086_v11 = vrot.slane %v3083_v58, 2  ;;  %v3085_v44 = vrot.slane %v3083_v58, 1  ;;  %v3087_v31 = vrot.slane %v3083_v58, 3  ;;  %v3088_v56 = vrot.slane %v3083_v58, 4 }
0x11db   : > { %v3089_v29 = vrot.slane %v3083_v58, 5  ;;  %v3090_v28 = vrot.slane %v3083_v58, 6  ;;  %v3091_v45 = vrot.slane %v3083_v58, 7  ;;  %v3029_v54 = vadd.f32 %v3013_v19, %v5808_v46  ;;  %v5814_v58 = vld [vmem:[#allocation2 + $0x1e] sm:$0x1] }
0x11dc   : > { %3096 = vrot.lane.b32.xlu0 %v3086_v11, %s4613_s10  ;;  %v3028_v25 = vadd.f32 %v3012_v2, %v5811_v61  ;;  %v3816_v11 = vmul.f32 -1.442695, %v3027_v22  ;;  %v5820_v19 = vld [vmem:[#allocation2 + $0x2e] sm:$0x1]  ;;  %v5823_v22 = vld [vmem:[#allocation2 + $0x36] sm:$0x1] }
0x11de   : > { %3094 = vrot.lane.b32.xlu1 %v3085_v44, %s4613_s10  ;;  %v3016_v44 = vrot.slane %v3007_v26, 5  ;;  %4415 = vpow2.f32 %v3816_v11  ;;  %v3817_v7 = vmul.f32 -1.442695, %v3028_v25 }
0x11e0   : > { %3098 = vrot.lane.b32.xlu0 %v3087_v31, %s4613_s10  ;;  %v3030_v31 = vadd.f32 %v3014_v38, %v5814_v58  ;;  %v3032_v32 = vadd.f32 %v3016_v44, %v5820_v19 }
0x11e2   : > { %3100 = vrot.lane.b32.xlu1 %v3088_v56, %s4613_s10  ;;  %v3818_v56 = vmul.f32 -1.442695, %v3029_v54  ;;  %v3819_v2 = vmul.f32 -1.442695, %v3030_v31  ;;  %v5826_v54 = vld [vmem:[#allocation2 + $0x3e] sm:$0x1] }
0x11e3   : > { %v3034_v52 = vadd.f32 %v3018_v37, %v5826_v54 }
0x11e4   : > { %3102 = vrot.lane.b32.xlu0 %v3089_v29, %s4613_s10  ;;  %v5817_v29 = vld [vmem:[#allocation2 + $0x26] sm:$0x1]  ;;  %4417 = vpow2.f32 %v3818_v56 }
0x11e5   : > { %4419 = vpow2.f32 %v3817_v7 }
0x11e6   : > { %3104 = vrot.lane.b32.xlu1 %v3090_v28, %s4613_s10  ;;  %v3017_v28 = vrot.slane %v3007_v26, 6  ;;  %4421 = vpow2.f32 %v3819_v2  ;;  %v3823_v26 = vmul.f32 -1.442695, %v3034_v52 }
0x11e8   : > { %3106 = vrot.lane.b32.xlu0 %v3091_v45, %s4613_s10  ;;  %v3031_v45 = vadd.f32 %v3015_v1, %v5817_v29  ;;  %v3033_v21 = vadd.f32 %v3017_v28, %v5823_v22  ;;  %v3821_v1 = vmul.f32 -1.442695, %v3032_v32  ;;  %v4416_v11 = vpop.eup %4415 }
0x11e9   : > { %v3059_v31 = vadd.f32 1.0, %v4416_v11 }
0x11ea   : > { %v3820_v38 = vmul.f32 -1.442695, %v3031_v45  ;;  %v3822_v25 = vmul.f32 -1.442695, %v3033_v21 }
0x11ec   : > { %4423 = vpow2.f32 %v3820_v38 }
0x11ed   : > { %4425 = vpow2.f32 %v3821_v1 }
0x11ee   : > { %v4418_v44 = vpop.eup %4417  ;;  %4427 = vpow2.f32 %v3822_v25 }
0x11ef   : > { %v4420_v56 = vpop.eup %4419  ;;  %4429 = vpow2.f32 %v3823_v26  ;;  %v3061_v27 = vadd.f32 1.0, %v4418_v44 }
0x11f0   : > { %v4422_v28 = vpop.eup %4421  ;;  %4431 = vrcp.f32 %v3059_v31  ;;  %v3060_v7 = vadd.f32 1.0, %v4420_v56 }
0x11f1   : > { %4433 = vrcp.f32 %v3061_v27  ;;  %v3062_v43 = vadd.f32 1.0, %v4422_v28 }
0x11f2   : > { %4435 = vrcp.f32 %v3060_v7 }
0x11f3   : > { %4437 = vrcp.f32 %v3062_v43 }
0x11f6   : > { %v4424_v45 = vpop.eup %4423 }
0x11f7   : > { %v4426_v37 = vpop.eup %4425  ;;  %v3063_v32 = vadd.f32 1.0, %v4424_v45 }
0x11f8   : > { %v4428_v2 = vpop.eup %4427  ;;  %v3064_v21 = vadd.f32 1.0, %v4426_v37 }
0x11f9   : > { %v4430_v38 = vpop.eup %4429  ;;  %4439 = vrcp.f32 %v3063_v32  ;;  %v3065_v52 = vadd.f32 1.0, %v4428_v2 }
0x11fa   : > { %v5829_v1 = vpop.eup %4431  ;;  %4441 = vrcp.f32 %v3064_v21  ;;  %v3066_v11 = vadd.f32 1.0, %v4430_v38 }
0x11fb   : > { %v5832_v44 = vpop.eup %4433  ;;  %4443 = vrcp.f32 %v3065_v52 }
0x11fc   : > { %v5836_v43 = vpop.eup %4435  ;;  %4445 = vrcp.f32 %v3066_v11 }
0x11fd   : > { %v5840_v7 = vpop.eup %4437 }
0x1203   : > { %v5844_v32 = vpop.eup %4439 }
0x1204   : > { %v5848_v38 = vpop.eup %4441 }
0x1205   : > { %v5852_v11 = vpop.eup %4443 }
0x124c   : > { %v3093_v25 = vpop.permute.xlu1 %3092 }
0x124d   : > { %v3116_v26 = vmul.f32 %v5829_v1, %v3093_v25 }
0x124e   : > { %v3097_v27 = vpop.permute.xlu0 %3096 }
0x124f   : > { %v3118_v31 = vmul.f32 %v5832_v44, %v3097_v27  ;;  %3132 = vrot.lane.b32.xlu1 %v3116_v26, %s4613_s10 }
0x1250   : > { %v3095_v56 = vpop.permute.xlu1 %3094 }
0x1251   : > { %v3117_v28 = vmul.f32 %v5836_v43, %v3095_v56  ;;  %3136 = vrot.lane.b32.xlu0 %v3118_v31, %s4613_s10  ;;  %v5856_v31 = vpop.eup %4445 }
0x1252   : > { %v3099_v45 = vpop.permute.xlu0 %3098 }
0x1253   : > { %v3119_v37 = vmul.f32 %v5840_v7, %v3099_v45  ;;  %3134 = vrot.lane.b32.xlu1 %v3117_v28, %s4613_s10 }
0x1254   : > { %v3101_v2 = vpop.permute.xlu1 %3100 }
0x1255   : > { %v3120_v21 = vmul.f32 %v5844_v32, %v3101_v2  ;;  %3138 = vrot.lane.b32.xlu0 %v3119_v37, %s4613_s10 }
0x1256   : > { %v3103_v52 = vpop.permute.xlu0 %3102 }
0x1257   : > { %v3121_v25 = vmul.f32 %v5848_v38, %v3103_v52  ;;  %3140 = vrot.lane.b32.xlu1 %v3120_v21, %s4613_s10 }
0x1258   : > { %v3105_v26 = vpop.permute.xlu1 %3104 }
0x1259   : > { %v3122_v27 = vmul.f32 %v5852_v11, %v3105_v26  ;;  %3142 = vrot.lane.b32.xlu0 %v3121_v25, %s4613_s10 }
0x125a   : > { %v3107_v56 = vpop.permute.xlu0 %3106 }
0x125b   : > { %v3123_v28 = vmul.f32 %v5856_v31, %v3107_v56  ;;  %3144 = vrot.lane.b32.xlu1 %v3122_v27, %s4613_s10 }
0x125d   : > { %3146 = vrot.lane.b32.xlu0 %v3123_v28, %s4613_s10 }
0x12c1   : > { %v3133_v45 = vpop.permute.xlu1 %3132 }
0x12c2   : > { %v3156_v37 = vadd.f32 %v3133_v45, %v5805_v51 }
0x12c3   : > { %v3137_v2 = vpop.permute.xlu0 %3136 }
0x12c4   : > { %4447 = vtanh.f32 %v3156_v37  ;;  %v3158_v21 = vadd.f32 %v3137_v2, %v5808_v46 }
0x12c5   : > { %v3135_v52 = vpop.permute.xlu1 %3134 }
0x12c6   : > { %4449 = vtanh.f32 %v3158_v21  ;;  %v3157_v25 = vadd.f32 %v3135_v52, %v5811_v61 }
0x12c7   : > { %v3139_v26 = vpop.permute.xlu0 %3138 }
0x12c8   : > { %4451 = vtanh.f32 %v3157_v25  ;;  %v3159_v35 = vadd.f32 %v3139_v26, %v5814_v58  ;;  %v3174_v25 = vsub.f32 1.0, %v5832_v44 }
0x12c9   : > { %v3141_v56 = vpop.permute.xlu1 %3140 }
0x12ca   : > { %4453 = vtanh.f32 %v3159_v35  ;;  %v3160_v27 = vadd.f32 %v3141_v56, %v5817_v29  ;;  %v3172_v56 = vsub.f32 1.0, %v5829_v1 }
0x12cb   : > { %v3143_v28 = vpop.permute.xlu0 %3142 }
0x12cc   : > { %4455 = vtanh.f32 %v3160_v27  ;;  %v3161_v51 = vadd.f32 %v3143_v28, %v5820_v19  ;;  %v3173_v28 = vsub.f32 1.0, %v5836_v43 }
0x12cd   : > { %v3145_v45 = vpop.permute.xlu1 %3144 }
0x12ce   : > { %v4448_v37 = vpop.eup %4447  ;;  %4457 = vtanh.f32 %v3161_v51  ;;  %v3162_v46 = vadd.f32 %v3145_v45, %v5823_v22  ;;  %v3222_v51 = vmul.f32 %v5832_v44, %v5749_v8 }
0x12cf   : > { %v3147_v2 = vpop.permute.xlu0 %3146  ;;  %3188 = vrot.lane.b32.xlu1 %v4448_v37, %s4615_s28 }
0x12d0   : > { %v4450_v61 = vpop.eup %4449  ;;  %4459 = vtanh.f32 %v3162_v46  ;;  %v3163_v58 = vadd.f32 %v3147_v2, %v5826_v54  ;;  %v3221_v46 = vmul.f32 %v5836_v43, %v5751_v0  ;;  %v3224_v43 = vmul.f32 %v5844_v32, %v5771_v47 }
0x12d1   : > { %3192 = vrot.lane.b32.xlu0 %v4450_v61, %s4615_s28  ;;  %v3175_v61 = vsub.f32 1.0, %v5840_v7 }
0x12d2   : > { %v4452_v35 = vpop.eup %4451  ;;  %4461 = vtanh.f32 %v3163_v58  ;;  %v3220_v58 = vmul.f32 %v5829_v1, %v5759_v62 }
0x12d3   : > { %3190 = vrot.lane.b32.xlu1 %v4452_v35, %s4615_s28 }
0x12d4   : > { %v4454_v29 = vpop.eup %4453 }
0x12d5   : > { %3194 = vrot.lane.b32.xlu0 %v4454_v29, %s4615_s28 }
0x12d6   : > { %v4456_v19 = vpop.eup %4455 }
0x12d7   : > { %3196 = vrot.lane.b32.xlu1 %v4456_v19, %s4615_s28 }
0x12d8   : > { %v4458_v22 = vpop.eup %4457 }
0x12d9   : > { %3198 = vrot.lane.b32.xlu0 %v4458_v22, %s4615_s28  ;;  %v3223_v22 = vmul.f32 %v5840_v7, %v5762_v42  ;;  %v3225_v7 = vmul.f32 %v5848_v38, %v5779_v4 }
0x12da   : > { %v4460_v21 = vpop.eup %4459 }
0x12db   : > { %3200 = vrot.lane.b32.xlu1 %v4460_v21, %s4615_s28  ;;  %v3176_v21 = vsub.f32 1.0, %v5844_v32 }
0x12dc   : > { %v4462_v52 = vpop.eup %4461 }
0x12dd   : > { %3202 = vrot.lane.b32.xlu0 %v4462_v52, %s4615_s28 }
0x1341   : > { %v3189_v54 = vpop.permute.xlu1 %3188 }
0x1342   : > { %v3212_v37 = vmul.f32 %v3189_v54, %v3172_v56  ;;  %v3177_v54 = vsub.f32 1.0, %v5848_v38 }
0x1343   : > { %v3193_v26 = vpop.permute.xlu0 %3192 }
0x1344   : > { %v3214_v27 = vmul.f32 %v3193_v26, %v3174_v25  ;;  %v5897_v25 = vadd.f32 %v3220_v58, %v3212_v37 }
0x1345   : > { %v3191_v45 = vpop.permute.xlu1 %3190 }
0x1346   : > { %v3213_v2 = vmul.f32 %v3191_v45, %v3173_v28  ;;  %v5887_v35 = vadd.f32 %v3222_v51, %v3214_v27  ;;  %v3178_v51 = vsub.f32 1.0, %v5852_v11 }
0x1347   : > { %v3195_v29 = vpop.permute.xlu0 %3194 }
0x1348   : > { %v5889_v19 = vadd.f32 %v3221_v46, %v3213_v2  ;;  %v3215_v44 = vmul.f32 %v3195_v29, %v3175_v61  ;;  %v3293_v27 = vrot.slane %v5887_v35, 6  ;;  %v3226_v61 = vmul.f32 %v5852_v11, %v5784_v34 }
0x1349   : > { %v3197_v52 = vpop.permute.xlu1 %3196  ;;  %v3179_v29 = vsub.f32 1.0, %v5856_v31 }
0x134a   : > { %v3291_v1 = vrot.slane %v5889_v19, 7  ;;  %v5900_v26 = vadd.f32 %v3223_v22, %v3215_v44  ;;  %v3216_v56 = vmul.f32 %v3197_v52, %v3176_v21 }
0x134b   : > { %v3199_v28 = vpop.permute.xlu0 %3198 }
0x134c   : > { %v3292_v32 = vsel %vm558_vm2, %v3291_v1, %v5897_v25  ;;  %v3295_v45 = vrot.slane %v5900_v26, 5  ;;  %v5909_v37 = vadd.f32 %v3224_v43, %v3216_v56  ;;  %v3217_v46 = vmul.f32 %v3199_v28, %v3177_v54 }
0x134d   : > { %v3294_v2 = vsel %vm561_vm3, %v3293_v27, %v3292_v32  ;;  %v3201_v58 = vpop.permute.xlu1 %3200  ;;  %v3227_v43 = vmul.f32 %v5856_v31, %v5788_v9 }
0x134e   : > { %v3296_v38 = vsel %vm564_vm4, %v3295_v45, %v3294_v2  ;;  %v3297_v22 = vrot.slane %v5909_v37, 4  ;;  %v5917_v44 = vadd.f32 %v3225_v7, %v3217_v46  ;;  %v3218_v21 = vmul.f32 %v3201_v58, %v3178_v51 }
0x134f   : > { %v3203_v52 = vpop.permute.xlu0 %3202 }
0x1350   : > { %v3299_v54 = vrot.slane %v5917_v44, 3  ;;  %v5922_v1 = vadd.f32 %v3226_v61, %v3218_v21  ;;  %v3219_v56 = vmul.f32 %v3203_v52, %v3179_v29  ;;  %v3298_v11 = vsel %vm567_vm5, %v3297_v22, %v3296_v38 }
0x1352   : > { %6432 = vst [vmem:[#allocation30_spill] sm:$0xff] %v5922_v1  ;;  %v3301_v27 = vrot.slane %v5922_v1, 2  ;;  %v5926_v28 = vadd.f32 %v3227_v43, %v3219_v56  ;;  %v3300_v32 = vsel %vm570_vm6, %v3299_v54, %v3298_v11  ;;  %v5943_v54 = vld [vmem:[#allocation2 + $0x7] sm:$0x1] }
0x1354   : > { %6433 = vst [vmem:[#allocation31_spill] sm:$0xff] %v5926_v28  ;;  %v3303_v7 = vrot.slane %v5926_v28, 1  ;;  %v3302_v51 = vsel %vm573_vm7, %v3301_v27, %v3300_v32  ;;  %v5946_v27 = vld [vmem:[#allocation2 + $0x17] sm:$0x1] }
0x1356   : > { %v3304_v31 = vsel %vm576_vm8, %v3303_v7, %v3302_v51  ;;  %v5949_v51 = vld [vmem:[#allocation2 + $0xf] sm:$0x1] }
0x1357   : > { %3305 = vrot.lane.b32.xlu1 %v3304_v31, %s4615_s28 }
0x13c9   : > { %v3306_v45 = vpop.permute.xlu1 %3305 }
0x13ca   : > { %4011 = vmatmul.mubr.msk.f32.vlgmr.msra.gmra.mrb[14].mxu0 %vm390_vm1, %v3306_v45 }
0x149d   : > { %v3375_v46 = vpop.f32.mrb[14].mxu0 }
0x149e   : > { %v4012_v2 = vpop.f32.mrb[15].mxu0  ;;  %v3451_v61 = vadd.f32 %v3375_v46, %v4907_v5  ;;  %v3381_v52 = vrot.slane %v3375_v46, 2  ;;  %v3380_v56 = vrot.slane %v3375_v46, 1  ;;  %v3395_v11 = vadd.f32 %v3375_v46, %v5943_v54 }
0x149f   : > { %v3382_v32 = vrot.slane %v3375_v46, 3  ;;  %v3383_v31 = vrot.slane %v3375_v46, 4  ;;  %v3386_v9 = vrot.slane %v3375_v46, 7 }
0x14a0   : > { %3460 = vrot.lane.b32.xlu0 %v3451_v61, %s4613_s10  ;;  %v3454_v58 = vrot.slane %v3451_v61, 2  ;;  %v3453_v29 = vrot.slane %v3451_v61, 1  ;;  %v3455_v38 = vrot.slane %v3451_v61, 3  ;;  %v3456_v22 = vrot.slane %v3451_v61, 4 }
0x14a1   : > { %v3457_v21 = vrot.slane %v3451_v61, 5  ;;  %v3458_v43 = vrot.slane %v3451_v61, 6  ;;  %v3459_v5 = vrot.slane %v3451_v61, 7  ;;  %v3397_v7 = vadd.f32 %v3381_v52, %v5946_v27  ;;  %v5952_v61 = vld [vmem:[#allocation2 + $0x1f] sm:$0x1] }
0x14a2   : > { %3464 = vrot.lane.b32.xlu1 %v3454_v58, %s4613_s10  ;;  %v3396_v45 = vadd.f32 %v3380_v56, %v5949_v51  ;;  %v3825_v2 = vmul.f32 -1.442695, %v3395_v11  ;;  %v3384_v58 = vrot.slane %v3375_v46, 5  ;;  %v5958_v52 = vld [vmem:[#allocation2 + $0x2f] sm:$0x1] }
0x14a3   : > { %v5961_v11 = vld [vmem:[#allocation2 + $0x37] sm:$0x1] }
0x14a4   : > { %3462 = vrot.lane.b32.xlu0 %v3453_v29, %s4613_s10  ;;  %v3398_v29 = vadd.f32 %v3382_v32, %v5952_v61  ;;  %4463 = vpow2.f32 %v3825_v2  ;;  %v3400_v34 = vadd.f32 %v3384_v58, %v5958_v52 }
0x14a6   : > { %3466 = vrot.lane.b32.xlu1 %v3455_v38, %s4613_s10  ;;  %v3827_v38 = vmul.f32 -1.442695, %v3397_v7  ;;  %v3828_v56 = vmul.f32 -1.442695, %v3398_v29  ;;  %v5964_v7 = vld [vmem:[#allocation2 + $0x3f] sm:$0x1] }
0x14a7   : > { %v3402_v47 = vadd.f32 %v3386_v9, %v5964_v7 }
0x14a8   : > { %3468 = vrot.lane.b32.xlu0 %v3456_v22, %s4613_s10  ;;  %v5955_v22 = vld [vmem:[#allocation2 + $0x27] sm:$0x1]  ;;  %4465 = vpow2.f32 %v3827_v38 }
0x14aa   : > { %3470 = vrot.lane.b32.xlu1 %v3457_v21, %s4613_s10  ;;  %v3385_v21 = vrot.slane %v3375_v46, 6  ;;  %v3832_v46 = vmul.f32 -1.442695, %v3402_v47 }
0x14ac   : > { %3472 = vrot.lane.b32.xlu0 %v3458_v43, %s4613_s10  ;;  %v3399_v43 = vadd.f32 %v3383_v31, %v5955_v22  ;;  %v3401_v4 = vadd.f32 %v3385_v21, %v5961_v11  ;;  %v3830_v31 = vmul.f32 -1.442695, %v3400_v34 }
0x14ae   : > { %3474 = vrot.lane.b32.xlu1 %v3459_v5, %s4613_s10  ;;  %v3826_v5 = vmul.f32 -1.442695, %v3396_v45  ;;  %v3829_v32 = vmul.f32 -1.442695, %v3399_v43  ;;  %v3831_v45 = vmul.f32 -1.442695, %v3401_v4  ;;  %v4464_v2 = vpop.eup %4463 }
0x14af   : > { %v3427_v29 = vadd.f32 1.0, %v4464_v2 }
0x14b0   : > { %4467 = vpow2.f32 %v3826_v5 }
0x14b1   : > { %4469 = vpow2.f32 %v3828_v56 }
0x14b2   : > { %4471 = vpow2.f32 %v3829_v32  ;;  %v4466_v58 = vpop.eup %4465 }
0x14b3   : > { %4473 = vpow2.f32 %v3830_v31  ;;  %v3429_v42 = vadd.f32 1.0, %v4466_v58 }
0x14b4   : > { %4475 = vpow2.f32 %v3831_v45 }
0x14b5   : > { %4477 = vpow2.f32 %v3832_v46 }
0x14b6   : > { %4479 = vrcp.f32 %v3427_v29 }
0x14b7   : > { %4481 = vrcp.f32 %v3429_v42 }
0x14ba   : > { %v4468_v38 = vpop.eup %4467 }
0x14bb   : > { %v4470_v21 = vpop.eup %4469  ;;  %v3428_v43 = vadd.f32 1.0, %v4468_v38 }
0x14bc   : > { %v4472_v5 = vpop.eup %4471  ;;  %v3430_v62 = vadd.f32 1.0, %v4470_v21 }
0x14bd   : > { %v4474_v9 = vpop.eup %4473  ;;  %4483 = vrcp.f32 %v3428_v43  ;;  %v3431_v34 = vadd.f32 1.0, %v4472_v5 }
0x14be   : > { %v4476_v56 = vpop.eup %4475  ;;  %4485 = vrcp.f32 %v3430_v62  ;;  %v3432_v4 = vadd.f32 1.0, %v4474_v9 }
0x14bf   : > { %v4478_v32 = vpop.eup %4477  ;;  %4487 = vrcp.f32 %v3431_v34  ;;  %v3433_v47 = vadd.f32 1.0, %v4476_v56 }
0x14c0   : > { %v5967_v31 = vpop.eup %4479  ;;  %4489 = vrcp.f32 %v3432_v4  ;;  %v3434_v2 = vadd.f32 1.0, %v4478_v32 }
0x14c1   : > { %v5970_v58 = vpop.eup %4481  ;;  %4491 = vrcp.f32 %v3433_v47 }
0x14c2   : > { %4493 = vrcp.f32 %v3434_v2 }
0x14c7   : > { %v5974_v62 = vpop.eup %4483 }
0x14c8   : > { %v5978_v43 = vpop.eup %4485 }
0x14c9   : > { %v5982_v34 = vpop.eup %4487 }
0x14ca   : > { %v5986_v32 = vpop.eup %4489 }
0x14cb   : > { %v5990_v2 = vpop.eup %4491 }
0x14cc   : > { %6434 = vst [vmem:[#allocation32_spill] sm:$0xff] %v5990_v2 }
0x1512   : > { %v3461_v45 = vpop.permute.xlu0 %3460 }
0x1513   : > { %v3484_v46 = vmul.f32 %v5967_v31, %v3461_v45 }
0x1514   : > { %v3465_v42 = vpop.permute.xlu1 %3464 }
0x1515   : > { %v3486_v29 = vmul.f32 %v5970_v58, %v3465_v42  ;;  %3500 = vrot.lane.b32.xlu0 %v3484_v46, %s4613_s10 }
0x1516   : > { %v3463_v38 = vpop.permute.xlu0 %3462 }
0x1517   : > { %v3485_v21 = vmul.f32 %v5974_v62, %v3463_v38  ;;  %3504 = vrot.lane.b32.xlu1 %v3486_v29, %s4613_s10  ;;  %v5994_v29 = vpop.eup %4493 }
0x1518   : > { %v3467_v5 = vpop.permute.xlu1 %3466  ;;  %6435 = vst [vmem:[#allocation33_spill] sm:$0xff] %v5994_v29 }
0x1519   : > { %v3487_v9 = vmul.f32 %v5978_v43, %v3467_v5  ;;  %3502 = vrot.lane.b32.xlu0 %v3485_v21, %s4613_s10  ;;  %v3769_v5 = vld [vmem:[%s6372_s7] ss:$0 sm:$0xff] }
0x151a   : > { %v3469_v56 = vpop.permute.xlu0 %3468 }
0x151b   : > { %v3488_v4 = vmul.f32 %v5982_v34, %v3469_v56  ;;  %3506 = vrot.lane.b32.xlu1 %v3487_v9, %s4613_s10 }
0x151c   : > { %v3471_v47 = vpop.permute.xlu1 %3470 }
0x151d   : > { %v3489_v45 = vmul.f32 %v5986_v32, %v3471_v47  ;;  %3508 = vrot.lane.b32.xlu0 %v3488_v4, %s4613_s10 }
0x151e   : > { %v3473_v46 = vpop.permute.xlu0 %3472 }
0x151f   : > { %v3490_v42 = vmul.f32 %v5990_v2, %v3473_v46  ;;  %3510 = vrot.lane.b32.xlu1 %v3489_v45, %s4613_s10 }
0x1520   : > { %v3475_v38 = vpop.permute.xlu1 %3474 }
0x1521   : > { %v3491_v21 = vmul.f32 %v5994_v29, %v3475_v38  ;;  %3512 = vrot.lane.b32.xlu0 %v3490_v42, %s4613_s10 }
0x1523   : > { %3514 = vrot.lane.b32.xlu1 %v3491_v21, %s4613_s10  ;;  %s6444_s10 = sshll.u32 %s4775_s18, 3 }
0x1524   : > { %s6168_s20 = scalar_lea.vmem [#allocation7], %s6444_s10 }
0x1525   : > { %1024 = vrot.lane.b32.xlu0 %v3769_v5, %s4614_s17  ;;  %s3657_s27 = sshll.u32 %s6168_s20, 4  ;;  %s3644_s17 = scalar_lea.sflag [#allocation6], %s4775_s18  ;;  %s6322_s27 = int_to_ptr.vmem [resolvable:$true] %s3657_s27 }
0x1526   : > { %p4548_p10 = scmp.lt.s32.totalorder %s6322_s27, %s4546_s24 }
0x1587   : > { %v3501_v9 = vpop.permute.xlu0 %3500 }
0x1588   : > { %v3524_v45 = vadd.f32 %v3501_v9, %v5943_v54 }
0x1589   : > { %v3505_v29 = vpop.permute.xlu1 %3504 }
0x158a   : > { %4495 = vtanh.f32 %v3524_v45  ;;  %v3526_v2 = vadd.f32 %v3505_v29, %v5946_v27 }
0x158b   : > { %v3503_v56 = vpop.permute.xlu0 %3502 }
0x158f   : > { %v3509_v4 = vpop.permute.xlu0 %3508 }
0x1593   : > { %v3513_v47 = vpop.permute.xlu0 %3512 }
0x1597   : > { %v6004_v46 = vpop.permute.xlu0 %1024 }
0x1598   : > { %v1028_v38 = vmul.f32 %v6004_v46, %v5036_v60  ;;  %v1029_v42 = vmul.f32 %v6004_v46, %v5039_v63  ;;  %v1030_v8 = vmul.f32 %v6004_v46, %v5047_v12  ;;  %v1031_v21 = vmul.f32 %v6004_v46, %v5050_v14 }
0x1599   : > { %v1027_v5 = vmul.f32 %v6004_v46, %v5053_v16  ;;  %v1032_v54 = vmul.f32 %v6004_v46, %v5055_v41  ;;  %v1033_v60 = vmul.f32 %v6004_v46, %v5060_v6  ;;  %v3525_v63 = vadd.f32 %v3503_v56, %v5949_v51  ;;  %v3507_v56 = vpop.permute.xlu1 %3506 }
0x159a   : > { %v1043_v9 = vrot.slane %v1028_v38, 7  ;;  %v1045_v28 = vrot.slane %v1029_v42, 6  ;;  %v1034_v12 = vmul.f32 %v6004_v46, %v5068_v20  ;;  %v1047_v0 = vrot.slane %v1030_v8, 5 }
0x159b   : > { %v1049_v1 = vrot.slane %v1031_v21, 4  ;;  %v1051_v38 = vrot.slane %v1032_v54, 3  ;;  %v1053_v42 = vrot.slane %v1033_v60, 2  ;;  %4497 = vtanh.f32 %v3525_v63 }
0x159c   : > { %v1044_v14 = vsel %vm558_vm2, %v1043_v9, %v1027_v5  ;;  %v1055_v51 = vrot.slane %v1034_v12, 1  ;;  %4499 = vtanh.f32 %v3526_v2  ;;  %v3530_v2 = vadd.f32 %v3513_v47, %v5961_v11 }
0x159d   : > { %v1046_v16 = vsel %vm561_vm3, %v1045_v28, %v1044_v14  ;;  %v4496_v28 = vpop.eup %4495  ;;  %v3511_v27 = vpop.permute.xlu1 %3510  ;;  %v1397_v11 = vmul.f32 %v5177_v39, %v6004_v46  ;;  %v1765_v14 = vmul.f32 %v5321_v57, %v6004_v46  ;;  %v1399_v39 = vmul.f32 %v5188_v18, %v6004_v46 }
0x159e   : > { %v1048_v41 = vsel %vm564_vm4, %v1047_v0, %v1046_v16  ;;  %v3527_v0 = vadd.f32 %v3507_v56, %v5952_v61  ;;  %v3529_v21 = vadd.f32 %v3511_v27, %v5958_v52  ;;  %v1396_v16 = vmul.f32 %v5185_v48, %v6004_v46 }
0x159f   : > { %v1050_v45 = vsel %vm567_vm5, %v1049_v1, %v1048_v41  ;;  %v3528_v1 = vadd.f32 %v3509_v4, %v5955_v22  ;;  %v1412_v12 = vrot.slane %v1397_v11, 7  ;;  %v1400_v57 = vmul.f32 %v5197_v50, %v6004_v46 }
0x15a0   : > { %v1052_v6 = vsel %vm570_vm6, %v1051_v38, %v1050_v45  ;;  %4501 = vtanh.f32 %v3527_v0  ;;  %v1766_v38 = vmul.f32 %v5319_v3, %v6004_v46  ;;  %v1416_v48 = vrot.slane %v1399_v39, 5  ;;  %v6436_v39 = vld [vmem:[#allocation10_spill] sm:$0xff] }
0x15a1   : > { %v1054_v20 = vsel %vm573_vm7, %v1053_v42, %v1052_v6  ;;  %4503 = vtanh.f32 %v3528_v1  ;;  %v3515_v61 = vpop.permute.xlu1 %3514  ;;  %v1413_v45 = vsel %vm558_vm2, %v1412_v12, %v1396_v16  ;;  %v1764_v42 = vmul.f32 %v5329_v53, %v6004_v46 }
0x15a2   : > { %v1056_v8 = vsel %vm576_vm8, %v1055_v51, %v1054_v20  ;;  %4505 = vtanh.f32 %v3529_v21  ;;  %v3531_v22 = vadd.f32 %v3515_v61, %v5964_v7  ;;  %v1398_v7 = vmul.f32 %v5175_v10, %v6004_v46 }
0x15a3   : > { %1057 = vrot.lane.b32.xlu1 %v1056_v8, %s4615_s28  ;;  %4507 = vtanh.f32 %v3530_v2  ;;  %v1780_v10 = vrot.slane %v1765_v14, 7  ;;  %v1782_v51 = vrot.slane %v1766_v38, 6  ;;  %v1767_v56 = vmul.f32 %v5332_v36, %v6004_v46 }
0x15a4   : > { %4509 = vtanh.f32 %v3531_v22  ;;  %v1414_v41 = vrot.slane %v1398_v7, 6  ;;  %v1401_v18 = vmul.f32 %v5204_v55, %v6004_v46  ;;  %v1418_v8 = vrot.slane %v1400_v57, 4 }
0x15a5   : > { %v4498_v29 = vpop.eup %4497  ;;  %v1781_v3 = vsel %vm558_vm2, %v1780_v10, %v1764_v42  ;;  %v1768_v53 = vmul.f32 %v5341_v40, %v6004_v46  ;;  %v1784_v0 = vrot.slane %v1767_v56, 5  ;;  %v1769_v27 = vmul.f32 %v5348_v49, %v6004_v46  ;;  %v6438_v56 = vld [vmem:[#allocation11_spill] sm:$0xff] }
0x15a6   : > { %v4500_v5 = vpop.eup %4499  ;;  %v1415_v6 = vsel %vm561_vm3, %v1414_v41, %v1413_v45  ;;  %v1783_v50 = vsel %vm561_vm3, %v1782_v51, %v1781_v3  ;;  %v1420_v36 = vrot.slane %v1401_v18, 3  ;;  %v1403_v21 = vmul.f32 %v5214_v33, %v6004_v46 }
0x15a7   : > { %3556 = vrot.lane.b32.xlu1 %v4496_v28, %s4615_s28  ;;  %v1417_v20 = vsel %vm564_vm4, %v1416_v48, %v1415_v6  ;;  %v1402_v28 = vmul.f32 %v5210_v13, %v6004_v46  ;;  %v1785_v55 = vsel %vm564_vm4, %v1784_v0, %v1783_v50  ;;  %v1770_v2 = vmul.f32 %v5354_v15, %v6004_v46  ;;  %v6437_v6 = vld [vmem:[#allocation15_spill] sm:$0xff] }
0x15a8   : > { %v1419_v1 = vsel %vm567_vm5, %v1418_v8, %v1417_v20  ;;  %v1788_v61 = vrot.slane %v1769_v27, 3  ;;  %v1424_v22 = vrot.slane %v1403_v21, 1  ;;  %v1771_v49 = vmul.f32 %v5358_v24, %v6004_v46 }
0x15a9   : > { %v1421_v40 = vsel %vm570_vm6, %v1420_v36, %v1419_v1  ;;  %v2133_v24 = vmul.f32 %v5465_v17, %v6004_v46  ;;  %v2132_v16 = vmul.f32 %v5473_v30, %v6004_v46  ;;  %v2501_v38 = vmul.f32 %v5608_v23, %v6004_v46  ;;  %v6439_v36 = vld [vmem:[#allocation12_spill] sm:$0xff] }
0x15aa   : > { %v4502_v54 = vpop.eup %4501  ;;  %v2135_v45 = vmul.f32 %v6436_v39, %v6004_v46  ;;  %v3540_v17 = vsub.f32 1.0, %v5967_v31  ;;  %v3541_v42 = vsub.f32 1.0, %v5974_v62  ;;  %v6121_v30 = vmul.f32 %v5974_v62, %v5889_v19 }
0x15ab   : > { %3558 = vrot.lane.b32.xlu1 %v4498_v29, %s4615_s28  ;;  %v4504_v4 = vpop.eup %4503  ;;  %v1786_v29 = vrot.slane %v1768_v53, 4  ;;  %v2148_v14 = vrot.slane %v2133_v24, 7  ;;  %v3542_v57 = vsub.f32 1.0, %v5970_v58  ;;  %v2502_v51 = vmul.f32 %v6437_v6, %v6004_v46  ;;  %v6445_v24 = vld [vmem:[#allocation13_spill] sm:$0xff]  ;;  %v6447_v6 = vld [vmem:[#allocation18_spill] sm:$0xff] }
0x15ac   : > { %v4506_v9 = vpop.eup %4505  ;;  %v6128_v48 = vstv %s680_s30  ;;  %v2136_v3 = vmul.f32 %v6438_v56, %v6004_v46  ;;  %v2516_v20 = vrot.slane %v2501_v38, 7  ;;  %v6135_v8 = vmul.f32 %v5970_v58, %v5887_v35 }
0x15ad   : > { %v4508_v52 = vpop.eup %4507  ;;  %v1787_v13 = vsel %vm567_vm5, %v1786_v29, %v1785_v55  ;;  %v2149_v10 = vsel %vm558_vm2, %v2148_v14, %v2132_v16  ;;  %v3543_v53 = vsub.f32 1.0, %v5978_v43  ;;  %v6140_v50 = vmul.f32 %v5978_v43, %v5900_v26  ;;  %v6440_v55 = vld [vmem:[#allocation16_spill] sm:$0xff]  ;;  %v6446_v16 = vld [vmem:[#allocation14_spill] sm:$0xff] }
0x15ae   : > { %v4510_v60 = vpop.eup %4509  ;;  %v2152_v0 = vrot.slane %v2135_v45, 5  ;;  %v2137_v27 = vmul.f32 %v6439_v36, %v6004_v46  ;;  %v2500_v29 = vmul.f32 %v6440_v55, %v6004_v46  ;;  %v6149_v21 = vmul.f32 %v5982_v34, %v5909_v37 }
0x15af   : > { %3560 = vrot.lane.b32.xlu1 %v4500_v5, %s4615_s28  ;;  %v1422_v5 = vrot.slane %v1402_v28, 2  ;;  %v3544_v28 = vsub.f32 1.0, %v5982_v34  ;;  %v3237_v45 = vmul.f32 %v5889_v19, %v6004_v46  ;;  %v3241_v58 = vmul.f32 %v5917_v44, %v6004_v46 }
0x15b0   : > { %v2156_v39 = vrot.slane %v2137_v27, 3  ;;  %v6451_v27 = vld [vmem:[#allocation20_spill] sm:$0xff] }
0x15b1   : > { %v2506_v55 = vmul.f32 %v6451_v27, %v6004_v46  ;;  %v3236_v27 = vmul.f32 %v5897_v25, %v6004_v46 }
0x15b3   : > { %3562 = vrot.lane.b32.xlu1 %v4502_v54, %s4615_s28  ;;  %v1423_v54 = vsel %vm573_vm7, %v1422_v5, %v1421_v40 }
0x15b4   : > { %v1425_v33 = vsel %vm576_vm8, %v1424_v22, %v1423_v54  ;;  %v6441_v54 = vld [vmem:[#allocation17_spill] sm:$0xff] }
0x15b5   : > { %v2503_v22 = vmul.f32 %v6441_v54, %v6004_v46 }
0x15b7   : > { %3564 = vrot.lane.b32.xlu1 %v4504_v4, %s4615_s28  ;;  %v1789_v4 = vsel %vm570_vm6, %v1788_v61, %v1787_v13  ;;  %v3545_v13 = vsub.f32 1.0, %v5986_v32  ;;  %v2154_v61 = vrot.slane %v2136_v3, 4  ;;  %v6448_v3 = vld [vmem:[#allocation23_spill] sm:$0xff]  ;;  %v2520_v19 = vrot.slane %v2503_v22, 5  ;;  %v6454_v22 = vld [vmem:[#allocation22_spill] sm:$0xff] }
0x15bb   : > { %3566 = vrot.lane.b32.xlu1 %v4506_v9, %s4615_s28  ;;  %v1790_v9 = vrot.slane %v1770_v2, 2  ;;  %v2518_v2 = vrot.slane %v2502_v51, 6  ;;  %v2504_v51 = vmul.f32 %v6447_v6, %v6004_v46 }
0x15bf   : > { %3568 = vrot.lane.b32.xlu1 %v4508_v52, %s4615_s28  ;;  %v1791_v52 = vsel %vm573_vm7, %v1790_v9, %v1789_v4  ;;  %v6159_v4 = vmul.f32 %v5986_v32, %v5917_v44 }
0x15c3   : > { %3570 = vrot.lane.b32.xlu1 %v4510_v60, %s4615_s28  ;;  %v1792_v60 = vrot.slane %v1771_v49, 1  ;;  %v2517_v49 = vsel %vm558_vm2, %v2516_v20, %v2500_v29  ;;  %v6449_v20 = vld [vmem:[#allocation33_spill] sm:$0xff]  ;;  %v6452_v29 = vld [vmem:[#allocation31_spill] sm:$0xff] }
0x15c4   : > { %v2519_v56 = vsel %vm561_vm3, %v2518_v2, %v2517_v49  ;;  %v6453_v49 = vld [vmem:[#allocation21_spill] sm:$0xff] }
0x15c5   : > { %v1793_v15 = vsel %vm576_vm8, %v1792_v60, %v1791_v52  ;;  %v6443_v60 = vld [vmem:[#allocation30_spill] sm:$0xff] }
0x1615   : > { %v1058_v47 = vpop.permute.xlu1 %1057 }
0x1616   : > { %v1060_v63 = vsel %vm390_vm1, %v1058_v47, 0.0 }
0x1617   : > { %1061 = vadd.xlane.f32.xlu0 %v1060_v63  ;;  %v2134_v63 = vmul.f32 %v5463_v59, %v6004_v46  ;;  %v6116_v59 = vmul.f32 %v5967_v31, %v5897_v25  ;;  %v3260_v31 = vrot.slane %v3241_v58, 3 }
0x1619   : > { %v6094_v11 = vpop.permute.xlu1 %3556  ;;  %v2150_v41 = vrot.slane %v2134_v63, 6  ;;  %v2138_v63 = vmul.f32 %v6445_v24, %v6004_v46  ;;  %v6199_v24 = vmul.f32 %v6453_v49, %v6004_v46  ;;  %v6455_v49 = vld [vmem:[#allocation24_spill] sm:$0xff] }
0x161b   : > { %v2151_v18 = vsel %vm561_vm3, %v2150_v41, %v2149_v10  ;;  %v2139_v41 = vmul.f32 %v6446_v16, %v6004_v46  ;;  %v2158_v2 = vrot.slane %v2138_v63, 2  ;;  %v3252_v16 = vrot.slane %v3237_v45, 7 }
0x161c   : > { %v2153_v5 = vsel %vm564_vm4, %v2152_v0, %v2151_v18  ;;  %v2869_v18 = vmul.f32 %v6448_v3, %v6004_v46  ;;  %v3547_v0 = vsub.f32 1.0, %v6449_v20  ;;  %v3239_v45 = vmul.f32 %v5900_v26, %v6004_v46  ;;  %v6456_v26 = vld [vmem:[#allocation25_spill] sm:$0xff] }
0x161d   : > { %v6096_v47 = vpop.permute.xlu1 %3558  ;;  %v2155_v38 = vsel %vm567_vm5, %v2154_v61, %v2153_v5  ;;  %v3238_v61 = vmul.f32 %v5887_v35, %v6004_v46 }
0x161e   : > { %v2157_v5 = vsel %vm570_vm6, %v2156_v39, %v2155_v38  ;;  %v2522_v38 = vrot.slane %v2504_v51, 4  ;;  %v2884_v63 = vrot.slane %v2869_v18, 7  ;;  %v2528_v51 = vrot.slane %v6199_v24, 1 }
0x161f   : > { %v2159_v35 = vsel %vm573_vm7, %v2158_v2, %v2157_v5  ;;  %v3253_v18 = vsel %vm558_vm2, %v3252_v16, %v3236_v27  ;;  %v2871_v5 = vmul.f32 %v6456_v26, %v6004_v46  ;;  %v3256_v24 = vrot.slane %v3239_v45, 5 }
0x1621   : > { %v6098_v7 = vpop.permute.xlu1 %3560 }
0x1622   : > { %v3582_v25 = vmul.f32 %v6098_v7, %v3542_v57 }
0x1624   : > { %v3598_v34 = vadd.f32 %v6135_v8, %v3582_v25  ;;  %v6458_v8 = vld [vmem:[#allocation27_spill] sm:$0xff] }
0x1625   : > { %v6104_v12 = vpop.permute.xlu1 %3562 }
0x1626   : > { %v3583_v62 = vmul.f32 %v6104_v12, %v3543_v53 }
0x1628   : > { %v3599_v32 = vadd.f32 %v6140_v50, %v3583_v62 }
0x1629   : > { %v6124_v23 = vpop.permute.xlu1 %3564 }
0x162a   : > { %v3584_v7 = vmul.f32 %v6124_v23, %v3544_v28 }
0x162c   : > { %v3600_v16 = vadd.f32 %v6149_v21, %v3584_v7  ;;  %v6459_v21 = vld [vmem:[#allocation28_spill] sm:$0xff] }
0x162d   : > { %1426 = vrot.lane.b32.xlu0 %v1425_v33, %s4615_s28  ;;  %v3567_v9 = vpop.permute.xlu1 %3566  ;;  %v6442_v33 = vld [vmem:[#allocation32_spill] sm:$0xff] }
0x162e   : > { %v3546_v52 = vsub.f32 1.0, %v6442_v33  ;;  %v3585_v53 = vmul.f32 %v3567_v9, %v3545_v13 }
0x1631   : > { %1794 = vrot.lane.b32.xlu0 %v1793_v15, %s4615_s28  ;;  %v6164_v15 = vmul.f32 %v6442_v33, %v6443_v60  ;;  %v3569_v6 = vpop.permute.xlu1 %3568 }
0x1632   : > { %v3586_v23 = vmul.f32 %v3569_v6, %v3546_v52  ;;  %v3601_v6 = vadd.f32 %v6159_v4, %v3585_v53  ;;  %v3608_v4 = vmul.f32 %v3600_v16, %v6004_v46 }
0x1635   : > { %v3571_v57 = vpop.permute.xlu1 %3570 }
0x1636   : > { %v3587_v13 = vmul.f32 %v3571_v57, %v3547_v0  ;;  %v2874_v0 = vmul.f32 %v6459_v21, %v6004_v46 }
0x1638   : > { %v2894_v25 = vrot.slane %v2874_v0, 2 }
0x16a4   : > { %v1062_v1 = vpop.xlane.xlu0 %1061 }
0x16a5   : > { %v1064_v40 = vadd.f32 %v6128_v48, %v1062_v1  ;;  %v6450_v1 = vld [vmem:[#allocation19_spill] sm:$0xff] }
0x16a6   : > { %v2505_v36 = vmul.f32 %v6450_v1, %v6004_v46  ;;  %v2526_v1 = vrot.slane %v2506_v55, 2 }
0x16a7   : > { %1066 = vst.msk [vmem:[%s6168_s20] sm:$0xff] %vm1065_vm10, %v1064_v40  ;;  %v6192_v40 = vmul.f32 %v6449_v20, %v6452_v29  ;;  %v2160_v20 = vrot.slane %v2139_v41, 1  ;;  %v3581_v41 = vmul.f32 %v6096_v47, %v3541_v42  ;;  %v3240_v42 = vmul.f32 %v5909_v37, %v6004_v46  ;;  %v6457_v37 = vld [vmem:[#allocation26_spill] sm:$0xff] }
0x16a8   : > { %v1427_v14 = vpop.permute.xlu0 %1426  ;;  %v2524_v39 = vrot.slane %v2505_v36, 3 }
0x16a9   : > { %v1429_v10 = vsel %vm390_vm1, %v1427_v14, 0.0  ;;  %v2521_v14 = vsel %vm564_vm4, %v2520_v19, %v2519_v56  ;;  %v3254_v19 = vrot.slane %v3238_v61, 6  ;;  %v2161_v55 = vsel %vm576_vm8, %v2160_v20, %v2159_v35 }
0x16aa   : > { %1430 = vadd.xlane.f32.xlu1 %v1429_v10  ;;  %v2870_v10 = vmul.f32 %v6454_v22, %v6004_v46  ;;  %v2523_v56 = vsel %vm567_vm5, %v2522_v38, %v2521_v14  ;;  %v3242_v61 = vmul.f32 %v6443_v60, %v6004_v46  ;;  %v3597_v12 = vadd.f32 %v6121_v30, %v3581_v41 }
0x16ab   : > { %v2525_v47 = vsel %vm570_vm6, %v2524_v39, %v2523_v56  ;;  %v3255_v43 = vsel %vm561_vm3, %v3254_v19, %v3253_v18  ;;  %v2872_v14 = vmul.f32 %v6457_v37, %v6004_v46  ;;  %v2888_v60 = vrot.slane %v2871_v5, 5 }
0x16ac   : > { %v1795_v54 = vpop.permute.xlu0 %1794  ;;  %v2886_v36 = vrot.slane %v2870_v10, 6  ;;  %v2527_v28 = vsel %vm573_vm7, %v2526_v1, %v2525_v47  ;;  %v3580_v30 = vmul.f32 %v6094_v11, %v3540_v17  ;;  %v3257_v9 = vsel %vm564_vm4, %v3256_v24, %v3255_v43 }
0x16ad   : > { %v1797_v3 = vsel %vm390_vm1, %v1795_v54, 0.0  ;;  %v2868_v54 = vmul.f32 %v6455_v49, %v6004_v46  ;;  %v3258_v22 = vrot.slane %v3240_v42, 4  ;;  %v2873_v10 = vmul.f32 %v6458_v8, %v6004_v46  ;;  %v6460_v49 = vld [vmem:[#allocation29_spill] sm:$0xff] }
0x16ae   : > { %1798 = vadd.xlane.f32.xlu0 %v1797_v3  ;;  %v3605_v52 = vmul.f32 %v3597_v12, %v6004_v46  ;;  %v2890_v3 = vrot.slane %v2872_v14, 4  ;;  %v3606_v11 = vmul.f32 %v3598_v34, %v6004_v46  ;;  %v3602_v17 = vadd.f32 %v6164_v15, %v3586_v23 }
0x16af   : > { %v2885_v2 = vsel %vm558_vm2, %v2884_v63, %v2868_v54  ;;  %v3259_v50 = vsel %vm567_vm5, %v3258_v22, %v3257_v9  ;;  %v3596_v20 = vadd.f32 %v6116_v59, %v3580_v30  ;;  %v3607_v38 = vmul.f32 %v3599_v32, %v6004_v46 }
0x16b0   : > { %v2887_v44 = vsel %vm561_vm3, %v2886_v36, %v2885_v2  ;;  %v3603_v63 = vadd.f32 %v6192_v40, %v3587_v13  ;;  %v3243_v15 = vmul.f32 %v6452_v29, %v6004_v46  ;;  %v3262_v39 = vrot.slane %v3242_v61, 2 }
0x16b1   : > { %v2889_v33 = vsel %vm564_vm4, %v2888_v60, %v2887_v44  ;;  %v2892_v1 = vrot.slane %v2873_v10, 3  ;;  %v3620_v27 = vrot.slane %v3605_v52, 7  ;;  %v3609_v56 = vmul.f32 %v3601_v6, %v6004_v46 }
0x16b2   : > { %v2891_v35 = vsel %vm567_vm5, %v2890_v3, %v2889_v33  ;;  %v2529_v59 = vsel %vm576_vm8, %v2528_v51, %v2527_v28  ;;  %v3261_v45 = vsel %vm570_vm6, %v3260_v31, %v3259_v50  ;;  %v3622_v19 = vrot.slane %v3606_v11, 6 }
0x16b3   : > { %v3610_v40 = vmul.f32 %v3602_v17, %v6004_v46  ;;  %v2875_v54 = vmul.f32 %v6460_v49, %v6004_v46  ;;  %v2893_v41 = vsel %vm570_vm6, %v2892_v1, %v2891_v35  ;;  %v3604_v18 = vmul.f32 %v3596_v20, %v6004_v46 }
0x16b4   : > { %v3624_v29 = vrot.slane %v3607_v38, 5  ;;  %v3611_v36 = vmul.f32 %v3603_v63, %v6004_v46  ;;  %v3263_v51 = vsel %vm573_vm7, %v3262_v39, %v3261_v45  ;;  %v3628_v5 = vrot.slane %v3609_v56, 3 }
0x16b5   : > { %v3621_v26 = vsel %vm558_vm2, %v3620_v27, %v3604_v18  ;;  %v3264_v2 = vrot.slane %v3243_v15, 1  ;;  %v2895_v62 = vsel %vm573_vm7, %v2894_v25, %v2893_v41  ;;  %v3630_v42 = vrot.slane %v3610_v40, 2 }
0x16b6   : > { %v3623_v47 = vsel %vm561_vm3, %v3622_v19, %v3621_v26  ;;  %v2896_v58 = vrot.slane %v2875_v54, 1  ;;  %v3632_v46 = vrot.slane %v3611_v36, 1 }
0x16b7   : > { %v3625_v7 = vsel %vm564_vm4, %v3624_v29, %v3623_v47  ;;  %v3265_v57 = vsel %vm576_vm8, %v3264_v2, %v3263_v51 }
0x16b8   : > { %v2897_v43 = vsel %vm576_vm8, %v2896_v58, %v2895_v62 }
0x16bb   : > { %2162 = vrot.lane.b32.xlu1 %v2161_v55, %s4615_s28  ;;  %v3626_v55 = vrot.slane %v3608_v4, 4 }
0x16bd   : > { %v3627_v61 = vsel %vm567_vm5, %v3626_v55, %v3625_v7 }
0x16be   : > { %v3629_v24 = vsel %vm570_vm6, %v3628_v5, %v3627_v61 }
0x16bf   : > { %2530 = vrot.lane.b32.xlu1 %v2529_v59, %s4615_s28  ;;  %v3631_v12 = vsel %vm573_vm7, %v3630_v42, %v3629_v24 }
0x16c0   : > { %v3633_v53 = vsel %vm576_vm8, %v3632_v46, %v3631_v12 }
0x16c3   : > { %3266 = vrot.lane.b32.xlu1 %v3265_v57, %s4615_s28 }
0x16c4   : > { %2898 = vrot.lane.b32.xlu0 %v2897_v43, %s4615_s28 }
0x16c7   : > { %3634 = vrot.lane.b32.xlu1 %v3633_v53, %s4615_s28  ;;  %s4541_s28 = scalar_lea.vmem %s6322_s27, 128 }
0x16c8   : > { %p4542_p6 = scmp.ne.s32.totalorder %s6322_s27, %s4541_s28  ;;  %p4549_p2 = scmp.lt.s32.totalorder %s4547_s21, %s4541_s28 }
0x16ca   : > { %p4543_p13 = pnand %p4542_p6, %p6461_p12  ;;  %p4550_p4 = por %p4549_p2, %p4548_p10 }
0x16cc   : > { %p4544_p7 = pneg %p4543_p13 }
0x16ce   : > { %p4551_p5 = pnand %p4550_p4, %p4544_p7 }
0x1737   : > { %v1431_v37 = vpop.xlane.xlu1 %1430 }
0x1738   : > { %v1432_v14 = vadd.f32 %v1431_v37, %v6128_v48 }
0x173a   : > { %1434 = vst.msk [vmem:[%s6168_s20] sm:$0xff] %vm1433_vm11, %v1432_v14 }
0x173b   : > { %v2163_v44 = vpop.permute.xlu1 %2162  ;;  %v1799_v34 = vpop.xlane.xlu0 %1798 }
0x173c   : > { %v2165_v23 = vsel %vm390_vm1, %v2163_v44, 0.0  ;;  %v1800_v28 = vadd.f32 %v1799_v34, %v6128_v48 }
0x173d   : > { %2166 = vadd.xlane.f32.xlu1 %v2165_v23 }
0x173e   : > { %1802 = vst.msk [vmem:[%s6168_s20] sm:$0xff] %vm1801_vm12, %v1800_v28 }
0x173f   : > { %v2531_v60 = vpop.permute.xlu1 %2530  ;;  %v2899_v30 = vpop.permute.xlu0 %2898 }
0x1740   : > { %v2533_v32 = vsel %vm390_vm1, %v2531_v60, 0.0  ;;  %v2901_v13 = vsel %vm390_vm1, %v2899_v30, 0.0 }
0x1741   : > { %2534 = vadd.xlane.f32.xlu0 %v2533_v32  ;;  %2902 = vadd.xlane.f32.xlu1 %v2901_v13 }
0x1743   : > { %v3267_v9 = vpop.permute.xlu1 %3266 }
0x1744   : > { %v3269_v16 = vsel %vm390_vm1, %v3267_v9, 0.0 }
0x1745   : > { %3270 = vadd.xlane.f32.xlu1 %v3269_v16 }
0x1747   : > { %v3635_v22 = vpop.permute.xlu1 %3634 }
0x1748   : > { %v3637_v8 = vsel %vm390_vm1, %v3635_v22, 0.0  ;;  %vm3641_vm1 = vcmask 64568  }
0x1749   : > { %3638 = vadd.xlane.f32.xlu0 %v3637_v8 }
0x17ca   : > { %v2167_v10 = vpop.xlane.xlu1 %2166 }
0x17cb   : > { %v2168_v33 = vadd.f32 %v2167_v10, %v6128_v48 }
0x17cd   : > { %2170 = vst.msk [vmem:[%s6168_s20] sm:$0xff] %vm2169_vm13, %v2168_v33 }
0x17ce   : > { %v2903_v52 = vpop.xlane.xlu1 %2902  ;;  %v2535_v6 = vpop.xlane.xlu0 %2534 }
0x17cf   : > { %v2904_v31 = vadd.f32 %v2903_v52, %v6128_v48  ;;  %v2536_v3 = vadd.f32 %v2535_v6, %v6128_v48 }
0x17d1   : > { %2538 = vst.msk [vmem:[%s6168_s20] sm:$0xff] %vm2537_vm14, %v2536_v3 }
0x17d2   : > { %v3271_v11 = vpop.xlane.xlu1 %3270  ;;  %2906 = vst.msk [vmem:[%s6168_s20] sm:$0xff] %vm2905_vm15, %v2904_v31 }
0x17d3   : > { %v3272_v17 = vadd.f32 %v3271_v11, %v6128_v48 }
0x17d5   : > { %3274 = vst.msk [vmem:[%s6168_s20] sm:$0xff] %vm3273_vm0, %v3272_v17 }
0x17d6   : > { %v3639_v50 = vpop.xlane.xlu0 %3638 }
0x17d7   : > { %v3640_v21 = vadd.f32 %v3639_v50, %v6128_v48 }
0x17d9   : > { %3642 = vst.msk [vmem:[%s6168_s20] sm:$0xff] %vm3641_vm1, %v3640_v21 }
0x17da   : > { %4554 = shalt.err (!%p4551_p5)
}
0x17db   : > { %s4555_s18 = scalar_lea.hbm %s6320_s15, 128  ;;  %s4559_s20 = scalar_lea.hbm %s6374_s9, 256 }
0x17dc   : > { %p4556_p8 = scmp.ne.s32.totalorder %s6320_s15, %s4555_s18  ;;  %p4560_p1 = scmp.lt.u32.totalorder %s6320_s15, %s6374_s9 }
0x17dd   : > { %p4561_p3 = scmp.lt.u32.totalorder %s4559_s20, %s4555_s18  ;;  %p4563_p6 = scmp.lt.u32.totalorder %s4555_s18, %s6320_s15 }
0x17de   : > { %p4557_p9 = pnand %p4556_p8, %p6461_p12 }
0x17df   : > { %p4562_p11 = por %p4561_p3, %p4560_p1 }
0x17e0   : > { %p4558_p0 = pneg %p4557_p9 }
0x17e1   : > { %p4564_p13 = por %p4563_p6, %p4562_p11 }
0x17e3   : > { %p4565_p7 = pnand %p4564_p13, %p4558_p0 }
0x17e5   : > { %4568 = shalt.err (!%p4565_p7)
}
0x17e6   : > { %4077 = dma.vmem_to_hbm [thread:$0]  (%p6461_p12), %s6322_s27, 128, %s6320_s15, %s3644_s17  }
0x17e7 PF: > { %s3669_s26 = sand.u32 1, %s4595_s11   ;;  %p6462_p10 = scmp.ne.s32.totalorder %s6408_s23, 0 }
0x17e8   : > { %p6463_p2 = scmp.ge.s32.totalorder %s4607_s14, 2  ;;  %s3670_s28 = scalar_lea.sflag [#allocation6], %s3669_s26 }
0x17ea   : > { %p4084_p4 = pnand %p6463_p2, %p6462_p10 }
0x17ec   : > { %4590 = dma.done.wait (!%p4084_p4), %s3670_s28, 128  }
0x17ed   : > { %4592 = vsyncadd (!%p4084_p4), %s3670_s28, 4294967168  ;;  %p23_p5 = scmp.ge.s32.totalorder %s4695_s16, 4   ;;  %s6464_s11 = smov %s4599_s12 }
0x17ee   : > { %s6465_s12 = smov %s4603_s13  ;;  %s6466_s13 = smov %s4707_s19 }
0x17ef   : > { %s6467_s14 = smov %s4695_s16  ;;  %25 = sbr.rel (!%p23_p5) target bundleno = 7 (0x7), region = 104 }
0x17f6   :  { %3675 = vsyncpa [#allocation5], 1 }
0x17f7   :  { %3677 = vsyncpa [#allocation5 + $0x1], 1 }
0x17f8   :  { %3678 = vsyncpa [#allocation6], 1 }
0x17f9   :  { %3680 = vsyncpa [#allocation6 + $0x1], 1 }

</bundles_post_ra>
